<compile_context>
chip_gen: v5e
topology: v5e:2x2
jax: 0.10.0
libtpu: 0.0.40
codegen_flags: <defaults>
</compile_context>

<pallas_src>
import functools
import math

import numpy as np
import jax
import jax.numpy as jnp
from jax.experimental import pallas as pl
from jax.experimental.pallas import tpu as pltpu

# ----------------------------- small config consistent with the module --------------------
EMB_DIM = 32          # embedding_dim
ATTN_DIM = 64         # attn_dim (d_model, dim_feedforward)
SPEC_DIM = 16         # spectrogram_dim
N_HEADS = 4
HEAD_DIM = ATTN_DIM // N_HEADS
N_BLOCKS = 2
N_POST = 2            # n_post_processing_steps
MAX_T = 16            # max_timesteps
BATCH = 2
SEQ = 8
LN_EPS = 1e-5
BN_EPS = 1e-5
NEG_BIG = -1e9        # additive mask value for cross-batch attention entries


def _layernorm(x, g, b, eps=LN_EPS):
    mu = jnp.mean(x, axis=-1, keepdims=True)
    var = jnp.mean((x - mu) ** 2, axis=-1, keepdims=True)
    return (x - mu) * jax.lax.rsqrt(var + eps) * g + b


def make_shift_mats(batch, seq):
    """0/1 matrices M_k with (M_k @ z)[r] = z[r + k - 2] within each length-`seq` batch
    segment, and 0 where the conv tap falls into the zero padding."""
    bs = batch * seq
    mats = np.zeros((5, bs, bs), np.float32)
    for k in range(5):
        off = k - 2
        for r in range(bs):
            t = r % seq
            if 0 <= t + off < seq:
                mats[k, r, r + off] = 1.0
    return jnp.asarray(mats)


def make_attn_mask(batch, seq):
    """Block-diagonal additive mask over the folded (B*S, B*S) score matrix: 0 inside a
    batch's own block, NEG_BIG across batches (so softmax stays per-batch)."""
    bs = batch * seq
    m = np.full((bs, bs), NEG_BIG, np.float32)
    for b in range(batch):
        m[b * seq:(b + 1) * seq, b * seq:(b + 1) * seq] = 0.0
    return jnp.asarray(m)


# ----------------------------- the single fused Pallas kernel -----------------------------
def decoder_kernel(*refs, treedef, n_blocks, n_post, n_heads):
    x_ref = refs[0]                               # (B*S, EMB_DIM)
    cor_ref, int_ref = refs[-2], refs[-1]         # (B*S, SPEC_DIM) each
    p = jax.tree_util.tree_unflatten(treedef, refs[1:-2])

    f32 = jnp.float32
    hd = p['wq'].shape[-1]
    scale = 1.0 / math.sqrt(hd)

    def conv_res(h2d, prefix, idx):
        """ConvResBlock (eval mode) on (B*S, Cin) activations."""
        c1_b = p[prefix + 'c1_b'][idx]
        c5_b = p[prefix + 'c5_b'][idx]
        g = p[prefix + 'bn_g'][idx]
        beta = p[prefix + 'bn_b'][idx]
        mean = p[prefix + 'bn_mean'][idx]
        var = p[prefix + 'bn_var'][idx]

        # kernel-size-1 conv == per-position linear (residual branch)
        res = jnp.dot(h2d, p[prefix + 'c1_wt'][idx], preferred_element_type=f32) + c1_b
        # kernel-size-5 conv, padding=2: per-tap matmul + MXU shift matrix (shift + pad).
        # Center tap (k=2) is the identity shift within the full B*S block -> skip it.
        acc = jnp.dot(h2d, p[prefix + 'c5_wt'][idx, 2], preferred_element_type=f32)
        for k in (0, 1, 3, 4):
            z = jnp.dot(h2d, p[prefix + 'c5_wt'][idx, k], preferred_element_type=f32)
            acc = acc + jnp.dot(p['shift'][k], z, preferred_element_type=f32)
        y = jnp.maximum(acc + c5_b, 0.0)                              # ReLU
        y = (y - mean) * jax.lax.rsqrt(var + BN_EPS) * g + beta       # BatchNorm1d (running stats)
        return y + res                                                # dropout = identity (eval)

    # positional embedding (pre-tiled to (B*S, E)); batch already folded into M dim
    h = x_ref[...] + p['pos'][...]
    amask = p['amask'][...]                                           # (B*S, B*S)

    for i in range(n_blocks):
        # ---- linear_block ----
        h = jnp.dot(h, p['lin_wt'][i], preferred_element_type=f32) + p['lin_b'][i]   # (BS, A)

        # ---- TransformerEncoderLayer (post-LN, ReLU, eval) ----
        # Per-head weights avoid lane-axis slicing; out-proj accumulated per head
        # (equivalent to concat(heads) @ Wo). Batch separation is enforced with the
        # block-diagonal additive mask on the folded (BS, BS) scores.
        attn = None
        for hh in range(n_heads):
            q = jnp.dot(h, p['wq'][i, hh], preferred_element_type=f32) + p['bq'][i, hh]
            k = jnp.dot(h, p['wk'][i, hh], preferred_element_type=f32) + p['bk'][i, hh]
            v = jnp.dot(h, p['wv'][i, hh], preferred_element_type=f32) + p['bv'][i, hh]
            s = jax.lax.dot_general(q, k, (((1,), (1,)), ((), ())),
                                    preferred_element_type=f32) * scale + amask       # (BS, BS)
            e = jnp.exp(s - jnp.max(s, axis=-1, keepdims=True))
            prob = e / jnp.sum(e, axis=-1, keepdims=True)
            ctx = jnp.dot(prob, v, preferred_element_type=f32)                        # (BS, hd)
            o_h = jnp.dot(ctx, p['wo'][i, hh], preferred_element_type=f32)            # (BS, A)
            attn = o_h if attn is None else attn + o_h
        attn = attn + p['bo'][i]

        h = _layernorm(h + attn, p['ln1_g'][i], p['ln1_b'][i])                # norm1
        ff = jnp.dot(
            jnp.maximum(jnp.dot(h, p['w1'][i], preferred_element_type=f32) + p['b1'][i], 0.0),
            p['w2'][i], preferred_element_type=f32) + p['b2'][i]
        h = _layernorm(h + ff, p['ln2_g'][i], p['ln2_b'][i])                  # norm2

        # ---- ConvResBlock (attn_dim -> embedding_dim) ----
        h = conv_res(h, '', i)

    # intermediate 1x1 conv
    inter = jnp.dot(h, p['int_wt'][...], preferred_element_type=f32) + p['int_b'][...]

    # post-processing ConvResBlocks (embedding_dim -> embedding_dim)
    for j in range(n_post):
        h = conv_res(h, 'p_', j)

    # correction 1x1 conv + residual with intermediate
    cor = jnp.dot(h, p['cor_wt'][...], preferred_element_type=f32) + p['cor_b'][...] + inter

    int_ref[...] = inter
    cor_ref[...] = cor


def decoder_pallas(x, kparams):
    """x: (B, S, EMB_DIM) -> (corrected, intermediate), each (B, S, SPEC_DIM)."""
    B, S, E = x.shape
    flat, treedef = jax.tree_util.tree_flatten(kparams)
    kern = functools.partial(decoder_kernel, treedef=treedef,
                             n_blocks=N_BLOCKS, n_post=N_POST, n_heads=N_HEADS)
    out_sd = jax.ShapeDtypeStruct((B * S, SPEC_DIM), jnp.float32)
    vmem = lambda: pl.BlockSpec(memory_space=pltpu.MemorySpace.VMEM)
    cor, inter = pl.pallas_call(
        kern,
        out_shape=(out_sd, out_sd),
        in_specs=[vmem() for _ in range(1 + len(flat))],
        out_specs=(vmem(), vmem()),
    )(x.reshape(B * S, E), *flat)
    return cor.reshape(B, S, SPEC_DIM), inter.reshape(B, S, SPEC_DIM)


# ----------------------------- parameters (PyTorch-natural layout) ------------------------
def init_params(key):
    keys = iter(jax.random.split(key, 512))

    def rnd(shape, scale=0.08):
        return scale * jax.random.normal(next(keys), shape, dtype=jnp.float32)

    def conv_res_p(cin, cout):
        return {
            'c1_w': rnd((cout, cin, 1)), 'c1_b': rnd((cout,)),
            'c5_w': rnd((cout, cin, 5)), 'c5_b': rnd((cout,)),
            'bn_g': 1.0 + rnd((cout,)), 'bn_b': rnd((cout,)),
            'bn_mean': rnd((cout,)),
            'bn_var': 0.5 + jax.random.uniform(next(keys), (cout,), dtype=jnp.float32),
        }

    params = {
        'pos_w': rnd((MAX_T, EMB_DIM), 0.1),
        'int_w': rnd((SPEC_DIM, EMB_DIM, 1)), 'int_b': rnd((SPEC_DIM,)),
        'cor_w': rnd((SPEC_DIM, EMB_DIM, 1)), 'cor_b': rnd((SPEC_DIM,)),
        'blocks': [], 'post': [],
    }
    for _ in range(N_BLOCKS):
        blk = {
            'lin_w': rnd((ATTN_DIM, EMB_DIM)), 'lin_b': rnd((ATTN_DIM,)),
            'in_proj_w': rnd((3 * ATTN_DIM, ATTN_DIM)), 'in_proj_b': rnd((3 * ATTN_DIM,)),
            'out_proj_w': rnd((ATTN_DIM, ATTN_DIM)), 'out_proj_b': rnd((ATTN_DIM,)),
            'ln1_g': 1.0 + rnd((ATTN_DIM,)), 'ln1_b': rnd((ATTN_DIM,)),
            'w1': rnd((ATTN_DIM, ATTN_DIM)), 'b1': rnd((ATTN_DIM,)),
            'w2': rnd((ATTN_DIM, ATTN_DIM)), 'b2': rnd((ATTN_DIM,)),
            'ln2_g': 1.0 + rnd((ATTN_DIM,)), 'ln2_b': rnd((ATTN_DIM,)),
        }
        blk.update(conv_res_p(ATTN_DIM, EMB_DIM))
        params['blocks'].append(blk)
    for _ in range(N_POST):
        params['post'].append(conv_res_p(EMB_DIM, EMB_DIM))
    return params


def pack_params(params, batch, seq):
    """Repack PyTorch-layout params into the kernel's MXU/lane-friendly layout."""
    A, nh, hd = ATTN_DIM, N_HEADS, HEAD_DIM
    blocks, post = params['blocks'], params['post']

    def stack(blks, fn):
        return jnp.stack([fn(b) for b in blks])

    def conv_pack(prefix, blks):
        return {
            prefix + 'c1_wt': stack(blks, lambda b: b['c1_w'][:, :, 0].T),            # (cin, cout)
            prefix + 'c1_b': stack(blks, lambda b: b['c1_b'][None, :]),
            prefix + 'c5_wt': stack(blks, lambda b: jnp.transpose(b['c5_w'], (2, 1, 0))),  # (5,cin,cout)
            prefix + 'c5_b': stack(blks, lambda b: b['c5_b'][None, :]),
            prefix + 'bn_g': stack(blks, lambda b: b['bn_g'][None, :]),
            prefix + 'bn_b': stack(blks, lambda b: b['bn_b'][None, :]),
            prefix + 'bn_mean': stack(blks, lambda b: b['bn_mean'][None, :]),
            prefix + 'bn_var': stack(blks, lambda b: b['bn_var'][None, :]),
        }

    def qkv_w(idx):
        return stack(blocks, lambda b: jnp.transpose(
            b['in_proj_w'][idx * A:(idx + 1) * A].T.reshape(A, nh, hd), (1, 0, 2)))     # (nh, A, hd)

    def qkv_b(idx):
        return stack(blocks, lambda b: b['in_proj_b'][idx * A:(idx + 1) * A].reshape(nh, 1, hd))

    kp = {
        'pos': jnp.tile(params['pos_w'][:seq], (batch, 1)),       # (B*S, E)
        'shift': make_shift_mats(batch, seq),                     # (5, B*S, B*S)
        'amask': make_attn_mask(batch, seq),                      # (B*S, B*S)
        'lin_wt': stack(blocks, lambda b: b['lin_w'].T),
        'lin_b': stack(blocks, lambda b: b['lin_b'][None, :]),
        'wq': qkv_w(0), 'wk': qkv_w(1), 'wv': qkv_w(2),
        'bq': qkv_b(0), 'bk': qkv_b(1), 'bv': qkv_b(2),
        'wo': stack(blocks, lambda b: b['out_proj_w'].T.reshape(nh, hd, A)),   # (nh, hd, A)
        'bo': stack(blocks, lambda b: b['out_proj_b'][None, :]),
        'ln1_g': stack(blocks, lambda b: b['ln1_g'][None, :]),
        'ln1_b': stack(blocks, lambda b: b['ln1_b'][None, :]),
        'w1': stack(blocks, lambda b: b['w1'].T),
        'b1': stack(blocks, lambda b: b['b1'][None, :]),
        'w2': stack(blocks, lambda b: b['w2'].T),
        'b2': stack(blocks, lambda b: b['b2'][None, :]),
        'ln2_g': stack(blocks, lambda b: b['ln2_g'][None, :]),
        'ln2_b': stack(blocks, lambda b: b['ln2_b'][None, :]),
        'int_wt': params['int_w'][:, :, 0].T, 'int_b': params['int_b'][None, :],
        'cor_wt': params['cor_w'][:, :, 0].T, 'cor_b': params['cor_b'][None, :],
    }
    kp.update(conv_pack('', blocks))
    kp.update(conv_pack('p_', post))
    return kp


# ----------------------------- pure-JAX reference (for verification) ----------------------
def _ref_conv_res(h, prm):
    B, S, _ = h.shape
    res = jnp.einsum('bsi,oi->bso', h, prm['c1_w'][:, :, 0]) + prm['c1_b']
    xp = jnp.pad(h, ((0, 0), (2, 2), (0, 0)))
    y = prm['c5_b'] + sum(
        jnp.einsum('bsi,oi->bso', xp[:, k:k + S], prm['c5_w'][:, :, k]) for k in range(5))
    y = jax.nn.relu(y)
    y = (y - prm['bn_mean']) * jax.lax.rsqrt(prm['bn_var'] + BN_EPS) * prm['bn_g'] + prm['bn_b']
    return y + res


def ref_forward(x, params):
    B, S, _ = x.shape
    A, nh, hd = ATTN_DIM, N_HEADS, HEAD_DIM
    h = x + params['pos_w'][:S][None]
    for blk in params['blocks']:
        h = h @ blk['lin_w'].T + blk['lin_b']
        qkv = h @ blk['in_proj_w'].T + blk['in_proj_b']
        q, k, v = jnp.split(qkv, 3, axis=-1)
        qh = q.reshape(B, S, nh, hd).transpose(0, 2, 1, 3)
        kh = k.reshape(B, S, nh, hd).transpose(0, 2, 1, 3)
        vh = v.reshape(B, S, nh, hd).transpose(0, 2, 1, 3)
        s = jnp.einsum('bhqd,bhkd->bhqk', qh, kh) / math.sqrt(hd)
        prob = jax.nn.softmax(s, axis=-1)
        ctx = jnp.einsum('bhqk,bhkd->bhqd', prob, vh).transpose(0, 2, 1, 3).reshape(B, S, A)
        attn = ctx @ blk['out_proj_w'].T + blk['out_proj_b']
        h = _layernorm(h + attn, blk['ln1_g'], blk['ln1_b'])
        ff = jax.nn.relu(h @ blk['w1'].T + blk['b1']) @ blk['w2'].T + blk['b2']
        h = _layernorm(h + ff, blk['ln2_g'], blk['ln2_b'])
        h = _ref_conv_res(h, blk)
    inter = jnp.einsum('bsi,oi->bso', h, params['int_w'][:, :, 0]) + params['int_b']
    for pb in params['post']:
        h = _ref_conv_res(h, pb)
    cor = jnp.einsum('bsi,oi->bso', h, params['cor_w'][:, :, 0]) + params['cor_b'] + inter
    return cor, inter


if __name__ == "__main__":
    key = jax.random.PRNGKey(0)
    pkey, xkey = jax.random.split(key)
    params = init_params(pkey)
    x = jax.random.normal(xkey, (BATCH, SEQ, EMB_DIM), dtype=jnp.float32)

    kparams = pack_params(params, BATCH, SEQ)
    corrected, intermediate = decoder_pallas(x, kparams)
    corrected = jax.block_until_ready(corrected)
    intermediate = jax.block_until_ready(intermediate)

    ref_cor, ref_int = ref_forward(x, params)
    assert corrected.shape == (BATCH, SEQ, SPEC_DIM), corrected.shape
    assert intermediate.shape == (BATCH, SEQ, SPEC_DIM), intermediate.shape
    err_c = float(jnp.max(jnp.abs(corrected - ref_cor)))
    err_i = float(jnp.max(jnp.abs(intermediate - ref_int)))
    assert err_c < 1e-3 and err_i < 1e-3, (err_c, err_i)
    print("KERNEL_OK")
</pallas_src>

<mosaic_0001>
module attributes {stable_mosaic.version = 11 : i64} {
  func.func @decoder_kernel(%arg0: memref<16x32xf32, #tpu.memory_space<vmem>>, %arg1: memref<16x16xf32, #tpu.memory_space<vmem>>, %arg2: memref<2x1x64xf32, #tpu.memory_space<vmem>>, %arg3: memref<2x1x64xf32, #tpu.memory_space<vmem>>, %arg4: memref<2x4x1x16xf32, #tpu.memory_space<vmem>>, %arg5: memref<2x1x32xf32, #tpu.memory_space<vmem>>, %arg6: memref<2x1x32xf32, #tpu.memory_space<vmem>>, %arg7: memref<2x1x32xf32, #tpu.memory_space<vmem>>, %arg8: memref<2x1x32xf32, #tpu.memory_space<vmem>>, %arg9: memref<2x1x64xf32, #tpu.memory_space<vmem>>, %arg10: memref<2x4x1x16xf32, #tpu.memory_space<vmem>>, %arg11: memref<2x4x1x16xf32, #tpu.memory_space<vmem>>, %arg12: memref<2x1x32xf32, #tpu.memory_space<vmem>>, %arg13: memref<2x64x32xf32, #tpu.memory_space<vmem>>, %arg14: memref<2x1x32xf32, #tpu.memory_space<vmem>>, %arg15: memref<2x5x64x32xf32, #tpu.memory_space<vmem>>, %arg16: memref<1x16xf32, #tpu.memory_space<vmem>>, %arg17: memref<32x16xf32, #tpu.memory_space<vmem>>, %arg18: memref<1x16xf32, #tpu.memory_space<vmem>>, %arg19: memref<32x16xf32, #tpu.memory_space<vmem>>, %arg20: memref<2x1x64xf32, #tpu.memory_space<vmem>>, %arg21: memref<2x32x64xf32, #tpu.memory_space<vmem>>, %arg22: memref<2x1x64xf32, #tpu.memory_space<vmem>>, %arg23: memref<2x1x64xf32, #tpu.memory_space<vmem>>, %arg24: memref<2x1x64xf32, #tpu.memory_space<vmem>>, %arg25: memref<2x1x64xf32, #tpu.memory_space<vmem>>, %arg26: memref<2x1x32xf32, #tpu.memory_space<vmem>>, %arg27: memref<2x1x32xf32, #tpu.memory_space<vmem>>, %arg28: memref<2x1x32xf32, #tpu.memory_space<vmem>>, %arg29: memref<2x1x32xf32, #tpu.memory_space<vmem>>, %arg30: memref<2x1x32xf32, #tpu.memory_space<vmem>>, %arg31: memref<2x32x32xf32, #tpu.memory_space<vmem>>, %arg32: memref<2x1x32xf32, #tpu.memory_space<vmem>>, %arg33: memref<2x5x32x32xf32, #tpu.memory_space<vmem>>, %arg34: memref<16x32xf32, #tpu.memory_space<vmem>>, %arg35: memref<5x16x16xf32, #tpu.memory_space<vmem>>, %arg36: memref<2x64x64xf32, #tpu.memory_space<vmem>>, %arg37: memref<2x64x64xf32, #tpu.memory_space<vmem>>, %arg38: memref<2x4x64x16xf32, #tpu.memory_space<vmem>>, %arg39: memref<2x4x16x64xf32, #tpu.memory_space<vmem>>, %arg40: memref<2x4x64x16xf32, #tpu.memory_space<vmem>>, %arg41: memref<2x4x64x16xf32, #tpu.memory_space<vmem>>, %arg42: memref<16x16xf32, #tpu.memory_space<vmem>>, %arg43: memref<16x16xf32, #tpu.memory_space<vmem>>) attributes {dimension_semantics = [], scalar_prefetch = 0 : i64, scratch_operands = 0 : i64, tpu.core_type = #tpu.core_type<tc>} {
    %c0 = arith.constant 0 : index
    %c0_0 = arith.constant 0 : index
    %0 = vector.load %arg0[%c0, %c0_0] : memref<16x32xf32, #tpu.memory_space<vmem>>, vector<16x32xf32>
    %c0_1 = arith.constant 0 : index
    %c0_2 = arith.constant 0 : index
    %1 = vector.load %arg34[%c0_1, %c0_2] : memref<16x32xf32, #tpu.memory_space<vmem>>, vector<16x32xf32>
    %2 = arith.addf %0, %1 : vector<16x32xf32>
    %c0_3 = arith.constant 0 : index
    %c0_4 = arith.constant 0 : index
    %3 = vector.load %arg1[%c0_3, %c0_4] : memref<16x16xf32, #tpu.memory_space<vmem>>, vector<16x16xf32>
    %c0_5 = arith.constant 0 : index
    %c0_6 = arith.constant 0 : index
    %c0_7 = arith.constant 0 : index
    %4 = vector.load %arg21[%c0_5, %c0_6, %c0_7] : memref<2x32x64xf32, #tpu.memory_space<vmem>>, vector<1x32x64xf32>
    %5 = vector.shape_cast %4 : vector<1x32x64xf32> to vector<32x64xf32>
    %cst = arith.constant dense<0.000000e+00> : vector<16x64xf32>
    %6 = tpu.matmul %2, %5, %cst {dimension_numbers = #tpu.dot_dimension_numbers<[1], [0], [0], [1], [0, 0, 1, 1], [], []>} : vector<16x32xf32>, vector<32x64xf32>, vector<16x64xf32> -> vector<16x64xf32>
    %c0_8 = arith.constant 0 : index
    %c0_9 = arith.constant 0 : index
    %c0_10 = arith.constant 0 : index
    %7 = vector.load %arg20[%c0_8, %c0_9, %c0_10] : memref<2x1x64xf32, #tpu.memory_space<vmem>>, vector<1x1x64xf32>
    %8 = vector.shape_cast %7 : vector<1x1x64xf32> to vector<1x64xf32>
    %9 = vector.broadcast %8 : vector<1x64xf32> to vector<16x64xf32>
    %10 = arith.addf %6, %9 : vector<16x64xf32>
    %c0_11 = arith.constant 0 : index
    %c0_12 = arith.constant 0 : index
    %c0_13 = arith.constant 0 : index
    %c0_14 = arith.constant 0 : index
    %11 = vector.load %arg40[%c0_11, %c0_12, %c0_13, %c0_14] : memref<2x4x64x16xf32, #tpu.memory_space<vmem>>, vector<1x1x64x16xf32>
    %12 = vector.shape_cast %11 : vector<1x1x64x16xf32> to vector<64x16xf32>
    %cst_15 = arith.constant dense<0.000000e+00> : vector<16x16xf32>
    %13 = tpu.matmul %10, %12, %cst_15 {dimension_numbers = #tpu.dot_dimension_numbers<[1], [0], [0], [1], [0, 0, 1, 1], [], []>} : vector<16x64xf32>, vector<64x16xf32>, vector<16x16xf32> -> vector<16x16xf32>
    %c0_16 = arith.constant 0 : index
    %c0_17 = arith.constant 0 : index
    %c0_18 = arith.constant 0 : index
    %c0_19 = arith.constant 0 : index
    %14 = vector.load %arg10[%c0_16, %c0_17, %c0_18, %c0_19] : memref<2x4x1x16xf32, #tpu.memory_space<vmem>>, vector<1x1x1x16xf32>
    %15 = vector.shape_cast %14 : vector<1x1x1x16xf32> to vector<1x16xf32>
    %16 = vector.broadcast %15 : vector<1x16xf32> to vector<16x16xf32>
    %17 = arith.addf %13, %16 : vector<16x16xf32>
    %c0_20 = arith.constant 0 : index
    %c0_21 = arith.constant 0 : index
    %c0_22 = arith.constant 0 : index
    %c0_23 = arith.constant 0 : index
    %18 = vector.load %arg38[%c0_20, %c0_21, %c0_22, %c0_23] : memref<2x4x64x16xf32, #tpu.memory_space<vmem>>, vector<1x1x64x16xf32>
    %19 = vector.shape_cast %18 : vector<1x1x64x16xf32> to vector<64x16xf32>
    %cst_24 = arith.constant dense<0.000000e+00> : vector<16x16xf32>
    %20 = tpu.matmul %10, %19, %cst_24 {dimension_numbers = #tpu.dot_dimension_numbers<[1], [0], [0], [1], [0, 0, 1, 1], [], []>} : vector<16x64xf32>, vector<64x16xf32>, vector<16x16xf32> -> vector<16x16xf32>
    %c0_25 = arith.constant 0 : index
    %c0_26 = arith.constant 0 : index
    %c0_27 = arith.constant 0 : index
    %c0_28 = arith.constant 0 : index
    %21 = vector.load %arg4[%c0_25, %c0_26, %c0_27, %c0_28] : memref<2x4x1x16xf32, #tpu.memory_space<vmem>>, vector<1x1x1x16xf32>
    %22 = vector.shape_cast %21 : vector<1x1x1x16xf32> to vector<1x16xf32>
    %23 = vector.broadcast %22 : vector<1x16xf32> to vector<16x16xf32>
    %24 = arith.addf %20, %23 : vector<16x16xf32>
    %c0_29 = arith.constant 0 : index
    %c0_30 = arith.constant 0 : index
    %c0_31 = arith.constant 0 : index
    %c0_32 = arith.constant 0 : index
    %25 = vector.load %arg41[%c0_29, %c0_30, %c0_31, %c0_32] : memref<2x4x64x16xf32, #tpu.memory_space<vmem>>, vector<1x1x64x16xf32>
    %26 = vector.shape_cast %25 : vector<1x1x64x16xf32> to vector<64x16xf32>
    %cst_33 = arith.constant dense<0.000000e+00> : vector<16x16xf32>
    %27 = tpu.matmul %10, %26, %cst_33 {dimension_numbers = #tpu.dot_dimension_numbers<[1], [0], [0], [1], [0, 0, 1, 1], [], []>} : vector<16x64xf32>, vector<64x16xf32>, vector<16x16xf32> -> vector<16x16xf32>
    %c0_34 = arith.constant 0 : index
    %c0_35 = arith.constant 0 : index
    %c0_36 = arith.constant 0 : index
    %c0_37 = arith.constant 0 : index
    %28 = vector.load %arg11[%c0_34, %c0_35, %c0_36, %c0_37] : memref<2x4x1x16xf32, #tpu.memory_space<vmem>>, vector<1x1x1x16xf32>
    %29 = vector.shape_cast %28 : vector<1x1x1x16xf32> to vector<1x16xf32>
    %30 = vector.broadcast %29 : vector<1x16xf32> to vector<16x16xf32>
    %31 = arith.addf %27, %30 : vector<16x16xf32>
    %cst_38 = arith.constant dense<0.000000e+00> : vector<16x16xf32>
    %32 = tpu.matmul %17, %24, %cst_38 {dimension_numbers = #tpu.dot_dimension_numbers<[1], [1], [0], [0], [0, 0, 1, 0], [], []>} : vector<16x16xf32>, vector<16x16xf32>, vector<16x16xf32> -> vector<16x16xf32>
    %cst_39 = arith.constant 2.500000e-01 : f32
    %33 = vector.broadcast %cst_39 : f32 to vector<16x16xf32>
    %34 = arith.mulf %32, %33 : vector<16x16xf32>
    %35 = arith.addf %34, %3 : vector<16x16xf32>
    %cst_40 = arith.constant dense<0xFF800000> : vector<16xf32>
    %36 = vector.multi_reduction <maximumf>, %35, %cst_40 [1] : vector<16x16xf32> to vector<16xf32>
    %37 = vector.shape_cast %36 : vector<16xf32> to vector<16x1xf32>
    %38 = vector.broadcast %37 : vector<16x1xf32> to vector<16x16xf32>
    %39 = arith.subf %35, %38 : vector<16x16xf32>
    %40 = math.exp %39 : vector<16x16xf32>
    %cst_41 = arith.constant dense<0.000000e+00> : vector<16xf32>
    %41 = vector.multi_reduction <add>, %40, %cst_41 [1] : vector<16x16xf32> to vector<16xf32>
    %42 = vector.shape_cast %41 : vector<16xf32> to vector<16x1xf32>
    %43 = vector.broadcast %42 : vector<16x1xf32> to vector<16x16xf32>
    %44 = arith.divf %40, %43 : vector<16x16xf32>
    %cst_42 = arith.constant dense<0.000000e+00> : vector<16x16xf32>
    %45 = tpu.matmul %44, %31, %cst_42 {dimension_numbers = #tpu.dot_dimension_numbers<[1], [0], [0], [1], [0, 0, 1, 1], [], []>} : vector<16x16xf32>, vector<16x16xf32>, vector<16x16xf32> -> vector<16x16xf32>
    %c0_43 = arith.constant 0 : index
    %c0_44 = arith.constant 0 : index
    %c0_45 = arith.constant 0 : index
    %c0_46 = arith.constant 0 : index
    %46 = vector.load %arg39[%c0_43, %c0_44, %c0_45, %c0_46] : memref<2x4x16x64xf32, #tpu.memory_space<vmem>>, vector<1x1x16x64xf32>
    %47 = vector.shape_cast %46 : vector<1x1x16x64xf32> to vector<16x64xf32>
    %cst_47 = arith.constant dense<0.000000e+00> : vector<16x64xf32>
    %48 = tpu.matmul %45, %47, %cst_47 {dimension_numbers = #tpu.dot_dimension_numbers<[1], [0], [0], [1], [0, 0, 1, 1], [], []>} : vector<16x16xf32>, vector<16x64xf32>, vector<16x64xf32> -> vector<16x64xf32>
    %c0_48 = arith.constant 0 : index
    %c1 = arith.constant 1 : index
    %c0_49 = arith.constant 0 : index
    %c0_50 = arith.constant 0 : index
    %49 = vector.load %arg40[%c0_48, %c1, %c0_49, %c0_50] : memref<2x4x64x16xf32, #tpu.memory_space<vmem>>, vector<1x1x64x16xf32>
    %50 = vector.shape_cast %49 : vector<1x1x64x16xf32> to vector<64x16xf32>
    %cst_51 = arith.constant dense<0.000000e+00> : vector<16x16xf32>
    %51 = tpu.matmul %10, %50, %cst_51 {dimension_numbers = #tpu.dot_dimension_numbers<[1], [0], [0], [1], [0, 0, 1, 1], [], []>} : vector<16x64xf32>, vector<64x16xf32>, vector<16x16xf32> -> vector<16x16xf32>
    %c0_52 = arith.constant 0 : index
    %c1_53 = arith.constant 1 : index
    %c0_54 = arith.constant 0 : index
    %c0_55 = arith.constant 0 : index
    %52 = vector.load %arg10[%c0_52, %c1_53, %c0_54, %c0_55] : memref<2x4x1x16xf32, #tpu.memory_space<vmem>>, vector<1x1x1x16xf32>
    %53 = vector.shape_cast %52 : vector<1x1x1x16xf32> to vector<1x16xf32>
    %54 = vector.broadcast %53 : vector<1x16xf32> to vector<16x16xf32>
    %55 = arith.addf %51, %54 : vector<16x16xf32>
    %c0_56 = arith.constant 0 : index
    %c1_57 = arith.constant 1 : index
    %c0_58 = arith.constant 0 : index
    %c0_59 = arith.constant 0 : index
    %56 = vector.load %arg38[%c0_56, %c1_57, %c0_58, %c0_59] : memref<2x4x64x16xf32, #tpu.memory_space<vmem>>, vector<1x1x64x16xf32>
    %57 = vector.shape_cast %56 : vector<1x1x64x16xf32> to vector<64x16xf32>
    %cst_60 = arith.constant dense<0.000000e+00> : vector<16x16xf32>
    %58 = tpu.matmul %10, %57, %cst_60 {dimension_numbers = #tpu.dot_dimension_numbers<[1], [0], [0], [1], [0, 0, 1, 1], [], []>} : vector<16x64xf32>, vector<64x16xf32>, vector<16x16xf32> -> vector<16x16xf32>
    %c0_61 = arith.constant 0 : index
    %c1_62 = arith.constant 1 : index
    %c0_63 = arith.constant 0 : index
    %c0_64 = arith.constant 0 : index
    %59 = vector.load %arg4[%c0_61, %c1_62, %c0_63, %c0_64] : memref<2x4x1x16xf32, #tpu.memory_space<vmem>>, vector<1x1x1x16xf32>
    %60 = vector.shape_cast %59 : vector<1x1x1x16xf32> to vector<1x16xf32>
    %61 = vector.broadcast %60 : vector<1x16xf32> to vector<16x16xf32>
    %62 = arith.addf %58, %61 : vector<16x16xf32>
    %c0_65 = arith.constant 0 : index
    %c1_66 = arith.constant 1 : index
    %c0_67 = arith.constant 0 : index
    %c0_68 = arith.constant 0 : index
    %63 = vector.load %arg41[%c0_65, %c1_66, %c0_67, %c0_68] : memref<2x4x64x16xf32, #tpu.memory_space<vmem>>, vector<1x1x64x16xf32>
    %64 = vector.shape_cast %63 : vector<1x1x64x16xf32> to vector<64x16xf32>
    %cst_69 = arith.constant dense<0.000000e+00> : vector<16x16xf32>
    %65 = tpu.matmul %10, %64, %cst_69 {dimension_numbers = #tpu.dot_dimension_numbers<[1], [0], [0], [1], [0, 0, 1, 1], [], []>} : vector<16x64xf32>, vector<64x16xf32>, vector<16x16xf32> -> vector<16x16xf32>
    %c0_70 = arith.constant 0 : index
    %c1_71 = arith.constant 1 : index
    %c0_72 = arith.constant 0 : index
    %c0_73 = arith.constant 0 : index
    %66 = vector.load %arg11[%c0_70, %c1_71, %c0_72, %c0_73] : memref<2x4x1x16xf32, #tpu.memory_space<vmem>>, vector<1x1x1x16xf32>
    %67 = vector.shape_cast %66 : vector<1x1x1x16xf32> to vector<1x16xf32>
    %68 = vector.broadcast %67 : vector<1x16xf32> to vector<16x16xf32>
    %69 = arith.addf %65, %68 : vector<16x16xf32>
    %cst_74 = arith.constant dense<0.000000e+00> : vector<16x16xf32>
    %70 = tpu.matmul %55, %62, %cst_74 {dimension_numbers = #tpu.dot_dimension_numbers<[1], [1], [0], [0], [0, 0, 1, 0], [], []>} : vector<16x16xf32>, vector<16x16xf32>, vector<16x16xf32> -> vector<16x16xf32>
    %cst_75 = arith.constant 2.500000e-01 : f32
    %71 = vector.broadcast %cst_75 : f32 to vector<16x16xf32>
    %72 = arith.mulf %70, %71 : vector<16x16xf32>
    %73 = arith.addf %72, %3 : vector<16x16xf32>
    %cst_76 = arith.constant dense<0xFF800000> : vector<16xf32>
    %74 = vector.multi_reduction <maximumf>, %73, %cst_76 [1] : vector<16x16xf32> to vector<16xf32>
    %75 = vector.shape_cast %74 : vector<16xf32> to vector<16x1xf32>
    %76 = vector.broadcast %75 : vector<16x1xf32> to vector<16x16xf32>
    %77 = arith.subf %73, %76 : vector<16x16xf32>
    %78 = math.exp %77 : vector<16x16xf32>
    %cst_77 = arith.constant dense<0.000000e+00> : vector<16xf32>
    %79 = vector.multi_reduction <add>, %78, %cst_77 [1] : vector<16x16xf32> to vector<16xf32>
    %80 = vector.shape_cast %79 : vector<16xf32> to vector<16x1xf32>
    %81 = vector.broadcast %80 : vector<16x1xf32> to vector<16x16xf32>
    %82 = arith.divf %78, %81 : vector<16x16xf32>
    %cst_78 = arith.constant dense<0.000000e+00> : vector<16x16xf32>
    %83 = tpu.matmul %82, %69, %cst_78 {dimension_numbers = #tpu.dot_dimension_numbers<[1], [0], [0], [1], [0, 0, 1, 1], [], []>} : vector<16x16xf32>, vector<16x16xf32>, vector<16x16xf32> -> vector<16x16xf32>
    %c0_79 = arith.constant 0 : index
    %c1_80 = arith.constant 1 : index
    %c0_81 = arith.constant 0 : index
    %c0_82 = arith.constant 0 : index
    %84 = vector.load %arg39[%c0_79, %c1_80, %c0_81, %c0_82] : memref<2x4x16x64xf32, #tpu.memory_space<vmem>>, vector<1x1x16x64xf32>
    %85 = vector.shape_cast %84 : vector<1x1x16x64xf32> to vector<16x64xf32>
    %cst_83 = arith.constant dense<0.000000e+00> : vector<16x64xf32>
    %86 = tpu.matmul %83, %85, %cst_83 {dimension_numbers = #tpu.dot_dimension_numbers<[1], [0], [0], [1], [0, 0, 1, 1], [], []>} : vector<16x16xf32>, vector<16x64xf32>, vector<16x64xf32> -> vector<16x64xf32>
    %87 = arith.addf %48, %86 : vector<16x64xf32>
    %c0_84 = arith.constant 0 : index
    %c2 = arith.constant 2 : index
    %c0_85 = arith.constant 0 : index
    %c0_86 = arith.constant 0 : index
    %88 = vector.load %arg40[%c0_84, %c2, %c0_85, %c0_86] : memref<2x4x64x16xf32, #tpu.memory_space<vmem>>, vector<1x1x64x16xf32>
    %89 = vector.shape_cast %88 : vector<1x1x64x16xf32> to vector<64x16xf32>
    %cst_87 = arith.constant dense<0.000000e+00> : vector<16x16xf32>
    %90 = tpu.matmul %10, %89, %cst_87 {dimension_numbers = #tpu.dot_dimension_numbers<[1], [0], [0], [1], [0, 0, 1, 1], [], []>} : vector<16x64xf32>, vector<64x16xf32>, vector<16x16xf32> -> vector<16x16xf32>
    %c0_88 = arith.constant 0 : index
    %c2_89 = arith.constant 2 : index
    %c0_90 = arith.constant 0 : index
    %c0_91 = arith.constant 0 : index
    %91 = vector.load %arg10[%c0_88, %c2_89, %c0_90, %c0_91] : memref<2x4x1x16xf32, #tpu.memory_space<vmem>>, vector<1x1x1x16xf32>
    %92 = vector.shape_cast %91 : vector<1x1x1x16xf32> to vector<1x16xf32>
    %93 = vector.broadcast %92 : vector<1x16xf32> to vector<16x16xf32>
    %94 = arith.addf %90, %93 : vector<16x16xf32>
    %c0_92 = arith.constant 0 : index
    %c2_93 = arith.constant 2 : index
    %c0_94 = arith.constant 0 : index
    %c0_95 = arith.constant 0 : index
    %95 = vector.load %arg38[%c0_92, %c2_93, %c0_94, %c0_95] : memref<2x4x64x16xf32, #tpu.memory_space<vmem>>, vector<1x1x64x16xf32>
    %96 = vector.shape_cast %95 : vector<1x1x64x16xf32> to vector<64x16xf32>
    %cst_96 = arith.constant dense<0.000000e+00> : vector<16x16xf32>
    %97 = tpu.matmul %10, %96, %cst_96 {dimension_numbers = #tpu.dot_dimension_numbers<[1], [0], [0], [1], [0, 0, 1, 1], [], []>} : vector<16x64xf32>, vector<64x16xf32>, vector<16x16xf32> -> vector<16x16xf32>
    %c0_97 = arith.constant 0 : index
    %c2_98 = arith.constant 2 : index
    %c0_99 = arith.constant 0 : index
    %c0_100 = arith.constant 0 : index
    %98 = vector.load %arg4[%c0_97, %c2_98, %c0_99, %c0_100] : memref<2x4x1x16xf32, #tpu.memory_space<vmem>>, vector<1x1x1x16xf32>
    %99 = vector.shape_cast %98 : vector<1x1x1x16xf32> to vector<1x16xf32>
    %100 = vector.broadcast %99 : vector<1x16xf32> to vector<16x16xf32>
    %101 = arith.addf %97, %100 : vector<16x16xf32>
    %c0_101 = arith.constant 0 : index
    %c2_102 = arith.constant 2 : index
    %c0_103 = arith.constant 0 : index
    %c0_104 = arith.constant 0 : index
    %102 = vector.load %arg41[%c0_101, %c2_102, %c0_103, %c0_104] : memref<2x4x64x16xf32, #tpu.memory_space<vmem>>, vector<1x1x64x16xf32>
    %103 = vector.shape_cast %102 : vector<1x1x64x16xf32> to vector<64x16xf32>
    %cst_105 = arith.constant dense<0.000000e+00> : vector<16x16xf32>
    %104 = tpu.matmul %10, %103, %cst_105 {dimension_numbers = #tpu.dot_dimension_numbers<[1], [0], [0], [1], [0, 0, 1, 1], [], []>} : vector<16x64xf32>, vector<64x16xf32>, vector<16x16xf32> -> vector<16x16xf32>
    %c0_106 = arith.constant 0 : index
    %c2_107 = arith.constant 2 : index
    %c0_108 = arith.constant 0 : index
    %c0_109 = arith.constant 0 : index
    %105 = vector.load %arg11[%c0_106, %c2_107, %c0_108, %c0_109] : memref<2x4x1x16xf32, #tpu.memory_space<vmem>>, vector<1x1x1x16xf32>
    %106 = vector.shape_cast %105 : vector<1x1x1x16xf32> to vector<1x16xf32>
    %107 = vector.broadcast %106 : vector<1x16xf32> to vector<16x16xf32>
    %108 = arith.addf %104, %107 : vector<16x16xf32>
    %cst_110 = arith.constant dense<0.000000e+00> : vector<16x16xf32>
    %109 = tpu.matmul %94, %101, %cst_110 {dimension_numbers = #tpu.dot_dimension_numbers<[1], [1], [0], [0], [0, 0, 1, 0], [], []>} : vector<16x16xf32>, vector<16x16xf32>, vector<16x16xf32> -> vector<16x16xf32>
    %cst_111 = arith.constant 2.500000e-01 : f32
    %110 = vector.broadcast %cst_111 : f32 to vector<16x16xf32>
    %111 = arith.mulf %109, %110 : vector<16x16xf32>
    %112 = arith.addf %111, %3 : vector<16x16xf32>
    %cst_112 = arith.constant dense<0xFF800000> : vector<16xf32>
    %113 = vector.multi_reduction <maximumf>, %112, %cst_112 [1] : vector<16x16xf32> to vector<16xf32>
    %114 = vector.shape_cast %113 : vector<16xf32> to vector<16x1xf32>
    %115 = vector.broadcast %114 : vector<16x1xf32> to vector<16x16xf32>
    %116 = arith.subf %112, %115 : vector<16x16xf32>
    %117 = math.exp %116 : vector<16x16xf32>
    %cst_113 = arith.constant dense<0.000000e+00> : vector<16xf32>
    %118 = vector.multi_reduction <add>, %117, %cst_113 [1] : vector<16x16xf32> to vector<16xf32>
    %119 = vector.shape_cast %118 : vector<16xf32> to vector<16x1xf32>
    %120 = vector.broadcast %119 : vector<16x1xf32> to vector<16x16xf32>
    %121 = arith.divf %117, %120 : vector<16x16xf32>
    %cst_114 = arith.constant dense<0.000000e+00> : vector<16x16xf32>
    %122 = tpu.matmul %121, %108, %cst_114 {dimension_numbers = #tpu.dot_dimension_numbers<[1], [0], [0], [1], [0, 0, 1, 1], [], []>} : vector<16x16xf32>, vector<16x16xf32>, vector<16x16xf32> -> vector<16x16xf32>
    %c0_115 = arith.constant 0 : index
    %c2_116 = arith.constant 2 : index
    %c0_117 = arith.constant 0 : index
    %c0_118 = arith.constant 0 : index
    %123 = vector.load %arg39[%c0_115, %c2_116, %c0_117, %c0_118] : memref<2x4x16x64xf32, #tpu.memory_space<vmem>>, vector<1x1x16x64xf32>
    %124 = vector.shape_cast %123 : vector<1x1x16x64xf32> to vector<16x64xf32>
    %cst_119 = arith.constant dense<0.000000e+00> : vector<16x64xf32>
    %125 = tpu.matmul %122, %124, %cst_119 {dimension_numbers = #tpu.dot_dimension_numbers<[1], [0], [0], [1], [0, 0, 1, 1], [], []>} : vector<16x16xf32>, vector<16x64xf32>, vector<16x64xf32> -> vector<16x64xf32>
    %126 = arith.addf %87, %125 : vector<16x64xf32>
    %c0_120 = arith.constant 0 : index
    %c3 = arith.constant 3 : index
    %c0_121 = arith.constant 0 : index
    %c0_122 = arith.constant 0 : index
    %127 = vector.load %arg40[%c0_120, %c3, %c0_121, %c0_122] : memref<2x4x64x16xf32, #tpu.memory_space<vmem>>, vector<1x1x64x16xf32>
    %128 = vector.shape_cast %127 : vector<1x1x64x16xf32> to vector<64x16xf32>
    %cst_123 = arith.constant dense<0.000000e+00> : vector<16x16xf32>
    %129 = tpu.matmul %10, %128, %cst_123 {dimension_numbers = #tpu.dot_dimension_numbers<[1], [0], [0], [1], [0, 0, 1, 1], [], []>} : vector<16x64xf32>, vector<64x16xf32>, vector<16x16xf32> -> vector<16x16xf32>
    %c0_124 = arith.constant 0 : index
    %c3_125 = arith.constant 3 : index
    %c0_126 = arith.constant 0 : index
    %c0_127 = arith.constant 0 : index
    %130 = vector.load %arg10[%c0_124, %c3_125, %c0_126, %c0_127] : memref<2x4x1x16xf32, #tpu.memory_space<vmem>>, vector<1x1x1x16xf32>
    %131 = vector.shape_cast %130 : vector<1x1x1x16xf32> to vector<1x16xf32>
    %132 = vector.broadcast %131 : vector<1x16xf32> to vector<16x16xf32>
    %133 = arith.addf %129, %132 : vector<16x16xf32>
    %c0_128 = arith.constant 0 : index
    %c3_129 = arith.constant 3 : index
    %c0_130 = arith.constant 0 : index
    %c0_131 = arith.constant 0 : index
    %134 = vector.load %arg38[%c0_128, %c3_129, %c0_130, %c0_131] : memref<2x4x64x16xf32, #tpu.memory_space<vmem>>, vector<1x1x64x16xf32>
    %135 = vector.shape_cast %134 : vector<1x1x64x16xf32> to vector<64x16xf32>
    %cst_132 = arith.constant dense<0.000000e+00> : vector<16x16xf32>
    %136 = tpu.matmul %10, %135, %cst_132 {dimension_numbers = #tpu.dot_dimension_numbers<[1], [0], [0], [1], [0, 0, 1, 1], [], []>} : vector<16x64xf32>, vector<64x16xf32>, vector<16x16xf32> -> vector<16x16xf32>
    %c0_133 = arith.constant 0 : index
    %c3_134 = arith.constant 3 : index
    %c0_135 = arith.constant 0 : index
    %c0_136 = arith.constant 0 : index
    %137 = vector.load %arg4[%c0_133, %c3_134, %c0_135, %c0_136] : memref<2x4x1x16xf32, #tpu.memory_space<vmem>>, vector<1x1x1x16xf32>
    %138 = vector.shape_cast %137 : vector<1x1x1x16xf32> to vector<1x16xf32>
    %139 = vector.broadcast %138 : vector<1x16xf32> to vector<16x16xf32>
    %140 = arith.addf %136, %139 : vector<16x16xf32>
    %c0_137 = arith.constant 0 : index
    %c3_138 = arith.constant 3 : index
    %c0_139 = arith.constant 0 : index
    %c0_140 = arith.constant 0 : index
    %141 = vector.load %arg41[%c0_137, %c3_138, %c0_139, %c0_140] : memref<2x4x64x16xf32, #tpu.memory_space<vmem>>, vector<1x1x64x16xf32>
    %142 = vector.shape_cast %141 : vector<1x1x64x16xf32> to vector<64x16xf32>
    %cst_141 = arith.constant dense<0.000000e+00> : vector<16x16xf32>
    %143 = tpu.matmul %10, %142, %cst_141 {dimension_numbers = #tpu.dot_dimension_numbers<[1], [0], [0], [1], [0, 0, 1, 1], [], []>} : vector<16x64xf32>, vector<64x16xf32>, vector<16x16xf32> -> vector<16x16xf32>
    %c0_142 = arith.constant 0 : index
    %c3_143 = arith.constant 3 : index
    %c0_144 = arith.constant 0 : index
    %c0_145 = arith.constant 0 : index
    %144 = vector.load %arg11[%c0_142, %c3_143, %c0_144, %c0_145] : memref<2x4x1x16xf32, #tpu.memory_space<vmem>>, vector<1x1x1x16xf32>
    %145 = vector.shape_cast %144 : vector<1x1x1x16xf32> to vector<1x16xf32>
    %146 = vector.broadcast %145 : vector<1x16xf32> to vector<16x16xf32>
    %147 = arith.addf %143, %146 : vector<16x16xf32>
    %cst_146 = arith.constant dense<0.000000e+00> : vector<16x16xf32>
    %148 = tpu.matmul %133, %140, %cst_146 {dimension_numbers = #tpu.dot_dimension_numbers<[1], [1], [0], [0], [0, 0, 1, 0], [], []>} : vector<16x16xf32>, vector<16x16xf32>, vector<16x16xf32> -> vector<16x16xf32>
    %cst_147 = arith.constant 2.500000e-01 : f32
    %149 = vector.broadcast %cst_147 : f32 to vector<16x16xf32>
    %150 = arith.mulf %148, %149 : vector<16x16xf32>
    %151 = arith.addf %150, %3 : vector<16x16xf32>
    %cst_148 = arith.constant dense<0xFF800000> : vector<16xf32>
    %152 = vector.multi_reduction <maximumf>, %151, %cst_148 [1] : vector<16x16xf32> to vector<16xf32>
    %153 = vector.shape_cast %152 : vector<16xf32> to vector<16x1xf32>
    %154 = vector.broadcast %153 : vector<16x1xf32> to vector<16x16xf32>
    %155 = arith.subf %151, %154 : vector<16x16xf32>
    %156 = math.exp %155 : vector<16x16xf32>
    %cst_149 = arith.constant dense<0.000000e+00> : vector<16xf32>
    %157 = vector.multi_reduction <add>, %156, %cst_149 [1] : vector<16x16xf32> to vector<16xf32>
    %158 = vector.shape_cast %157 : vector<16xf32> to vector<16x1xf32>
    %159 = vector.broadcast %158 : vector<16x1xf32> to vector<16x16xf32>
    %160 = arith.divf %156, %159 : vector<16x16xf32>
    %cst_150 = arith.constant dense<0.000000e+00> : vector<16x16xf32>
    %161 = tpu.matmul %160, %147, %cst_150 {dimension_numbers = #tpu.dot_dimension_numbers<[1], [0], [0], [1], [0, 0, 1, 1], [], []>} : vector<16x16xf32>, vector<16x16xf32>, vector<16x16xf32> -> vector<16x16xf32>
    %c0_151 = arith.constant 0 : index
    %c3_152 = arith.constant 3 : index
    %c0_153 = arith.constant 0 : index
    %c0_154 = arith.constant 0 : index
    %162 = vector.load %arg39[%c0_151, %c3_152, %c0_153, %c0_154] : memref<2x4x16x64xf32, #tpu.memory_space<vmem>>, vector<1x1x16x64xf32>
    %163 = vector.shape_cast %162 : vector<1x1x16x64xf32> to vector<16x64xf32>
    %cst_155 = arith.constant dense<0.000000e+00> : vector<16x64xf32>
    %164 = tpu.matmul %161, %163, %cst_155 {dimension_numbers = #tpu.dot_dimension_numbers<[1], [0], [0], [1], [0, 0, 1, 1], [], []>} : vector<16x16xf32>, vector<16x64xf32>, vector<16x64xf32> -> vector<16x64xf32>
    %165 = arith.addf %126, %164 : vector<16x64xf32>
    %c0_156 = arith.constant 0 : index
    %c0_157 = arith.constant 0 : index
    %c0_158 = arith.constant 0 : index
    %166 = vector.load %arg9[%c0_156, %c0_157, %c0_158] : memref<2x1x64xf32, #tpu.memory_space<vmem>>, vector<1x1x64xf32>
    %167 = vector.shape_cast %166 : vector<1x1x64xf32> to vector<1x64xf32>
    %168 = vector.broadcast %167 : vector<1x64xf32> to vector<16x64xf32>
    %169 = arith.addf %165, %168 : vector<16x64xf32>
    %170 = arith.addf %10, %169 : vector<16x64xf32>
    %c0_159 = arith.constant 0 : index
    %c0_160 = arith.constant 0 : index
    %c0_161 = arith.constant 0 : index
    %171 = vector.load %arg23[%c0_159, %c0_160, %c0_161] : memref<2x1x64xf32, #tpu.memory_space<vmem>>, vector<1x1x64xf32>
    %172 = vector.shape_cast %171 : vector<1x1x64xf32> to vector<1x64xf32>
    %c0_162 = arith.constant 0 : index
    %c0_163 = arith.constant 0 : index
    %c0_164 = arith.constant 0 : index
    %173 = vector.load %arg22[%c0_162, %c0_163, %c0_164] : memref<2x1x64xf32, #tpu.memory_space<vmem>>, vector<1x1x64xf32>
    %174 = vector.shape_cast %173 : vector<1x1x64xf32> to vector<1x64xf32>
    %cst_165 = arith.constant dense<0.000000e+00> : vector<16xf32>
    %175 = vector.multi_reduction <add>, %170, %cst_165 [1] : vector<16x64xf32> to vector<16xf32>
    %176 = vector.shape_cast %175 : vector<16xf32> to vector<16x1xf32>
    %cst_166 = arith.constant 6.400000e+01 : f32
    %177 = vector.broadcast %cst_166 : f32 to vector<16x1xf32>
    %178 = arith.divf %176, %177 : vector<16x1xf32>
    %179 = vector.broadcast %178 : vector<16x1xf32> to vector<16x64xf32>
    %180 = arith.subf %170, %179 : vector<16x64xf32>
    %181 = arith.mulf %180, %180 : vector<16x64xf32>
    %cst_167 = arith.constant dense<0.000000e+00> : vector<16xf32>
    %182 = vector.multi_reduction <add>, %181, %cst_167 [1] : vector<16x64xf32> to vector<16xf32>
    %183 = vector.shape_cast %182 : vector<16xf32> to vector<16x1xf32>
    %cst_168 = arith.constant 6.400000e+01 : f32
    %184 = vector.broadcast %cst_168 : f32 to vector<16x1xf32>
    %185 = arith.divf %183, %184 : vector<16x1xf32>
    %186 = vector.broadcast %178 : vector<16x1xf32> to vector<16x64xf32>
    %187 = arith.subf %170, %186 : vector<16x64xf32>
    %cst_169 = arith.constant 9.99999974E-6 : f32
    %188 = vector.broadcast %cst_169 : f32 to vector<16x1xf32>
    %189 = arith.addf %185, %188 : vector<16x1xf32>
    %190 = math.rsqrt %189 : vector<16x1xf32>
    %191 = vector.broadcast %190 : vector<16x1xf32> to vector<16x64xf32>
    %192 = arith.mulf %187, %191 : vector<16x64xf32>
    %193 = vector.broadcast %172 : vector<1x64xf32> to vector<16x64xf32>
    %194 = arith.mulf %192, %193 : vector<16x64xf32>
    %195 = vector.broadcast %174 : vector<1x64xf32> to vector<16x64xf32>
    %196 = arith.addf %194, %195 : vector<16x64xf32>
    %c0_170 = arith.constant 0 : index
    %c0_171 = arith.constant 0 : index
    %c0_172 = arith.constant 0 : index
    %197 = vector.load %arg36[%c0_170, %c0_171, %c0_172] : memref<2x64x64xf32, #tpu.memory_space<vmem>>, vector<1x64x64xf32>
    %198 = vector.shape_cast %197 : vector<1x64x64xf32> to vector<64x64xf32>
    %cst_173 = arith.constant dense<0.000000e+00> : vector<16x64xf32>
    %199 = tpu.matmul %196, %198, %cst_173 {dimension_numbers = #tpu.dot_dimension_numbers<[1], [0], [0], [1], [0, 0, 1, 1], [], []>} : vector<16x64xf32>, vector<64x64xf32>, vector<16x64xf32> -> vector<16x64xf32>
    %c0_174 = arith.constant 0 : index
    %c0_175 = arith.constant 0 : index
    %c0_176 = arith.constant 0 : index
    %200 = vector.load %arg2[%c0_174, %c0_175, %c0_176] : memref<2x1x64xf32, #tpu.memory_space<vmem>>, vector<1x1x64xf32>
    %201 = vector.shape_cast %200 : vector<1x1x64xf32> to vector<1x64xf32>
    %202 = vector.broadcast %201 : vector<1x64xf32> to vector<16x64xf32>
    %203 = arith.addf %199, %202 : vector<16x64xf32>
    %cst_177 = arith.constant 0.000000e+00 : f32
    %204 = vector.broadcast %cst_177 : f32 to vector<16x64xf32>
    %205 = arith.maximumf %203, %204 : vector<16x64xf32>
    %c0_178 = arith.constant 0 : index
    %c0_179 = arith.constant 0 : index
    %c0_180 = arith.constant 0 : index
    %206 = vector.load %arg37[%c0_178, %c0_179, %c0_180] : memref<2x64x64xf32, #tpu.memory_space<vmem>>, vector<1x64x64xf32>
    %207 = vector.shape_cast %206 : vector<1x64x64xf32> to vector<64x64xf32>
    %cst_181 = arith.constant dense<0.000000e+00> : vector<16x64xf32>
    %208 = tpu.matmul %205, %207, %cst_181 {dimension_numbers = #tpu.dot_dimension_numbers<[1], [0], [0], [1], [0, 0, 1, 1], [], []>} : vector<16x64xf32>, vector<64x64xf32>, vector<16x64xf32> -> vector<16x64xf32>
    %c0_182 = arith.constant 0 : index
    %c0_183 = arith.constant 0 : index
    %c0_184 = arith.constant 0 : index
    %209 = vector.load %arg3[%c0_182, %c0_183, %c0_184] : memref<2x1x64xf32, #tpu.memory_space<vmem>>, vector<1x1x64xf32>
    %210 = vector.shape_cast %209 : vector<1x1x64xf32> to vector<1x64xf32>
    %211 = vector.broadcast %210 : vector<1x64xf32> to vector<16x64xf32>
    %212 = arith.addf %208, %211 : vector<16x64xf32>
    %213 = arith.addf %196, %212 : vector<16x64xf32>
    %c0_185 = arith.constant 0 : index
    %c0_186 = arith.constant 0 : index
    %c0_187 = arith.constant 0 : index
    %214 = vector.load %arg25[%c0_185, %c0_186, %c0_187] : memref<2x1x64xf32, #tpu.memory_space<vmem>>, vector<1x1x64xf32>
    %215 = vector.shape_cast %214 : vector<1x1x64xf32> to vector<1x64xf32>
    %c0_188 = arith.constant 0 : index
    %c0_189 = arith.constant 0 : index
    %c0_190 = arith.constant 0 : index
    %216 = vector.load %arg24[%c0_188, %c0_189, %c0_190] : memref<2x1x64xf32, #tpu.memory_space<vmem>>, vector<1x1x64xf32>
    %217 = vector.shape_cast %216 : vector<1x1x64xf32> to vector<1x64xf32>
    %cst_191 = arith.constant dense<0.000000e+00> : vector<16xf32>
    %218 = vector.multi_reduction <add>, %213, %cst_191 [1] : vector<16x64xf32> to vector<16xf32>
    %219 = vector.shape_cast %218 : vector<16xf32> to vector<16x1xf32>
    %cst_192 = arith.constant 6.400000e+01 : f32
    %220 = vector.broadcast %cst_192 : f32 to vector<16x1xf32>
    %221 = arith.divf %219, %220 : vector<16x1xf32>
    %222 = vector.broadcast %221 : vector<16x1xf32> to vector<16x64xf32>
    %223 = arith.subf %213, %222 : vector<16x64xf32>
    %224 = arith.mulf %223, %223 : vector<16x64xf32>
    %cst_193 = arith.constant dense<0.000000e+00> : vector<16xf32>
    %225 = vector.multi_reduction <add>, %224, %cst_193 [1] : vector<16x64xf32> to vector<16xf32>
    %226 = vector.shape_cast %225 : vector<16xf32> to vector<16x1xf32>
    %cst_194 = arith.constant 6.400000e+01 : f32
    %227 = vector.broadcast %cst_194 : f32 to vector<16x1xf32>
    %228 = arith.divf %226, %227 : vector<16x1xf32>
    %229 = vector.broadcast %221 : vector<16x1xf32> to vector<16x64xf32>
    %230 = arith.subf %213, %229 : vector<16x64xf32>
    %cst_195 = arith.constant 9.99999974E-6 : f32
    %231 = vector.broadcast %cst_195 : f32 to vector<16x1xf32>
    %232 = arith.addf %228, %231 : vector<16x1xf32>
    %233 = math.rsqrt %232 : vector<16x1xf32>
    %234 = vector.broadcast %233 : vector<16x1xf32> to vector<16x64xf32>
    %235 = arith.mulf %230, %234 : vector<16x64xf32>
    %236 = vector.broadcast %215 : vector<1x64xf32> to vector<16x64xf32>
    %237 = arith.mulf %235, %236 : vector<16x64xf32>
    %238 = vector.broadcast %217 : vector<1x64xf32> to vector<16x64xf32>
    %239 = arith.addf %237, %238 : vector<16x64xf32>
    %c0_196 = arith.constant 0 : index
    %c0_197 = arith.constant 0 : index
    %c0_198 = arith.constant 0 : index
    %240 = vector.load %arg12[%c0_196, %c0_197, %c0_198] : memref<2x1x32xf32, #tpu.memory_space<vmem>>, vector<1x1x32xf32>
    %241 = vector.shape_cast %240 : vector<1x1x32xf32> to vector<1x32xf32>
    %c0_199 = arith.constant 0 : index
    %c0_200 = arith.constant 0 : index
    %c0_201 = arith.constant 0 : index
    %242 = vector.load %arg14[%c0_199, %c0_200, %c0_201] : memref<2x1x32xf32, #tpu.memory_space<vmem>>, vector<1x1x32xf32>
    %243 = vector.shape_cast %242 : vector<1x1x32xf32> to vector<1x32xf32>
    %c0_202 = arith.constant 0 : index
    %c0_203 = arith.constant 0 : index
    %c0_204 = arith.constant 0 : index
    %244 = vector.load %arg6[%c0_202, %c0_203, %c0_204] : memref<2x1x32xf32, #tpu.memory_space<vmem>>, vector<1x1x32xf32>
    %245 = vector.shape_cast %244 : vector<1x1x32xf32> to vector<1x32xf32>
    %c0_205 = arith.constant 0 : index
    %c0_206 = arith.constant 0 : index
    %c0_207 = arith.constant 0 : index
    %246 = vector.load %arg5[%c0_205, %c0_206, %c0_207] : memref<2x1x32xf32, #tpu.memory_space<vmem>>, vector<1x1x32xf32>
    %247 = vector.shape_cast %246 : vector<1x1x32xf32> to vector<1x32xf32>
    %c0_208 = arith.constant 0 : index
    %c0_209 = arith.constant 0 : index
    %c0_210 = arith.constant 0 : index
    %248 = vector.load %arg7[%c0_208, %c0_209, %c0_210] : memref<2x1x32xf32, #tpu.memory_space<vmem>>, vector<1x1x32xf32>
    %249 = vector.shape_cast %248 : vector<1x1x32xf32> to vector<1x32xf32>
    %c0_211 = arith.constant 0 : index
    %c0_212 = arith.constant 0 : index
    %c0_213 = arith.constant 0 : index
    %250 = vector.load %arg8[%c0_211, %c0_212, %c0_213] : memref<2x1x32xf32, #tpu.memory_space<vmem>>, vector<1x1x32xf32>
    %251 = vector.shape_cast %250 : vector<1x1x32xf32> to vector<1x32xf32>
    %c0_214 = arith.constant 0 : index
    %c0_215 = arith.constant 0 : index
    %c0_216 = arith.constant 0 : index
    %252 = vector.load %arg13[%c0_214, %c0_215, %c0_216] : memref<2x64x32xf32, #tpu.memory_space<vmem>>, vector<1x64x32xf32>
    %253 = vector.shape_cast %252 : vector<1x64x32xf32> to vector<64x32xf32>
    %cst_217 = arith.constant dense<0.000000e+00> : vector<16x32xf32>
    %254 = tpu.matmul %239, %253, %cst_217 {dimension_numbers = #tpu.dot_dimension_numbers<[1], [0], [0], [1], [0, 0, 1, 1], [], []>} : vector<16x64xf32>, vector<64x32xf32>, vector<16x32xf32> -> vector<16x32xf32>
    %255 = vector.broadcast %241 : vector<1x32xf32> to vector<16x32xf32>
    %256 = arith.addf %254, %255 : vector<16x32xf32>
    %c0_218 = arith.constant 0 : index
    %c2_219 = arith.constant 2 : index
    %c0_220 = arith.constant 0 : index
    %c0_221 = arith.constant 0 : index
    %257 = vector.load %arg15[%c0_218, %c2_219, %c0_220, %c0_221] : memref<2x5x64x32xf32, #tpu.memory_space<vmem>>, vector<1x1x64x32xf32>
    %258 = vector.shape_cast %257 : vector<1x1x64x32xf32> to vector<64x32xf32>
    %cst_222 = arith.constant dense<0.000000e+00> : vector<16x32xf32>
    %259 = tpu.matmul %239, %258, %cst_222 {dimension_numbers = #tpu.dot_dimension_numbers<[1], [0], [0], [1], [0, 0, 1, 1], [], []>} : vector<16x64xf32>, vector<64x32xf32>, vector<16x32xf32> -> vector<16x32xf32>
    %c0_223 = arith.constant 0 : index
    %c0_224 = arith.constant 0 : index
    %c0_225 = arith.constant 0 : index
    %c0_226 = arith.constant 0 : index
    %260 = vector.load %arg15[%c0_223, %c0_224, %c0_225, %c0_226] : memref<2x5x64x32xf32, #tpu.memory_space<vmem>>, vector<1x1x64x32xf32>
    %261 = vector.shape_cast %260 : vector<1x1x64x32xf32> to vector<64x32xf32>
    %cst_227 = arith.constant dense<0.000000e+00> : vector<16x32xf32>
    %262 = tpu.matmul %239, %261, %cst_227 {dimension_numbers = #tpu.dot_dimension_numbers<[1], [0], [0], [1], [0, 0, 1, 1], [], []>} : vector<16x64xf32>, vector<64x32xf32>, vector<16x32xf32> -> vector<16x32xf32>
    %c0_228 = arith.constant 0 : index
    %c0_229 = arith.constant 0 : index
    %c0_230 = arith.constant 0 : index
    %263 = vector.load %arg35[%c0_228, %c0_229, %c0_230] : memref<5x16x16xf32, #tpu.memory_space<vmem>>, vector<1x16x16xf32>
    %264 = vector.shape_cast %263 : vector<1x16x16xf32> to vector<16x16xf32>
    %cst_231 = arith.constant dense<0.000000e+00> : vector<16x32xf32>
    %265 = tpu.matmul %264, %262, %cst_231 {dimension_numbers = #tpu.dot_dimension_numbers<[1], [0], [0], [1], [0, 0, 1, 1], [], []>} : vector<16x16xf32>, vector<16x32xf32>, vector<16x32xf32> -> vector<16x32xf32>
    %266 = arith.addf %259, %265 : vector<16x32xf32>
    %c0_232 = arith.constant 0 : index
    %c1_233 = arith.constant 1 : index
    %c0_234 = arith.constant 0 : index
    %c0_235 = arith.constant 0 : index
    %267 = vector.load %arg15[%c0_232, %c1_233, %c0_234, %c0_235] : memref<2x5x64x32xf32, #tpu.memory_space<vmem>>, vector<1x1x64x32xf32>
    %268 = vector.shape_cast %267 : vector<1x1x64x32xf32> to vector<64x32xf32>
    %cst_236 = arith.constant dense<0.000000e+00> : vector<16x32xf32>
    %269 = tpu.matmul %239, %268, %cst_236 {dimension_numbers = #tpu.dot_dimension_numbers<[1], [0], [0], [1], [0, 0, 1, 1], [], []>} : vector<16x64xf32>, vector<64x32xf32>, vector<16x32xf32> -> vector<16x32xf32>
    %c1_237 = arith.constant 1 : index
    %c0_238 = arith.constant 0 : index
    %c0_239 = arith.constant 0 : index
    %270 = vector.load %arg35[%c1_237, %c0_238, %c0_239] : memref<5x16x16xf32, #tpu.memory_space<vmem>>, vector<1x16x16xf32>
    %271 = vector.shape_cast %270 : vector<1x16x16xf32> to vector<16x16xf32>
    %cst_240 = arith.constant dense<0.000000e+00> : vector<16x32xf32>
    %272 = tpu.matmul %271, %269, %cst_240 {dimension_numbers = #tpu.dot_dimension_numbers<[1], [0], [0], [1], [0, 0, 1, 1], [], []>} : vector<16x16xf32>, vector<16x32xf32>, vector<16x32xf32> -> vector<16x32xf32>
    %273 = arith.addf %266, %272 : vector<16x32xf32>
    %c0_241 = arith.constant 0 : index
    %c3_242 = arith.constant 3 : index
    %c0_243 = arith.constant 0 : index
    %c0_244 = arith.constant 0 : index
    %274 = vector.load %arg15[%c0_241, %c3_242, %c0_243, %c0_244] : memref<2x5x64x32xf32, #tpu.memory_space<vmem>>, vector<1x1x64x32xf32>
    %275 = vector.shape_cast %274 : vector<1x1x64x32xf32> to vector<64x32xf32>
    %cst_245 = arith.constant dense<0.000000e+00> : vector<16x32xf32>
    %276 = tpu.matmul %239, %275, %cst_245 {dimension_numbers = #tpu.dot_dimension_numbers<[1], [0], [0], [1], [0, 0, 1, 1], [], []>} : vector<16x64xf32>, vector<64x32xf32>, vector<16x32xf32> -> vector<16x32xf32>
    %c3_246 = arith.constant 3 : index
    %c0_247 = arith.constant 0 : index
    %c0_248 = arith.constant 0 : index
    %277 = vector.load %arg35[%c3_246, %c0_247, %c0_248] : memref<5x16x16xf32, #tpu.memory_space<vmem>>, vector<1x16x16xf32>
    %278 = vector.shape_cast %277 : vector<1x16x16xf32> to vector<16x16xf32>
    %cst_249 = arith.constant dense<0.000000e+00> : vector<16x32xf32>
    %279 = tpu.matmul %278, %276, %cst_249 {dimension_numbers = #tpu.dot_dimension_numbers<[1], [0], [0], [1], [0, 0, 1, 1], [], []>} : vector<16x16xf32>, vector<16x32xf32>, vector<16x32xf32> -> vector<16x32xf32>
    %280 = arith.addf %273, %279 : vector<16x32xf32>
    %c0_250 = arith.constant 0 : index
    %c4 = arith.constant 4 : index
    %c0_251 = arith.constant 0 : index
    %c0_252 = arith.constant 0 : index
    %281 = vector.load %arg15[%c0_250, %c4, %c0_251, %c0_252] : memref<2x5x64x32xf32, #tpu.memory_space<vmem>>, vector<1x1x64x32xf32>
    %282 = vector.shape_cast %281 : vector<1x1x64x32xf32> to vector<64x32xf32>
    %cst_253 = arith.constant dense<0.000000e+00> : vector<16x32xf32>
    %283 = tpu.matmul %239, %282, %cst_253 {dimension_numbers = #tpu.dot_dimension_numbers<[1], [0], [0], [1], [0, 0, 1, 1], [], []>} : vector<16x64xf32>, vector<64x32xf32>, vector<16x32xf32> -> vector<16x32xf32>
    %c4_254 = arith.constant 4 : index
    %c0_255 = arith.constant 0 : index
    %c0_256 = arith.constant 0 : index
    %284 = vector.load %arg35[%c4_254, %c0_255, %c0_256] : memref<5x16x16xf32, #tpu.memory_space<vmem>>, vector<1x16x16xf32>
    %285 = vector.shape_cast %284 : vector<1x16x16xf32> to vector<16x16xf32>
    %cst_257 = arith.constant dense<0.000000e+00> : vector<16x32xf32>
    %286 = tpu.matmul %285, %283, %cst_257 {dimension_numbers = #tpu.dot_dimension_numbers<[1], [0], [0], [1], [0, 0, 1, 1], [], []>} : vector<16x16xf32>, vector<16x32xf32>, vector<16x32xf32> -> vector<16x32xf32>
    %287 = arith.addf %280, %286 : vector<16x32xf32>
    %288 = vector.broadcast %243 : vector<1x32xf32> to vector<16x32xf32>
    %289 = arith.addf %287, %288 : vector<16x32xf32>
    %cst_258 = arith.constant 0.000000e+00 : f32
    %290 = vector.broadcast %cst_258 : f32 to vector<16x32xf32>
    %291 = arith.maximumf %289, %290 : vector<16x32xf32>
    %292 = vector.broadcast %249 : vector<1x32xf32> to vector<16x32xf32>
    %293 = arith.subf %291, %292 : vector<16x32xf32>
    %cst_259 = arith.constant 9.99999974E-6 : f32
    %294 = vector.broadcast %cst_259 : f32 to vector<1x32xf32>
    %295 = arith.addf %251, %294 : vector<1x32xf32>
    %296 = math.rsqrt %295 : vector<1x32xf32>
    %297 = vector.broadcast %296 : vector<1x32xf32> to vector<16x32xf32>
    %298 = arith.mulf %293, %297 : vector<16x32xf32>
    %299 = vector.broadcast %245 : vector<1x32xf32> to vector<16x32xf32>
    %300 = arith.mulf %298, %299 : vector<16x32xf32>
    %301 = vector.broadcast %247 : vector<1x32xf32> to vector<16x32xf32>
    %302 = arith.addf %300, %301 : vector<16x32xf32>
    %303 = arith.addf %302, %256 : vector<16x32xf32>
    %c1_260 = arith.constant 1 : index
    %c0_261 = arith.constant 0 : index
    %c0_262 = arith.constant 0 : index
    %304 = vector.load %arg21[%c1_260, %c0_261, %c0_262] : memref<2x32x64xf32, #tpu.memory_space<vmem>>, vector<1x32x64xf32>
    %305 = vector.shape_cast %304 : vector<1x32x64xf32> to vector<32x64xf32>
    %cst_263 = arith.constant dense<0.000000e+00> : vector<16x64xf32>
    %306 = tpu.matmul %303, %305, %cst_263 {dimension_numbers = #tpu.dot_dimension_numbers<[1], [0], [0], [1], [0, 0, 1, 1], [], []>} : vector<16x32xf32>, vector<32x64xf32>, vector<16x64xf32> -> vector<16x64xf32>
    %c1_264 = arith.constant 1 : index
    %c0_265 = arith.constant 0 : index
    %c0_266 = arith.constant 0 : index
    %307 = vector.load %arg20[%c1_264, %c0_265, %c0_266] : memref<2x1x64xf32, #tpu.memory_space<vmem>>, vector<1x1x64xf32>
    %308 = vector.shape_cast %307 : vector<1x1x64xf32> to vector<1x64xf32>
    %309 = vector.broadcast %308 : vector<1x64xf32> to vector<16x64xf32>
    %310 = arith.addf %306, %309 : vector<16x64xf32>
    %c1_267 = arith.constant 1 : index
    %c0_268 = arith.constant 0 : index
    %c0_269 = arith.constant 0 : index
    %c0_270 = arith.constant 0 : index
    %311 = vector.load %arg40[%c1_267, %c0_268, %c0_269, %c0_270] : memref<2x4x64x16xf32, #tpu.memory_space<vmem>>, vector<1x1x64x16xf32>
    %312 = vector.shape_cast %311 : vector<1x1x64x16xf32> to vector<64x16xf32>
    %cst_271 = arith.constant dense<0.000000e+00> : vector<16x16xf32>
    %313 = tpu.matmul %310, %312, %cst_271 {dimension_numbers = #tpu.dot_dimension_numbers<[1], [0], [0], [1], [0, 0, 1, 1], [], []>} : vector<16x64xf32>, vector<64x16xf32>, vector<16x16xf32> -> vector<16x16xf32>
    %c1_272 = arith.constant 1 : index
    %c0_273 = arith.constant 0 : index
    %c0_274 = arith.constant 0 : index
    %c0_275 = arith.constant 0 : index
    %314 = vector.load %arg10[%c1_272, %c0_273, %c0_274, %c0_275] : memref<2x4x1x16xf32, #tpu.memory_space<vmem>>, vector<1x1x1x16xf32>
    %315 = vector.shape_cast %314 : vector<1x1x1x16xf32> to vector<1x16xf32>
    %316 = vector.broadcast %315 : vector<1x16xf32> to vector<16x16xf32>
    %317 = arith.addf %313, %316 : vector<16x16xf32>
    %c1_276 = arith.constant 1 : index
    %c0_277 = arith.constant 0 : index
    %c0_278 = arith.constant 0 : index
    %c0_279 = arith.constant 0 : index
    %318 = vector.load %arg38[%c1_276, %c0_277, %c0_278, %c0_279] : memref<2x4x64x16xf32, #tpu.memory_space<vmem>>, vector<1x1x64x16xf32>
    %319 = vector.shape_cast %318 : vector<1x1x64x16xf32> to vector<64x16xf32>
    %cst_280 = arith.constant dense<0.000000e+00> : vector<16x16xf32>
    %320 = tpu.matmul %310, %319, %cst_280 {dimension_numbers = #tpu.dot_dimension_numbers<[1], [0], [0], [1], [0, 0, 1, 1], [], []>} : vector<16x64xf32>, vector<64x16xf32>, vector<16x16xf32> -> vector<16x16xf32>
    %c1_281 = arith.constant 1 : index
    %c0_282 = arith.constant 0 : index
    %c0_283 = arith.constant 0 : index
    %c0_284 = arith.constant 0 : index
    %321 = vector.load %arg4[%c1_281, %c0_282, %c0_283, %c0_284] : memref<2x4x1x16xf32, #tpu.memory_space<vmem>>, vector<1x1x1x16xf32>
    %322 = vector.shape_cast %321 : vector<1x1x1x16xf32> to vector<1x16xf32>
    %323 = vector.broadcast %322 : vector<1x16xf32> to vector<16x16xf32>
    %324 = arith.addf %320, %323 : vector<16x16xf32>
    %c1_285 = arith.constant 1 : index
    %c0_286 = arith.constant 0 : index
    %c0_287 = arith.constant 0 : index
    %c0_288 = arith.constant 0 : index
    %325 = vector.load %arg41[%c1_285, %c0_286, %c0_287, %c0_288] : memref<2x4x64x16xf32, #tpu.memory_space<vmem>>, vector<1x1x64x16xf32>
    %326 = vector.shape_cast %325 : vector<1x1x64x16xf32> to vector<64x16xf32>
    %cst_289 = arith.constant dense<0.000000e+00> : vector<16x16xf32>
    %327 = tpu.matmul %310, %326, %cst_289 {dimension_numbers = #tpu.dot_dimension_numbers<[1], [0], [0], [1], [0, 0, 1, 1], [], []>} : vector<16x64xf32>, vector<64x16xf32>, vector<16x16xf32> -> vector<16x16xf32>
    %c1_290 = arith.constant 1 : index
    %c0_291 = arith.constant 0 : index
    %c0_292 = arith.constant 0 : index
    %c0_293 = arith.constant 0 : index
    %328 = vector.load %arg11[%c1_290, %c0_291, %c0_292, %c0_293] : memref<2x4x1x16xf32, #tpu.memory_space<vmem>>, vector<1x1x1x16xf32>
    %329 = vector.shape_cast %328 : vector<1x1x1x16xf32> to vector<1x16xf32>
    %330 = vector.broadcast %329 : vector<1x16xf32> to vector<16x16xf32>
    %331 = arith.addf %327, %330 : vector<16x16xf32>
    %cst_294 = arith.constant dense<0.000000e+00> : vector<16x16xf32>
    %332 = tpu.matmul %317, %324, %cst_294 {dimension_numbers = #tpu.dot_dimension_numbers<[1], [1], [0], [0], [0, 0, 1, 0], [], []>} : vector<16x16xf32>, vector<16x16xf32>, vector<16x16xf32> -> vector<16x16xf32>
    %cst_295 = arith.constant 2.500000e-01 : f32
    %333 = vector.broadcast %cst_295 : f32 to vector<16x16xf32>
    %334 = arith.mulf %332, %333 : vector<16x16xf32>
    %335 = arith.addf %334, %3 : vector<16x16xf32>
    %cst_296 = arith.constant dense<0xFF800000> : vector<16xf32>
    %336 = vector.multi_reduction <maximumf>, %335, %cst_296 [1] : vector<16x16xf32> to vector<16xf32>
    %337 = vector.shape_cast %336 : vector<16xf32> to vector<16x1xf32>
    %338 = vector.broadcast %337 : vector<16x1xf32> to vector<16x16xf32>
    %339 = arith.subf %335, %338 : vector<16x16xf32>
    %340 = math.exp %339 : vector<16x16xf32>
    %cst_297 = arith.constant dense<0.000000e+00> : vector<16xf32>
    %341 = vector.multi_reduction <add>, %340, %cst_297 [1] : vector<16x16xf32> to vector<16xf32>
    %342 = vector.shape_cast %341 : vector<16xf32> to vector<16x1xf32>
    %343 = vector.broadcast %342 : vector<16x1xf32> to vector<16x16xf32>
    %344 = arith.divf %340, %343 : vector<16x16xf32>
    %cst_298 = arith.constant dense<0.000000e+00> : vector<16x16xf32>
    %345 = tpu.matmul %344, %331, %cst_298 {dimension_numbers = #tpu.dot_dimension_numbers<[1], [0], [0], [1], [0, 0, 1, 1], [], []>} : vector<16x16xf32>, vector<16x16xf32>, vector<16x16xf32> -> vector<16x16xf32>
    %c1_299 = arith.constant 1 : index
    %c0_300 = arith.constant 0 : index
    %c0_301 = arith.constant 0 : index
    %c0_302 = arith.constant 0 : index
    %346 = vector.load %arg39[%c1_299, %c0_300, %c0_301, %c0_302] : memref<2x4x16x64xf32, #tpu.memory_space<vmem>>, vector<1x1x16x64xf32>
    %347 = vector.shape_cast %346 : vector<1x1x16x64xf32> to vector<16x64xf32>
    %cst_303 = arith.constant dense<0.000000e+00> : vector<16x64xf32>
    %348 = tpu.matmul %345, %347, %cst_303 {dimension_numbers = #tpu.dot_dimension_numbers<[1], [0], [0], [1], [0, 0, 1, 1], [], []>} : vector<16x16xf32>, vector<16x64xf32>, vector<16x64xf32> -> vector<16x64xf32>
    %c1_304 = arith.constant 1 : index
    %c1_305 = arith.constant 1 : index
    %c0_306 = arith.constant 0 : index
    %c0_307 = arith.constant 0 : index
    %349 = vector.load %arg40[%c1_304, %c1_305, %c0_306, %c0_307] : memref<2x4x64x16xf32, #tpu.memory_space<vmem>>, vector<1x1x64x16xf32>
    %350 = vector.shape_cast %349 : vector<1x1x64x16xf32> to vector<64x16xf32>
    %cst_308 = arith.constant dense<0.000000e+00> : vector<16x16xf32>
    %351 = tpu.matmul %310, %350, %cst_308 {dimension_numbers = #tpu.dot_dimension_numbers<[1], [0], [0], [1], [0, 0, 1, 1], [], []>} : vector<16x64xf32>, vector<64x16xf32>, vector<16x16xf32> -> vector<16x16xf32>
    %c1_309 = arith.constant 1 : index
    %c1_310 = arith.constant 1 : index
    %c0_311 = arith.constant 0 : index
    %c0_312 = arith.constant 0 : index
    %352 = vector.load %arg10[%c1_309, %c1_310, %c0_311, %c0_312] : memref<2x4x1x16xf32, #tpu.memory_space<vmem>>, vector<1x1x1x16xf32>
    %353 = vector.shape_cast %352 : vector<1x1x1x16xf32> to vector<1x16xf32>
    %354 = vector.broadcast %353 : vector<1x16xf32> to vector<16x16xf32>
    %355 = arith.addf %351, %354 : vector<16x16xf32>
    %c1_313 = arith.constant 1 : index
    %c1_314 = arith.constant 1 : index
    %c0_315 = arith.constant 0 : index
    %c0_316 = arith.constant 0 : index
    %356 = vector.load %arg38[%c1_313, %c1_314, %c0_315, %c0_316] : memref<2x4x64x16xf32, #tpu.memory_space<vmem>>, vector<1x1x64x16xf32>
    %357 = vector.shape_cast %356 : vector<1x1x64x16xf32> to vector<64x16xf32>
    %cst_317 = arith.constant dense<0.000000e+00> : vector<16x16xf32>
    %358 = tpu.matmul %310, %357, %cst_317 {dimension_numbers = #tpu.dot_dimension_numbers<[1], [0], [0], [1], [0, 0, 1, 1], [], []>} : vector<16x64xf32>, vector<64x16xf32>, vector<16x16xf32> -> vector<16x16xf32>
    %c1_318 = arith.constant 1 : index
    %c1_319 = arith.constant 1 : index
    %c0_320 = arith.constant 0 : index
    %c0_321 = arith.constant 0 : index
    %359 = vector.load %arg4[%c1_318, %c1_319, %c0_320, %c0_321] : memref<2x4x1x16xf32, #tpu.memory_space<vmem>>, vector<1x1x1x16xf32>
    %360 = vector.shape_cast %359 : vector<1x1x1x16xf32> to vector<1x16xf32>
    %361 = vector.broadcast %360 : vector<1x16xf32> to vector<16x16xf32>
    %362 = arith.addf %358, %361 : vector<16x16xf32>
    %c1_322 = arith.constant 1 : index
    %c1_323 = arith.constant 1 : index
    %c0_324 = arith.constant 0 : index
    %c0_325 = arith.constant 0 : index
    %363 = vector.load %arg41[%c1_322, %c1_323, %c0_324, %c0_325] : memref<2x4x64x16xf32, #tpu.memory_space<vmem>>, vector<1x1x64x16xf32>
    %364 = vector.shape_cast %363 : vector<1x1x64x16xf32> to vector<64x16xf32>
    %cst_326 = arith.constant dense<0.000000e+00> : vector<16x16xf32>
    %365 = tpu.matmul %310, %364, %cst_326 {dimension_numbers = #tpu.dot_dimension_numbers<[1], [0], [0], [1], [0, 0, 1, 1], [], []>} : vector<16x64xf32>, vector<64x16xf32>, vector<16x16xf32> -> vector<16x16xf32>
    %c1_327 = arith.constant 1 : index
    %c1_328 = arith.constant 1 : index
    %c0_329 = arith.constant 0 : index
    %c0_330 = arith.constant 0 : index
    %366 = vector.load %arg11[%c1_327, %c1_328, %c0_329, %c0_330] : memref<2x4x1x16xf32, #tpu.memory_space<vmem>>, vector<1x1x1x16xf32>
    %367 = vector.shape_cast %366 : vector<1x1x1x16xf32> to vector<1x16xf32>
    %368 = vector.broadcast %367 : vector<1x16xf32> to vector<16x16xf32>
    %369 = arith.addf %365, %368 : vector<16x16xf32>
    %cst_331 = arith.constant dense<0.000000e+00> : vector<16x16xf32>
    %370 = tpu.matmul %355, %362, %cst_331 {dimension_numbers = #tpu.dot_dimension_numbers<[1], [1], [0], [0], [0, 0, 1, 0], [], []>} : vector<16x16xf32>, vector<16x16xf32>, vector<16x16xf32> -> vector<16x16xf32>
    %cst_332 = arith.constant 2.500000e-01 : f32
    %371 = vector.broadcast %cst_332 : f32 to vector<16x16xf32>
    %372 = arith.mulf %370, %371 : vector<16x16xf32>
    %373 = arith.addf %372, %3 : vector<16x16xf32>
    %cst_333 = arith.constant dense<0xFF800000> : vector<16xf32>
    %374 = vector.multi_reduction <maximumf>, %373, %cst_333 [1] : vector<16x16xf32> to vector<16xf32>
    %375 = vector.shape_cast %374 : vector<16xf32> to vector<16x1xf32>
    %376 = vector.broadcast %375 : vector<16x1xf32> to vector<16x16xf32>
    %377 = arith.subf %373, %376 : vector<16x16xf32>
    %378 = math.exp %377 : vector<16x16xf32>
    %cst_334 = arith.constant dense<0.000000e+00> : vector<16xf32>
    %379 = vector.multi_reduction <add>, %378, %cst_334 [1] : vector<16x16xf32> to vector<16xf32>
    %380 = vector.shape_cast %379 : vector<16xf32> to vector<16x1xf32>
    %381 = vector.broadcast %380 : vector<16x1xf32> to vector<16x16xf32>
    %382 = arith.divf %378, %381 : vector<16x16xf32>
    %cst_335 = arith.constant dense<0.000000e+00> : vector<16x16xf32>
    %383 = tpu.matmul %382, %369, %cst_335 {dimension_numbers = #tpu.dot_dimension_numbers<[1], [0], [0], [1], [0, 0, 1, 1], [], []>} : vector<16x16xf32>, vector<16x16xf32>, vector<16x16xf32> -> vector<16x16xf32>
    %c1_336 = arith.constant 1 : index
    %c1_337 = arith.constant 1 : index
    %c0_338 = arith.constant 0 : index
    %c0_339 = arith.constant 0 : index
    %384 = vector.load %arg39[%c1_336, %c1_337, %c0_338, %c0_339] : memref<2x4x16x64xf32, #tpu.memory_space<vmem>>, vector<1x1x16x64xf32>
    %385 = vector.shape_cast %384 : vector<1x1x16x64xf32> to vector<16x64xf32>
    %cst_340 = arith.constant dense<0.000000e+00> : vector<16x64xf32>
    %386 = tpu.matmul %383, %385, %cst_340 {dimension_numbers = #tpu.dot_dimension_numbers<[1], [0], [0], [1], [0, 0, 1, 1], [], []>} : vector<16x16xf32>, vector<16x64xf32>, vector<16x64xf32> -> vector<16x64xf32>
    %387 = arith.addf %348, %386 : vector<16x64xf32>
    %c1_341 = arith.constant 1 : index
    %c2_342 = arith.constant 2 : index
    %c0_343 = arith.constant 0 : index
    %c0_344 = arith.constant 0 : index
    %388 = vector.load %arg40[%c1_341, %c2_342, %c0_343, %c0_344] : memref<2x4x64x16xf32, #tpu.memory_space<vmem>>, vector<1x1x64x16xf32>
    %389 = vector.shape_cast %388 : vector<1x1x64x16xf32> to vector<64x16xf32>
    %cst_345 = arith.constant dense<0.000000e+00> : vector<16x16xf32>
    %390 = tpu.matmul %310, %389, %cst_345 {dimension_numbers = #tpu.dot_dimension_numbers<[1], [0], [0], [1], [0, 0, 1, 1], [], []>} : vector<16x64xf32>, vector<64x16xf32>, vector<16x16xf32> -> vector<16x16xf32>
    %c1_346 = arith.constant 1 : index
    %c2_347 = arith.constant 2 : index
    %c0_348 = arith.constant 0 : index
    %c0_349 = arith.constant 0 : index
    %391 = vector.load %arg10[%c1_346, %c2_347, %c0_348, %c0_349] : memref<2x4x1x16xf32, #tpu.memory_space<vmem>>, vector<1x1x1x16xf32>
    %392 = vector.shape_cast %391 : vector<1x1x1x16xf32> to vector<1x16xf32>
    %393 = vector.broadcast %392 : vector<1x16xf32> to vector<16x16xf32>
    %394 = arith.addf %390, %393 : vector<16x16xf32>
    %c1_350 = arith.constant 1 : index
    %c2_351 = arith.constant 2 : index
    %c0_352 = arith.constant 0 : index
    %c0_353 = arith.constant 0 : index
    %395 = vector.load %arg38[%c1_350, %c2_351, %c0_352, %c0_353] : memref<2x4x64x16xf32, #tpu.memory_space<vmem>>, vector<1x1x64x16xf32>
    %396 = vector.shape_cast %395 : vector<1x1x64x16xf32> to vector<64x16xf32>
    %cst_354 = arith.constant dense<0.000000e+00> : vector<16x16xf32>
    %397 = tpu.matmul %310, %396, %cst_354 {dimension_numbers = #tpu.dot_dimension_numbers<[1], [0], [0], [1], [0, 0, 1, 1], [], []>} : vector<16x64xf32>, vector<64x16xf32>, vector<16x16xf32> -> vector<16x16xf32>
    %c1_355 = arith.constant 1 : index
    %c2_356 = arith.constant 2 : index
    %c0_357 = arith.constant 0 : index
    %c0_358 = arith.constant 0 : index
    %398 = vector.load %arg4[%c1_355, %c2_356, %c0_357, %c0_358] : memref<2x4x1x16xf32, #tpu.memory_space<vmem>>, vector<1x1x1x16xf32>
    %399 = vector.shape_cast %398 : vector<1x1x1x16xf32> to vector<1x16xf32>
    %400 = vector.broadcast %399 : vector<1x16xf32> to vector<16x16xf32>
    %401 = arith.addf %397, %400 : vector<16x16xf32>
    %c1_359 = arith.constant 1 : index
    %c2_360 = arith.constant 2 : index
    %c0_361 = arith.constant 0 : index
    %c0_362 = arith.constant 0 : index
    %402 = vector.load %arg41[%c1_359, %c2_360, %c0_361, %c0_362] : memref<2x4x64x16xf32, #tpu.memory_space<vmem>>, vector<1x1x64x16xf32>
    %403 = vector.shape_cast %402 : vector<1x1x64x16xf32> to vector<64x16xf32>
    %cst_363 = arith.constant dense<0.000000e+00> : vector<16x16xf32>
    %404 = tpu.matmul %310, %403, %cst_363 {dimension_numbers = #tpu.dot_dimension_numbers<[1], [0], [0], [1], [0, 0, 1, 1], [], []>} : vector<16x64xf32>, vector<64x16xf32>, vector<16x16xf32> -> vector<16x16xf32>
    %c1_364 = arith.constant 1 : index
    %c2_365 = arith.constant 2 : index
    %c0_366 = arith.constant 0 : index
    %c0_367 = arith.constant 0 : index
    %405 = vector.load %arg11[%c1_364, %c2_365, %c0_366, %c0_367] : memref<2x4x1x16xf32, #tpu.memory_space<vmem>>, vector<1x1x1x16xf32>
    %406 = vector.shape_cast %405 : vector<1x1x1x16xf32> to vector<1x16xf32>
    %407 = vector.broadcast %406 : vector<1x16xf32> to vector<16x16xf32>
    %408 = arith.addf %404, %407 : vector<16x16xf32>
    %cst_368 = arith.constant dense<0.000000e+00> : vector<16x16xf32>
    %409 = tpu.matmul %394, %401, %cst_368 {dimension_numbers = #tpu.dot_dimension_numbers<[1], [1], [0], [0], [0, 0, 1, 0], [], []>} : vector<16x16xf32>, vector<16x16xf32>, vector<16x16xf32> -> vector<16x16xf32>
    %cst_369 = arith.constant 2.500000e-01 : f32
    %410 = vector.broadcast %cst_369 : f32 to vector<16x16xf32>
    %411 = arith.mulf %409, %410 : vector<16x16xf32>
    %412 = arith.addf %411, %3 : vector<16x16xf32>
    %cst_370 = arith.constant dense<0xFF800000> : vector<16xf32>
    %413 = vector.multi_reduction <maximumf>, %412, %cst_370 [1] : vector<16x16xf32> to vector<16xf32>
    %414 = vector.shape_cast %413 : vector<16xf32> to vector<16x1xf32>
    %415 = vector.broadcast %414 : vector<16x1xf32> to vector<16x16xf32>
    %416 = arith.subf %412, %415 : vector<16x16xf32>
    %417 = math.exp %416 : vector<16x16xf32>
    %cst_371 = arith.constant dense<0.000000e+00> : vector<16xf32>
    %418 = vector.multi_reduction <add>, %417, %cst_371 [1] : vector<16x16xf32> to vector<16xf32>
    %419 = vector.shape_cast %418 : vector<16xf32> to vector<16x1xf32>
    %420 = vector.broadcast %419 : vector<16x1xf32> to vector<16x16xf32>
    %421 = arith.divf %417, %420 : vector<16x16xf32>
    %cst_372 = arith.constant dense<0.000000e+00> : vector<16x16xf32>
    %422 = tpu.matmul %421, %408, %cst_372 {dimension_numbers = #tpu.dot_dimension_numbers<[1], [0], [0], [1], [0, 0, 1, 1], [], []>} : vector<16x16xf32>, vector<16x16xf32>, vector<16x16xf32> -> vector<16x16xf32>
    %c1_373 = arith.constant 1 : index
    %c2_374 = arith.constant 2 : index
    %c0_375 = arith.constant 0 : index
    %c0_376 = arith.constant 0 : index
    %423 = vector.load %arg39[%c1_373, %c2_374, %c0_375, %c0_376] : memref<2x4x16x64xf32, #tpu.memory_space<vmem>>, vector<1x1x16x64xf32>
    %424 = vector.shape_cast %423 : vector<1x1x16x64xf32> to vector<16x64xf32>
    %cst_377 = arith.constant dense<0.000000e+00> : vector<16x64xf32>
    %425 = tpu.matmul %422, %424, %cst_377 {dimension_numbers = #tpu.dot_dimension_numbers<[1], [0], [0], [1], [0, 0, 1, 1], [], []>} : vector<16x16xf32>, vector<16x64xf32>, vector<16x64xf32> -> vector<16x64xf32>
    %426 = arith.addf %387, %425 : vector<16x64xf32>
    %c1_378 = arith.constant 1 : index
    %c3_379 = arith.constant 3 : index
    %c0_380 = arith.constant 0 : index
    %c0_381 = arith.constant 0 : index
    %427 = vector.load %arg40[%c1_378, %c3_379, %c0_380, %c0_381] : memref<2x4x64x16xf32, #tpu.memory_space<vmem>>, vector<1x1x64x16xf32>
    %428 = vector.shape_cast %427 : vector<1x1x64x16xf32> to vector<64x16xf32>
    %cst_382 = arith.constant dense<0.000000e+00> : vector<16x16xf32>
    %429 = tpu.matmul %310, %428, %cst_382 {dimension_numbers = #tpu.dot_dimension_numbers<[1], [0], [0], [1], [0, 0, 1, 1], [], []>} : vector<16x64xf32>, vector<64x16xf32>, vector<16x16xf32> -> vector<16x16xf32>
    %c1_383 = arith.constant 1 : index
    %c3_384 = arith.constant 3 : index
    %c0_385 = arith.constant 0 : index
    %c0_386 = arith.constant 0 : index
    %430 = vector.load %arg10[%c1_383, %c3_384, %c0_385, %c0_386] : memref<2x4x1x16xf32, #tpu.memory_space<vmem>>, vector<1x1x1x16xf32>
    %431 = vector.shape_cast %430 : vector<1x1x1x16xf32> to vector<1x16xf32>
    %432 = vector.broadcast %431 : vector<1x16xf32> to vector<16x16xf32>
    %433 = arith.addf %429, %432 : vector<16x16xf32>
    %c1_387 = arith.constant 1 : index
    %c3_388 = arith.constant 3 : index
    %c0_389 = arith.constant 0 : index
    %c0_390 = arith.constant 0 : index
    %434 = vector.load %arg38[%c1_387, %c3_388, %c0_389, %c0_390] : memref<2x4x64x16xf32, #tpu.memory_space<vmem>>, vector<1x1x64x16xf32>
    %435 = vector.shape_cast %434 : vector<1x1x64x16xf32> to vector<64x16xf32>
    %cst_391 = arith.constant dense<0.000000e+00> : vector<16x16xf32>
    %436 = tpu.matmul %310, %435, %cst_391 {dimension_numbers = #tpu.dot_dimension_numbers<[1], [0], [0], [1], [0, 0, 1, 1], [], []>} : vector<16x64xf32>, vector<64x16xf32>, vector<16x16xf32> -> vector<16x16xf32>
    %c1_392 = arith.constant 1 : index
    %c3_393 = arith.constant 3 : index
    %c0_394 = arith.constant 0 : index
    %c0_395 = arith.constant 0 : index
    %437 = vector.load %arg4[%c1_392, %c3_393, %c0_394, %c0_395] : memref<2x4x1x16xf32, #tpu.memory_space<vmem>>, vector<1x1x1x16xf32>
    %438 = vector.shape_cast %437 : vector<1x1x1x16xf32> to vector<1x16xf32>
    %439 = vector.broadcast %438 : vector<1x16xf32> to vector<16x16xf32>
    %440 = arith.addf %436, %439 : vector<16x16xf32>
    %c1_396 = arith.constant 1 : index
    %c3_397 = arith.constant 3 : index
    %c0_398 = arith.constant 0 : index
    %c0_399 = arith.constant 0 : index
    %441 = vector.load %arg41[%c1_396, %c3_397, %c0_398, %c0_399] : memref<2x4x64x16xf32, #tpu.memory_space<vmem>>, vector<1x1x64x16xf32>
    %442 = vector.shape_cast %441 : vector<1x1x64x16xf32> to vector<64x16xf32>
    %cst_400 = arith.constant dense<0.000000e+00> : vector<16x16xf32>
    %443 = tpu.matmul %310, %442, %cst_400 {dimension_numbers = #tpu.dot_dimension_numbers<[1], [0], [0], [1], [0, 0, 1, 1], [], []>} : vector<16x64xf32>, vector<64x16xf32>, vector<16x16xf32> -> vector<16x16xf32>
    %c1_401 = arith.constant 1 : index
    %c3_402 = arith.constant 3 : index
    %c0_403 = arith.constant 0 : index
    %c0_404 = arith.constant 0 : index
    %444 = vector.load %arg11[%c1_401, %c3_402, %c0_403, %c0_404] : memref<2x4x1x16xf32, #tpu.memory_space<vmem>>, vector<1x1x1x16xf32>
    %445 = vector.shape_cast %444 : vector<1x1x1x16xf32> to vector<1x16xf32>
    %446 = vector.broadcast %445 : vector<1x16xf32> to vector<16x16xf32>
    %447 = arith.addf %443, %446 : vector<16x16xf32>
    %cst_405 = arith.constant dense<0.000000e+00> : vector<16x16xf32>
    %448 = tpu.matmul %433, %440, %cst_405 {dimension_numbers = #tpu.dot_dimension_numbers<[1], [1], [0], [0], [0, 0, 1, 0], [], []>} : vector<16x16xf32>, vector<16x16xf32>, vector<16x16xf32> -> vector<16x16xf32>
    %cst_406 = arith.constant 2.500000e-01 : f32
    %449 = vector.broadcast %cst_406 : f32 to vector<16x16xf32>
    %450 = arith.mulf %448, %449 : vector<16x16xf32>
    %451 = arith.addf %450, %3 : vector<16x16xf32>
    %cst_407 = arith.constant dense<0xFF800000> : vector<16xf32>
    %452 = vector.multi_reduction <maximumf>, %451, %cst_407 [1] : vector<16x16xf32> to vector<16xf32>
    %453 = vector.shape_cast %452 : vector<16xf32> to vector<16x1xf32>
    %454 = vector.broadcast %453 : vector<16x1xf32> to vector<16x16xf32>
    %455 = arith.subf %451, %454 : vector<16x16xf32>
    %456 = math.exp %455 : vector<16x16xf32>
    %cst_408 = arith.constant dense<0.000000e+00> : vector<16xf32>
    %457 = vector.multi_reduction <add>, %456, %cst_408 [1] : vector<16x16xf32> to vector<16xf32>
    %458 = vector.shape_cast %457 : vector<16xf32> to vector<16x1xf32>
    %459 = vector.broadcast %458 : vector<16x1xf32> to vector<16x16xf32>
    %460 = arith.divf %456, %459 : vector<16x16xf32>
    %cst_409 = arith.constant dense<0.000000e+00> : vector<16x16xf32>
    %461 = tpu.matmul %460, %447, %cst_409 {dimension_numbers = #tpu.dot_dimension_numbers<[1], [0], [0], [1], [0, 0, 1, 1], [], []>} : vector<16x16xf32>, vector<16x16xf32>, vector<16x16xf32> -> vector<16x16xf32>
    %c1_410 = arith.constant 1 : index
    %c3_411 = arith.constant 3 : index
    %c0_412 = arith.constant 0 : index
    %c0_413 = arith.constant 0 : index
    %462 = vector.load %arg39[%c1_410, %c3_411, %c0_412, %c0_413] : memref<2x4x16x64xf32, #tpu.memory_space<vmem>>, vector<1x1x16x64xf32>
    %463 = vector.shape_cast %462 : vector<1x1x16x64xf32> to vector<16x64xf32>
    %cst_414 = arith.constant dense<0.000000e+00> : vector<16x64xf32>
    %464 = tpu.matmul %461, %463, %cst_414 {dimension_numbers = #tpu.dot_dimension_numbers<[1], [0], [0], [1], [0, 0, 1, 1], [], []>} : vector<16x16xf32>, vector<16x64xf32>, vector<16x64xf32> -> vector<16x64xf32>
    %465 = arith.addf %426, %464 : vector<16x64xf32>
    %c1_415 = arith.constant 1 : index
    %c0_416 = arith.constant 0 : index
    %c0_417 = arith.constant 0 : index
    %466 = vector.load %arg9[%c1_415, %c0_416, %c0_417] : memref<2x1x64xf32, #tpu.memory_space<vmem>>, vector<1x1x64xf32>
    %467 = vector.shape_cast %466 : vector<1x1x64xf32> to vector<1x64xf32>
    %468 = vector.broadcast %467 : vector<1x64xf32> to vector<16x64xf32>
    %469 = arith.addf %465, %468 : vector<16x64xf32>
    %470 = arith.addf %310, %469 : vector<16x64xf32>
    %c1_418 = arith.constant 1 : index
    %c0_419 = arith.constant 0 : index
    %c0_420 = arith.constant 0 : index
    %471 = vector.load %arg23[%c1_418, %c0_419, %c0_420] : memref<2x1x64xf32, #tpu.memory_space<vmem>>, vector<1x1x64xf32>
    %472 = vector.shape_cast %471 : vector<1x1x64xf32> to vector<1x64xf32>
    %c1_421 = arith.constant 1 : index
    %c0_422 = arith.constant 0 : index
    %c0_423 = arith.constant 0 : index
    %473 = vector.load %arg22[%c1_421, %c0_422, %c0_423] : memref<2x1x64xf32, #tpu.memory_space<vmem>>, vector<1x1x64xf32>
    %474 = vector.shape_cast %473 : vector<1x1x64xf32> to vector<1x64xf32>
    %cst_424 = arith.constant dense<0.000000e+00> : vector<16xf32>
    %475 = vector.multi_reduction <add>, %470, %cst_424 [1] : vector<16x64xf32> to vector<16xf32>
    %476 = vector.shape_cast %475 : vector<16xf32> to vector<16x1xf32>
    %cst_425 = arith.constant 6.400000e+01 : f32
    %477 = vector.broadcast %cst_425 : f32 to vector<16x1xf32>
    %478 = arith.divf %476, %477 : vector<16x1xf32>
    %479 = vector.broadcast %478 : vector<16x1xf32> to vector<16x64xf32>
    %480 = arith.subf %470, %479 : vector<16x64xf32>
    %481 = arith.mulf %480, %480 : vector<16x64xf32>
    %cst_426 = arith.constant dense<0.000000e+00> : vector<16xf32>
    %482 = vector.multi_reduction <add>, %481, %cst_426 [1] : vector<16x64xf32> to vector<16xf32>
    %483 = vector.shape_cast %482 : vector<16xf32> to vector<16x1xf32>
    %cst_427 = arith.constant 6.400000e+01 : f32
    %484 = vector.broadcast %cst_427 : f32 to vector<16x1xf32>
    %485 = arith.divf %483, %484 : vector<16x1xf32>
    %486 = vector.broadcast %478 : vector<16x1xf32> to vector<16x64xf32>
    %487 = arith.subf %470, %486 : vector<16x64xf32>
    %cst_428 = arith.constant 9.99999974E-6 : f32
    %488 = vector.broadcast %cst_428 : f32 to vector<16x1xf32>
    %489 = arith.addf %485, %488 : vector<16x1xf32>
    %490 = math.rsqrt %489 : vector<16x1xf32>
    %491 = vector.broadcast %490 : vector<16x1xf32> to vector<16x64xf32>
    %492 = arith.mulf %487, %491 : vector<16x64xf32>
    %493 = vector.broadcast %472 : vector<1x64xf32> to vector<16x64xf32>
    %494 = arith.mulf %492, %493 : vector<16x64xf32>
    %495 = vector.broadcast %474 : vector<1x64xf32> to vector<16x64xf32>
    %496 = arith.addf %494, %495 : vector<16x64xf32>
    %c1_429 = arith.constant 1 : index
    %c0_430 = arith.constant 0 : index
    %c0_431 = arith.constant 0 : index
    %497 = vector.load %arg36[%c1_429, %c0_430, %c0_431] : memref<2x64x64xf32, #tpu.memory_space<vmem>>, vector<1x64x64xf32>
    %498 = vector.shape_cast %497 : vector<1x64x64xf32> to vector<64x64xf32>
    %cst_432 = arith.constant dense<0.000000e+00> : vector<16x64xf32>
    %499 = tpu.matmul %496, %498, %cst_432 {dimension_numbers = #tpu.dot_dimension_numbers<[1], [0], [0], [1], [0, 0, 1, 1], [], []>} : vector<16x64xf32>, vector<64x64xf32>, vector<16x64xf32> -> vector<16x64xf32>
    %c1_433 = arith.constant 1 : index
    %c0_434 = arith.constant 0 : index
    %c0_435 = arith.constant 0 : index
    %500 = vector.load %arg2[%c1_433, %c0_434, %c0_435] : memref<2x1x64xf32, #tpu.memory_space<vmem>>, vector<1x1x64xf32>
    %501 = vector.shape_cast %500 : vector<1x1x64xf32> to vector<1x64xf32>
    %502 = vector.broadcast %501 : vector<1x64xf32> to vector<16x64xf32>
    %503 = arith.addf %499, %502 : vector<16x64xf32>
    %cst_436 = arith.constant 0.000000e+00 : f32
    %504 = vector.broadcast %cst_436 : f32 to vector<16x64xf32>
    %505 = arith.maximumf %503, %504 : vector<16x64xf32>
    %c1_437 = arith.constant 1 : index
    %c0_438 = arith.constant 0 : index
    %c0_439 = arith.constant 0 : index
    %506 = vector.load %arg37[%c1_437, %c0_438, %c0_439] : memref<2x64x64xf32, #tpu.memory_space<vmem>>, vector<1x64x64xf32>
    %507 = vector.shape_cast %506 : vector<1x64x64xf32> to vector<64x64xf32>
    %cst_440 = arith.constant dense<0.000000e+00> : vector<16x64xf32>
    %508 = tpu.matmul %505, %507, %cst_440 {dimension_numbers = #tpu.dot_dimension_numbers<[1], [0], [0], [1], [0, 0, 1, 1], [], []>} : vector<16x64xf32>, vector<64x64xf32>, vector<16x64xf32> -> vector<16x64xf32>
    %c1_441 = arith.constant 1 : index
    %c0_442 = arith.constant 0 : index
    %c0_443 = arith.constant 0 : index
    %509 = vector.load %arg3[%c1_441, %c0_442, %c0_443] : memref<2x1x64xf32, #tpu.memory_space<vmem>>, vector<1x1x64xf32>
    %510 = vector.shape_cast %509 : vector<1x1x64xf32> to vector<1x64xf32>
    %511 = vector.broadcast %510 : vector<1x64xf32> to vector<16x64xf32>
    %512 = arith.addf %508, %511 : vector<16x64xf32>
    %513 = arith.addf %496, %512 : vector<16x64xf32>
    %c1_444 = arith.constant 1 : index
    %c0_445 = arith.constant 0 : index
    %c0_446 = arith.constant 0 : index
    %514 = vector.load %arg25[%c1_444, %c0_445, %c0_446] : memref<2x1x64xf32, #tpu.memory_space<vmem>>, vector<1x1x64xf32>
    %515 = vector.shape_cast %514 : vector<1x1x64xf32> to vector<1x64xf32>
    %c1_447 = arith.constant 1 : index
    %c0_448 = arith.constant 0 : index
    %c0_449 = arith.constant 0 : index
    %516 = vector.load %arg24[%c1_447, %c0_448, %c0_449] : memref<2x1x64xf32, #tpu.memory_space<vmem>>, vector<1x1x64xf32>
    %517 = vector.shape_cast %516 : vector<1x1x64xf32> to vector<1x64xf32>
    %cst_450 = arith.constant dense<0.000000e+00> : vector<16xf32>
    %518 = vector.multi_reduction <add>, %513, %cst_450 [1] : vector<16x64xf32> to vector<16xf32>
    %519 = vector.shape_cast %518 : vector<16xf32> to vector<16x1xf32>
    %cst_451 = arith.constant 6.400000e+01 : f32
    %520 = vector.broadcast %cst_451 : f32 to vector<16x1xf32>
    %521 = arith.divf %519, %520 : vector<16x1xf32>
    %522 = vector.broadcast %521 : vector<16x1xf32> to vector<16x64xf32>
    %523 = arith.subf %513, %522 : vector<16x64xf32>
    %524 = arith.mulf %523, %523 : vector<16x64xf32>
    %cst_452 = arith.constant dense<0.000000e+00> : vector<16xf32>
    %525 = vector.multi_reduction <add>, %524, %cst_452 [1] : vector<16x64xf32> to vector<16xf32>
    %526 = vector.shape_cast %525 : vector<16xf32> to vector<16x1xf32>
    %cst_453 = arith.constant 6.400000e+01 : f32
    %527 = vector.broadcast %cst_453 : f32 to vector<16x1xf32>
    %528 = arith.divf %526, %527 : vector<16x1xf32>
    %529 = vector.broadcast %521 : vector<16x1xf32> to vector<16x64xf32>
    %530 = arith.subf %513, %529 : vector<16x64xf32>
    %cst_454 = arith.constant 9.99999974E-6 : f32
    %531 = vector.broadcast %cst_454 : f32 to vector<16x1xf32>
    %532 = arith.addf %528, %531 : vector<16x1xf32>
    %533 = math.rsqrt %532 : vector<16x1xf32>
    %534 = vector.broadcast %533 : vector<16x1xf32> to vector<16x64xf32>
    %535 = arith.mulf %530, %534 : vector<16x64xf32>
    %536 = vector.broadcast %515 : vector<1x64xf32> to vector<16x64xf32>
    %537 = arith.mulf %535, %536 : vector<16x64xf32>
    %538 = vector.broadcast %517 : vector<1x64xf32> to vector<16x64xf32>
    %539 = arith.addf %537, %538 : vector<16x64xf32>
    %c1_455 = arith.constant 1 : index
    %c0_456 = arith.constant 0 : index
    %c0_457 = arith.constant 0 : index
    %540 = vector.load %arg12[%c1_455, %c0_456, %c0_457] : memref<2x1x32xf32, #tpu.memory_space<vmem>>, vector<1x1x32xf32>
    %541 = vector.shape_cast %540 : vector<1x1x32xf32> to vector<1x32xf32>
    %c1_458 = arith.constant 1 : index
    %c0_459 = arith.constant 0 : index
    %c0_460 = arith.constant 0 : index
    %542 = vector.load %arg14[%c1_458, %c0_459, %c0_460] : memref<2x1x32xf32, #tpu.memory_space<vmem>>, vector<1x1x32xf32>
    %543 = vector.shape_cast %542 : vector<1x1x32xf32> to vector<1x32xf32>
    %c1_461 = arith.constant 1 : index
    %c0_462 = arith.constant 0 : index
    %c0_463 = arith.constant 0 : index
    %544 = vector.load %arg6[%c1_461, %c0_462, %c0_463] : memref<2x1x32xf32, #tpu.memory_space<vmem>>, vector<1x1x32xf32>
    %545 = vector.shape_cast %544 : vector<1x1x32xf32> to vector<1x32xf32>
    %c1_464 = arith.constant 1 : index
    %c0_465 = arith.constant 0 : index
    %c0_466 = arith.constant 0 : index
    %546 = vector.load %arg5[%c1_464, %c0_465, %c0_466] : memref<2x1x32xf32, #tpu.memory_space<vmem>>, vector<1x1x32xf32>
    %547 = vector.shape_cast %546 : vector<1x1x32xf32> to vector<1x32xf32>
    %c1_467 = arith.constant 1 : index
    %c0_468 = arith.constant 0 : index
    %c0_469 = arith.constant 0 : index
    %548 = vector.load %arg7[%c1_467, %c0_468, %c0_469] : memref<2x1x32xf32, #tpu.memory_space<vmem>>, vector<1x1x32xf32>
    %549 = vector.shape_cast %548 : vector<1x1x32xf32> to vector<1x32xf32>
    %c1_470 = arith.constant 1 : index
    %c0_471 = arith.constant 0 : index
    %c0_472 = arith.constant 0 : index
    %550 = vector.load %arg8[%c1_470, %c0_471, %c0_472] : memref<2x1x32xf32, #tpu.memory_space<vmem>>, vector<1x1x32xf32>
    %551 = vector.shape_cast %550 : vector<1x1x32xf32> to vector<1x32xf32>
    %c1_473 = arith.constant 1 : index
    %c0_474 = arith.constant 0 : index
    %c0_475 = arith.constant 0 : index
    %552 = vector.load %arg13[%c1_473, %c0_474, %c0_475] : memref<2x64x32xf32, #tpu.memory_space<vmem>>, vector<1x64x32xf32>
    %553 = vector.shape_cast %552 : vector<1x64x32xf32> to vector<64x32xf32>
    %cst_476 = arith.constant dense<0.000000e+00> : vector<16x32xf32>
    %554 = tpu.matmul %539, %553, %cst_476 {dimension_numbers = #tpu.dot_dimension_numbers<[1], [0], [0], [1], [0, 0, 1, 1], [], []>} : vector<16x64xf32>, vector<64x32xf32>, vector<16x32xf32> -> vector<16x32xf32>
    %555 = vector.broadcast %541 : vector<1x32xf32> to vector<16x32xf32>
    %556 = arith.addf %554, %555 : vector<16x32xf32>
    %c1_477 = arith.constant 1 : index
    %c2_478 = arith.constant 2 : index
    %c0_479 = arith.constant 0 : index
    %c0_480 = arith.constant 0 : index
    %557 = vector.load %arg15[%c1_477, %c2_478, %c0_479, %c0_480] : memref<2x5x64x32xf32, #tpu.memory_space<vmem>>, vector<1x1x64x32xf32>
    %558 = vector.shape_cast %557 : vector<1x1x64x32xf32> to vector<64x32xf32>
    %cst_481 = arith.constant dense<0.000000e+00> : vector<16x32xf32>
    %559 = tpu.matmul %539, %558, %cst_481 {dimension_numbers = #tpu.dot_dimension_numbers<[1], [0], [0], [1], [0, 0, 1, 1], [], []>} : vector<16x64xf32>, vector<64x32xf32>, vector<16x32xf32> -> vector<16x32xf32>
    %c1_482 = arith.constant 1 : index
    %c0_483 = arith.constant 0 : index
    %c0_484 = arith.constant 0 : index
    %c0_485 = arith.constant 0 : index
    %560 = vector.load %arg15[%c1_482, %c0_483, %c0_484, %c0_485] : memref<2x5x64x32xf32, #tpu.memory_space<vmem>>, vector<1x1x64x32xf32>
    %561 = vector.shape_cast %560 : vector<1x1x64x32xf32> to vector<64x32xf32>
    %cst_486 = arith.constant dense<0.000000e+00> : vector<16x32xf32>
    %562 = tpu.matmul %539, %561, %cst_486 {dimension_numbers = #tpu.dot_dimension_numbers<[1], [0], [0], [1], [0, 0, 1, 1], [], []>} : vector<16x64xf32>, vector<64x32xf32>, vector<16x32xf32> -> vector<16x32xf32>
    %c0_487 = arith.constant 0 : index
    %c0_488 = arith.constant 0 : index
    %c0_489 = arith.constant 0 : index
    %563 = vector.load %arg35[%c0_487, %c0_488, %c0_489] : memref<5x16x16xf32, #tpu.memory_space<vmem>>, vector<1x16x16xf32>
    %564 = vector.shape_cast %563 : vector<1x16x16xf32> to vector<16x16xf32>
    %cst_490 = arith.constant dense<0.000000e+00> : vector<16x32xf32>
    %565 = tpu.matmul %564, %562, %cst_490 {dimension_numbers = #tpu.dot_dimension_numbers<[1], [0], [0], [1], [0, 0, 1, 1], [], []>} : vector<16x16xf32>, vector<16x32xf32>, vector<16x32xf32> -> vector<16x32xf32>
    %566 = arith.addf %559, %565 : vector<16x32xf32>
    %c1_491 = arith.constant 1 : index
    %c1_492 = arith.constant 1 : index
    %c0_493 = arith.constant 0 : index
    %c0_494 = arith.constant 0 : index
    %567 = vector.load %arg15[%c1_491, %c1_492, %c0_493, %c0_494] : memref<2x5x64x32xf32, #tpu.memory_space<vmem>>, vector<1x1x64x32xf32>
    %568 = vector.shape_cast %567 : vector<1x1x64x32xf32> to vector<64x32xf32>
    %cst_495 = arith.constant dense<0.000000e+00> : vector<16x32xf32>
    %569 = tpu.matmul %539, %568, %cst_495 {dimension_numbers = #tpu.dot_dimension_numbers<[1], [0], [0], [1], [0, 0, 1, 1], [], []>} : vector<16x64xf32>, vector<64x32xf32>, vector<16x32xf32> -> vector<16x32xf32>
    %c1_496 = arith.constant 1 : index
    %c0_497 = arith.constant 0 : index
    %c0_498 = arith.constant 0 : index
    %570 = vector.load %arg35[%c1_496, %c0_497, %c0_498] : memref<5x16x16xf32, #tpu.memory_space<vmem>>, vector<1x16x16xf32>
    %571 = vector.shape_cast %570 : vector<1x16x16xf32> to vector<16x16xf32>
    %cst_499 = arith.constant dense<0.000000e+00> : vector<16x32xf32>
    %572 = tpu.matmul %571, %569, %cst_499 {dimension_numbers = #tpu.dot_dimension_numbers<[1], [0], [0], [1], [0, 0, 1, 1], [], []>} : vector<16x16xf32>, vector<16x32xf32>, vector<16x32xf32> -> vector<16x32xf32>
    %573 = arith.addf %566, %572 : vector<16x32xf32>
    %c1_500 = arith.constant 1 : index
    %c3_501 = arith.constant 3 : index
    %c0_502 = arith.constant 0 : index
    %c0_503 = arith.constant 0 : index
    %574 = vector.load %arg15[%c1_500, %c3_501, %c0_502, %c0_503] : memref<2x5x64x32xf32, #tpu.memory_space<vmem>>, vector<1x1x64x32xf32>
    %575 = vector.shape_cast %574 : vector<1x1x64x32xf32> to vector<64x32xf32>
    %cst_504 = arith.constant dense<0.000000e+00> : vector<16x32xf32>
    %576 = tpu.matmul %539, %575, %cst_504 {dimension_numbers = #tpu.dot_dimension_numbers<[1], [0], [0], [1], [0, 0, 1, 1], [], []>} : vector<16x64xf32>, vector<64x32xf32>, vector<16x32xf32> -> vector<16x32xf32>
    %c3_505 = arith.constant 3 : index
    %c0_506 = arith.constant 0 : index
    %c0_507 = arith.constant 0 : index
    %577 = vector.load %arg35[%c3_505, %c0_506, %c0_507] : memref<5x16x16xf32, #tpu.memory_space<vmem>>, vector<1x16x16xf32>
    %578 = vector.shape_cast %577 : vector<1x16x16xf32> to vector<16x16xf32>
    %cst_508 = arith.constant dense<0.000000e+00> : vector<16x32xf32>
    %579 = tpu.matmul %578, %576, %cst_508 {dimension_numbers = #tpu.dot_dimension_numbers<[1], [0], [0], [1], [0, 0, 1, 1], [], []>} : vector<16x16xf32>, vector<16x32xf32>, vector<16x32xf32> -> vector<16x32xf32>
    %580 = arith.addf %573, %579 : vector<16x32xf32>
    %c1_509 = arith.constant 1 : index
    %c4_510 = arith.constant 4 : index
    %c0_511 = arith.constant 0 : index
    %c0_512 = arith.constant 0 : index
    %581 = vector.load %arg15[%c1_509, %c4_510, %c0_511, %c0_512] : memref<2x5x64x32xf32, #tpu.memory_space<vmem>>, vector<1x1x64x32xf32>
    %582 = vector.shape_cast %581 : vector<1x1x64x32xf32> to vector<64x32xf32>
    %cst_513 = arith.constant dense<0.000000e+00> : vector<16x32xf32>
    %583 = tpu.matmul %539, %582, %cst_513 {dimension_numbers = #tpu.dot_dimension_numbers<[1], [0], [0], [1], [0, 0, 1, 1], [], []>} : vector<16x64xf32>, vector<64x32xf32>, vector<16x32xf32> -> vector<16x32xf32>
    %c4_514 = arith.constant 4 : index
    %c0_515 = arith.constant 0 : index
    %c0_516 = arith.constant 0 : index
    %584 = vector.load %arg35[%c4_514, %c0_515, %c0_516] : memref<5x16x16xf32, #tpu.memory_space<vmem>>, vector<1x16x16xf32>
    %585 = vector.shape_cast %584 : vector<1x16x16xf32> to vector<16x16xf32>
    %cst_517 = arith.constant dense<0.000000e+00> : vector<16x32xf32>
    %586 = tpu.matmul %585, %583, %cst_517 {dimension_numbers = #tpu.dot_dimension_numbers<[1], [0], [0], [1], [0, 0, 1, 1], [], []>} : vector<16x16xf32>, vector<16x32xf32>, vector<16x32xf32> -> vector<16x32xf32>
    %587 = arith.addf %580, %586 : vector<16x32xf32>
    %588 = vector.broadcast %543 : vector<1x32xf32> to vector<16x32xf32>
    %589 = arith.addf %587, %588 : vector<16x32xf32>
    %cst_518 = arith.constant 0.000000e+00 : f32
    %590 = vector.broadcast %cst_518 : f32 to vector<16x32xf32>
    %591 = arith.maximumf %589, %590 : vector<16x32xf32>
    %592 = vector.broadcast %549 : vector<1x32xf32> to vector<16x32xf32>
    %593 = arith.subf %591, %592 : vector<16x32xf32>
    %cst_519 = arith.constant 9.99999974E-6 : f32
    %594 = vector.broadcast %cst_519 : f32 to vector<1x32xf32>
    %595 = arith.addf %551, %594 : vector<1x32xf32>
    %596 = math.rsqrt %595 : vector<1x32xf32>
    %597 = vector.broadcast %596 : vector<1x32xf32> to vector<16x32xf32>
    %598 = arith.mulf %593, %597 : vector<16x32xf32>
    %599 = vector.broadcast %545 : vector<1x32xf32> to vector<16x32xf32>
    %600 = arith.mulf %598, %599 : vector<16x32xf32>
    %601 = vector.broadcast %547 : vector<1x32xf32> to vector<16x32xf32>
    %602 = arith.addf %600, %601 : vector<16x32xf32>
    %603 = arith.addf %602, %556 : vector<16x32xf32>
    %c0_520 = arith.constant 0 : index
    %c0_521 = arith.constant 0 : index
    %604 = vector.load %arg19[%c0_520, %c0_521] : memref<32x16xf32, #tpu.memory_space<vmem>>, vector<32x16xf32>
    %cst_522 = arith.constant dense<0.000000e+00> : vector<16x16xf32>
    %605 = tpu.matmul %603, %604, %cst_522 {dimension_numbers = #tpu.dot_dimension_numbers<[1], [0], [0], [1], [0, 0, 1, 1], [], []>} : vector<16x32xf32>, vector<32x16xf32>, vector<16x16xf32> -> vector<16x16xf32>
    %c0_523 = arith.constant 0 : index
    %c0_524 = arith.constant 0 : index
    %606 = vector.load %arg18[%c0_523, %c0_524] : memref<1x16xf32, #tpu.memory_space<vmem>>, vector<1x16xf32>
    %607 = vector.broadcast %606 : vector<1x16xf32> to vector<16x16xf32>
    %608 = arith.addf %605, %607 : vector<16x16xf32>
    %c0_525 = arith.constant 0 : index
    %c0_526 = arith.constant 0 : index
    %c0_527 = arith.constant 0 : index
    %609 = vector.load %arg30[%c0_525, %c0_526, %c0_527] : memref<2x1x32xf32, #tpu.memory_space<vmem>>, vector<1x1x32xf32>
    %610 = vector.shape_cast %609 : vector<1x1x32xf32> to vector<1x32xf32>
    %c0_528 = arith.constant 0 : index
    %c0_529 = arith.constant 0 : index
    %c0_530 = arith.constant 0 : index
    %611 = vector.load %arg32[%c0_528, %c0_529, %c0_530] : memref<2x1x32xf32, #tpu.memory_space<vmem>>, vector<1x1x32xf32>
    %612 = vector.shape_cast %611 : vector<1x1x32xf32> to vector<1x32xf32>
    %c0_531 = arith.constant 0 : index
    %c0_532 = arith.constant 0 : index
    %c0_533 = arith.constant 0 : index
    %613 = vector.load %arg27[%c0_531, %c0_532, %c0_533] : memref<2x1x32xf32, #tpu.memory_space<vmem>>, vector<1x1x32xf32>
    %614 = vector.shape_cast %613 : vector<1x1x32xf32> to vector<1x32xf32>
    %c0_534 = arith.constant 0 : index
    %c0_535 = arith.constant 0 : index
    %c0_536 = arith.constant 0 : index
    %615 = vector.load %arg26[%c0_534, %c0_535, %c0_536] : memref<2x1x32xf32, #tpu.memory_space<vmem>>, vector<1x1x32xf32>
    %616 = vector.shape_cast %615 : vector<1x1x32xf32> to vector<1x32xf32>
    %c0_537 = arith.constant 0 : index
    %c0_538 = arith.constant 0 : index
    %c0_539 = arith.constant 0 : index
    %617 = vector.load %arg28[%c0_537, %c0_538, %c0_539] : memref<2x1x32xf32, #tpu.memory_space<vmem>>, vector<1x1x32xf32>
    %618 = vector.shape_cast %617 : vector<1x1x32xf32> to vector<1x32xf32>
    %c0_540 = arith.constant 0 : index
    %c0_541 = arith.constant 0 : index
    %c0_542 = arith.constant 0 : index
    %619 = vector.load %arg29[%c0_540, %c0_541, %c0_542] : memref<2x1x32xf32, #tpu.memory_space<vmem>>, vector<1x1x32xf32>
    %620 = vector.shape_cast %619 : vector<1x1x32xf32> to vector<1x32xf32>
    %c0_543 = arith.constant 0 : index
    %c0_544 = arith.constant 0 : index
    %c0_545 = arith.constant 0 : index
    %621 = vector.load %arg31[%c0_543, %c0_544, %c0_545] : memref<2x32x32xf32, #tpu.memory_space<vmem>>, vector<1x32x32xf32>
    %622 = vector.shape_cast %621 : vector<1x32x32xf32> to vector<32x32xf32>
    %cst_546 = arith.constant dense<0.000000e+00> : vector<16x32xf32>
    %623 = tpu.matmul %603, %622, %cst_546 {dimension_numbers = #tpu.dot_dimension_numbers<[1], [0], [0], [1], [0, 0, 1, 1], [], []>} : vector<16x32xf32>, vector<32x32xf32>, vector<16x32xf32> -> vector<16x32xf32>
    %624 = vector.broadcast %610 : vector<1x32xf32> to vector<16x32xf32>
    %625 = arith.addf %623, %624 : vector<16x32xf32>
    %c0_547 = arith.constant 0 : index
    %c2_548 = arith.constant 2 : index
    %c0_549 = arith.constant 0 : index
    %c0_550 = arith.constant 0 : index
    %626 = vector.load %arg33[%c0_547, %c2_548, %c0_549, %c0_550] : memref<2x5x32x32xf32, #tpu.memory_space<vmem>>, vector<1x1x32x32xf32>
    %627 = vector.shape_cast %626 : vector<1x1x32x32xf32> to vector<32x32xf32>
    %cst_551 = arith.constant dense<0.000000e+00> : vector<16x32xf32>
    %628 = tpu.matmul %603, %627, %cst_551 {dimension_numbers = #tpu.dot_dimension_numbers<[1], [0], [0], [1], [0, 0, 1, 1], [], []>} : vector<16x32xf32>, vector<32x32xf32>, vector<16x32xf32> -> vector<16x32xf32>
    %c0_552 = arith.constant 0 : index
    %c0_553 = arith.constant 0 : index
    %c0_554 = arith.constant 0 : index
    %c0_555 = arith.constant 0 : index
    %629 = vector.load %arg33[%c0_552, %c0_553, %c0_554, %c0_555] : memref<2x5x32x32xf32, #tpu.memory_space<vmem>>, vector<1x1x32x32xf32>
    %630 = vector.shape_cast %629 : vector<1x1x32x32xf32> to vector<32x32xf32>
    %cst_556 = arith.constant dense<0.000000e+00> : vector<16x32xf32>
    %631 = tpu.matmul %603, %630, %cst_556 {dimension_numbers = #tpu.dot_dimension_numbers<[1], [0], [0], [1], [0, 0, 1, 1], [], []>} : vector<16x32xf32>, vector<32x32xf32>, vector<16x32xf32> -> vector<16x32xf32>
    %c0_557 = arith.constant 0 : index
    %c0_558 = arith.constant 0 : index
    %c0_559 = arith.constant 0 : index
    %632 = vector.load %arg35[%c0_557, %c0_558, %c0_559] : memref<5x16x16xf32, #tpu.memory_space<vmem>>, vector<1x16x16xf32>
    %633 = vector.shape_cast %632 : vector<1x16x16xf32> to vector<16x16xf32>
    %cst_560 = arith.constant dense<0.000000e+00> : vector<16x32xf32>
    %634 = tpu.matmul %633, %631, %cst_560 {dimension_numbers = #tpu.dot_dimension_numbers<[1], [0], [0], [1], [0, 0, 1, 1], [], []>} : vector<16x16xf32>, vector<16x32xf32>, vector<16x32xf32> -> vector<16x32xf32>
    %635 = arith.addf %628, %634 : vector<16x32xf32>
    %c0_561 = arith.constant 0 : index
    %c1_562 = arith.constant 1 : index
    %c0_563 = arith.constant 0 : index
    %c0_564 = arith.constant 0 : index
    %636 = vector.load %arg33[%c0_561, %c1_562, %c0_563, %c0_564] : memref<2x5x32x32xf32, #tpu.memory_space<vmem>>, vector<1x1x32x32xf32>
    %637 = vector.shape_cast %636 : vector<1x1x32x32xf32> to vector<32x32xf32>
    %cst_565 = arith.constant dense<0.000000e+00> : vector<16x32xf32>
    %638 = tpu.matmul %603, %637, %cst_565 {dimension_numbers = #tpu.dot_dimension_numbers<[1], [0], [0], [1], [0, 0, 1, 1], [], []>} : vector<16x32xf32>, vector<32x32xf32>, vector<16x32xf32> -> vector<16x32xf32>
    %c1_566 = arith.constant 1 : index
    %c0_567 = arith.constant 0 : index
    %c0_568 = arith.constant 0 : index
    %639 = vector.load %arg35[%c1_566, %c0_567, %c0_568] : memref<5x16x16xf32, #tpu.memory_space<vmem>>, vector<1x16x16xf32>
    %640 = vector.shape_cast %639 : vector<1x16x16xf32> to vector<16x16xf32>
    %cst_569 = arith.constant dense<0.000000e+00> : vector<16x32xf32>
    %641 = tpu.matmul %640, %638, %cst_569 {dimension_numbers = #tpu.dot_dimension_numbers<[1], [0], [0], [1], [0, 0, 1, 1], [], []>} : vector<16x16xf32>, vector<16x32xf32>, vector<16x32xf32> -> vector<16x32xf32>
    %642 = arith.addf %635, %641 : vector<16x32xf32>
    %c0_570 = arith.constant 0 : index
    %c3_571 = arith.constant 3 : index
    %c0_572 = arith.constant 0 : index
    %c0_573 = arith.constant 0 : index
    %643 = vector.load %arg33[%c0_570, %c3_571, %c0_572, %c0_573] : memref<2x5x32x32xf32, #tpu.memory_space<vmem>>, vector<1x1x32x32xf32>
    %644 = vector.shape_cast %643 : vector<1x1x32x32xf32> to vector<32x32xf32>
    %cst_574 = arith.constant dense<0.000000e+00> : vector<16x32xf32>
    %645 = tpu.matmul %603, %644, %cst_574 {dimension_numbers = #tpu.dot_dimension_numbers<[1], [0], [0], [1], [0, 0, 1, 1], [], []>} : vector<16x32xf32>, vector<32x32xf32>, vector<16x32xf32> -> vector<16x32xf32>
    %c3_575 = arith.constant 3 : index
    %c0_576 = arith.constant 0 : index
    %c0_577 = arith.constant 0 : index
    %646 = vector.load %arg35[%c3_575, %c0_576, %c0_577] : memref<5x16x16xf32, #tpu.memory_space<vmem>>, vector<1x16x16xf32>
    %647 = vector.shape_cast %646 : vector<1x16x16xf32> to vector<16x16xf32>
    %cst_578 = arith.constant dense<0.000000e+00> : vector<16x32xf32>
    %648 = tpu.matmul %647, %645, %cst_578 {dimension_numbers = #tpu.dot_dimension_numbers<[1], [0], [0], [1], [0, 0, 1, 1], [], []>} : vector<16x16xf32>, vector<16x32xf32>, vector<16x32xf32> -> vector<16x32xf32>
    %649 = arith.addf %642, %648 : vector<16x32xf32>
    %c0_579 = arith.constant 0 : index
    %c4_580 = arith.constant 4 : index
    %c0_581 = arith.constant 0 : index
    %c0_582 = arith.constant 0 : index
    %650 = vector.load %arg33[%c0_579, %c4_580, %c0_581, %c0_582] : memref<2x5x32x32xf32, #tpu.memory_space<vmem>>, vector<1x1x32x32xf32>
    %651 = vector.shape_cast %650 : vector<1x1x32x32xf32> to vector<32x32xf32>
    %cst_583 = arith.constant dense<0.000000e+00> : vector<16x32xf32>
    %652 = tpu.matmul %603, %651, %cst_583 {dimension_numbers = #tpu.dot_dimension_numbers<[1], [0], [0], [1], [0, 0, 1, 1], [], []>} : vector<16x32xf32>, vector<32x32xf32>, vector<16x32xf32> -> vector<16x32xf32>
    %c4_584 = arith.constant 4 : index
    %c0_585 = arith.constant 0 : index
    %c0_586 = arith.constant 0 : index
    %653 = vector.load %arg35[%c4_584, %c0_585, %c0_586] : memref<5x16x16xf32, #tpu.memory_space<vmem>>, vector<1x16x16xf32>
    %654 = vector.shape_cast %653 : vector<1x16x16xf32> to vector<16x16xf32>
    %cst_587 = arith.constant dense<0.000000e+00> : vector<16x32xf32>
    %655 = tpu.matmul %654, %652, %cst_587 {dimension_numbers = #tpu.dot_dimension_numbers<[1], [0], [0], [1], [0, 0, 1, 1], [], []>} : vector<16x16xf32>, vector<16x32xf32>, vector<16x32xf32> -> vector<16x32xf32>
    %656 = arith.addf %649, %655 : vector<16x32xf32>
    %657 = vector.broadcast %612 : vector<1x32xf32> to vector<16x32xf32>
    %658 = arith.addf %656, %657 : vector<16x32xf32>
    %cst_588 = arith.constant 0.000000e+00 : f32
    %659 = vector.broadcast %cst_588 : f32 to vector<16x32xf32>
    %660 = arith.maximumf %658, %659 : vector<16x32xf32>
    %661 = vector.broadcast %618 : vector<1x32xf32> to vector<16x32xf32>
    %662 = arith.subf %660, %661 : vector<16x32xf32>
    %cst_589 = arith.constant 9.99999974E-6 : f32
    %663 = vector.broadcast %cst_589 : f32 to vector<1x32xf32>
    %664 = arith.addf %620, %663 : vector<1x32xf32>
    %665 = math.rsqrt %664 : vector<1x32xf32>
    %666 = vector.broadcast %665 : vector<1x32xf32> to vector<16x32xf32>
    %667 = arith.mulf %662, %666 : vector<16x32xf32>
    %668 = vector.broadcast %614 : vector<1x32xf32> to vector<16x32xf32>
    %669 = arith.mulf %667, %668 : vector<16x32xf32>
    %670 = vector.broadcast %616 : vector<1x32xf32> to vector<16x32xf32>
    %671 = arith.addf %669, %670 : vector<16x32xf32>
    %672 = arith.addf %671, %625 : vector<16x32xf32>
    %c1_590 = arith.constant 1 : index
    %c0_591 = arith.constant 0 : index
    %c0_592 = arith.constant 0 : index
    %673 = vector.load %arg30[%c1_590, %c0_591, %c0_592] : memref<2x1x32xf32, #tpu.memory_space<vmem>>, vector<1x1x32xf32>
    %674 = vector.shape_cast %673 : vector<1x1x32xf32> to vector<1x32xf32>
    %c1_593 = arith.constant 1 : index
    %c0_594 = arith.constant 0 : index
    %c0_595 = arith.constant 0 : index
    %675 = vector.load %arg32[%c1_593, %c0_594, %c0_595] : memref<2x1x32xf32, #tpu.memory_space<vmem>>, vector<1x1x32xf32>
    %676 = vector.shape_cast %675 : vector<1x1x32xf32> to vector<1x32xf32>
    %c1_596 = arith.constant 1 : index
    %c0_597 = arith.constant 0 : index
    %c0_598 = arith.constant 0 : index
    %677 = vector.load %arg27[%c1_596, %c0_597, %c0_598] : memref<2x1x32xf32, #tpu.memory_space<vmem>>, vector<1x1x32xf32>
    %678 = vector.shape_cast %677 : vector<1x1x32xf32> to vector<1x32xf32>
    %c1_599 = arith.constant 1 : index
    %c0_600 = arith.constant 0 : index
    %c0_601 = arith.constant 0 : index
    %679 = vector.load %arg26[%c1_599, %c0_600, %c0_601] : memref<2x1x32xf32, #tpu.memory_space<vmem>>, vector<1x1x32xf32>
    %680 = vector.shape_cast %679 : vector<1x1x32xf32> to vector<1x32xf32>
    %c1_602 = arith.constant 1 : index
    %c0_603 = arith.constant 0 : index
    %c0_604 = arith.constant 0 : index
    %681 = vector.load %arg28[%c1_602, %c0_603, %c0_604] : memref<2x1x32xf32, #tpu.memory_space<vmem>>, vector<1x1x32xf32>
    %682 = vector.shape_cast %681 : vector<1x1x32xf32> to vector<1x32xf32>
    %c1_605 = arith.constant 1 : index
    %c0_606 = arith.constant 0 : index
    %c0_607 = arith.constant 0 : index
    %683 = vector.load %arg29[%c1_605, %c0_606, %c0_607] : memref<2x1x32xf32, #tpu.memory_space<vmem>>, vector<1x1x32xf32>
    %684 = vector.shape_cast %683 : vector<1x1x32xf32> to vector<1x32xf32>
    %c1_608 = arith.constant 1 : index
    %c0_609 = arith.constant 0 : index
    %c0_610 = arith.constant 0 : index
    %685 = vector.load %arg31[%c1_608, %c0_609, %c0_610] : memref<2x32x32xf32, #tpu.memory_space<vmem>>, vector<1x32x32xf32>
    %686 = vector.shape_cast %685 : vector<1x32x32xf32> to vector<32x32xf32>
    %cst_611 = arith.constant dense<0.000000e+00> : vector<16x32xf32>
    %687 = tpu.matmul %672, %686, %cst_611 {dimension_numbers = #tpu.dot_dimension_numbers<[1], [0], [0], [1], [0, 0, 1, 1], [], []>} : vector<16x32xf32>, vector<32x32xf32>, vector<16x32xf32> -> vector<16x32xf32>
    %688 = vector.broadcast %674 : vector<1x32xf32> to vector<16x32xf32>
    %689 = arith.addf %687, %688 : vector<16x32xf32>
    %c1_612 = arith.constant 1 : index
    %c2_613 = arith.constant 2 : index
    %c0_614 = arith.constant 0 : index
    %c0_615 = arith.constant 0 : index
    %690 = vector.load %arg33[%c1_612, %c2_613, %c0_614, %c0_615] : memref<2x5x32x32xf32, #tpu.memory_space<vmem>>, vector<1x1x32x32xf32>
    %691 = vector.shape_cast %690 : vector<1x1x32x32xf32> to vector<32x32xf32>
    %cst_616 = arith.constant dense<0.000000e+00> : vector<16x32xf32>
    %692 = tpu.matmul %672, %691, %cst_616 {dimension_numbers = #tpu.dot_dimension_numbers<[1], [0], [0], [1], [0, 0, 1, 1], [], []>} : vector<16x32xf32>, vector<32x32xf32>, vector<16x32xf32> -> vector<16x32xf32>
    %c1_617 = arith.constant 1 : index
    %c0_618 = arith.constant 0 : index
    %c0_619 = arith.constant 0 : index
    %c0_620 = arith.constant 0 : index
    %693 = vector.load %arg33[%c1_617, %c0_618, %c0_619, %c0_620] : memref<2x5x32x32xf32, #tpu.memory_space<vmem>>, vector<1x1x32x32xf32>
    %694 = vector.shape_cast %693 : vector<1x1x32x32xf32> to vector<32x32xf32>
    %cst_621 = arith.constant dense<0.000000e+00> : vector<16x32xf32>
    %695 = tpu.matmul %672, %694, %cst_621 {dimension_numbers = #tpu.dot_dimension_numbers<[1], [0], [0], [1], [0, 0, 1, 1], [], []>} : vector<16x32xf32>, vector<32x32xf32>, vector<16x32xf32> -> vector<16x32xf32>
    %c0_622 = arith.constant 0 : index
    %c0_623 = arith.constant 0 : index
    %c0_624 = arith.constant 0 : index
    %696 = vector.load %arg35[%c0_622, %c0_623, %c0_624] : memref<5x16x16xf32, #tpu.memory_space<vmem>>, vector<1x16x16xf32>
    %697 = vector.shape_cast %696 : vector<1x16x16xf32> to vector<16x16xf32>
    %cst_625 = arith.constant dense<0.000000e+00> : vector<16x32xf32>
    %698 = tpu.matmul %697, %695, %cst_625 {dimension_numbers = #tpu.dot_dimension_numbers<[1], [0], [0], [1], [0, 0, 1, 1], [], []>} : vector<16x16xf32>, vector<16x32xf32>, vector<16x32xf32> -> vector<16x32xf32>
    %699 = arith.addf %692, %698 : vector<16x32xf32>
    %c1_626 = arith.constant 1 : index
    %c1_627 = arith.constant 1 : index
    %c0_628 = arith.constant 0 : index
    %c0_629 = arith.constant 0 : index
    %700 = vector.load %arg33[%c1_626, %c1_627, %c0_628, %c0_629] : memref<2x5x32x32xf32, #tpu.memory_space<vmem>>, vector<1x1x32x32xf32>
    %701 = vector.shape_cast %700 : vector<1x1x32x32xf32> to vector<32x32xf32>
    %cst_630 = arith.constant dense<0.000000e+00> : vector<16x32xf32>
    %702 = tpu.matmul %672, %701, %cst_630 {dimension_numbers = #tpu.dot_dimension_numbers<[1], [0], [0], [1], [0, 0, 1, 1], [], []>} : vector<16x32xf32>, vector<32x32xf32>, vector<16x32xf32> -> vector<16x32xf32>
    %c1_631 = arith.constant 1 : index
    %c0_632 = arith.constant 0 : index
    %c0_633 = arith.constant 0 : index
    %703 = vector.load %arg35[%c1_631, %c0_632, %c0_633] : memref<5x16x16xf32, #tpu.memory_space<vmem>>, vector<1x16x16xf32>
    %704 = vector.shape_cast %703 : vector<1x16x16xf32> to vector<16x16xf32>
    %cst_634 = arith.constant dense<0.000000e+00> : vector<16x32xf32>
    %705 = tpu.matmul %704, %702, %cst_634 {dimension_numbers = #tpu.dot_dimension_numbers<[1], [0], [0], [1], [0, 0, 1, 1], [], []>} : vector<16x16xf32>, vector<16x32xf32>, vector<16x32xf32> -> vector<16x32xf32>
    %706 = arith.addf %699, %705 : vector<16x32xf32>
    %c1_635 = arith.constant 1 : index
    %c3_636 = arith.constant 3 : index
    %c0_637 = arith.constant 0 : index
    %c0_638 = arith.constant 0 : index
    %707 = vector.load %arg33[%c1_635, %c3_636, %c0_637, %c0_638] : memref<2x5x32x32xf32, #tpu.memory_space<vmem>>, vector<1x1x32x32xf32>
    %708 = vector.shape_cast %707 : vector<1x1x32x32xf32> to vector<32x32xf32>
    %cst_639 = arith.constant dense<0.000000e+00> : vector<16x32xf32>
    %709 = tpu.matmul %672, %708, %cst_639 {dimension_numbers = #tpu.dot_dimension_numbers<[1], [0], [0], [1], [0, 0, 1, 1], [], []>} : vector<16x32xf32>, vector<32x32xf32>, vector<16x32xf32> -> vector<16x32xf32>
    %c3_640 = arith.constant 3 : index
    %c0_641 = arith.constant 0 : index
    %c0_642 = arith.constant 0 : index
    %710 = vector.load %arg35[%c3_640, %c0_641, %c0_642] : memref<5x16x16xf32, #tpu.memory_space<vmem>>, vector<1x16x16xf32>
    %711 = vector.shape_cast %710 : vector<1x16x16xf32> to vector<16x16xf32>
    %cst_643 = arith.constant dense<0.000000e+00> : vector<16x32xf32>
    %712 = tpu.matmul %711, %709, %cst_643 {dimension_numbers = #tpu.dot_dimension_numbers<[1], [0], [0], [1], [0, 0, 1, 1], [], []>} : vector<16x16xf32>, vector<16x32xf32>, vector<16x32xf32> -> vector<16x32xf32>
    %713 = arith.addf %706, %712 : vector<16x32xf32>
    %c1_644 = arith.constant 1 : index
    %c4_645 = arith.constant 4 : index
    %c0_646 = arith.constant 0 : index
    %c0_647 = arith.constant 0 : index
    %714 = vector.load %arg33[%c1_644, %c4_645, %c0_646, %c0_647] : memref<2x5x32x32xf32, #tpu.memory_space<vmem>>, vector<1x1x32x32xf32>
    %715 = vector.shape_cast %714 : vector<1x1x32x32xf32> to vector<32x32xf32>
    %cst_648 = arith.constant dense<0.000000e+00> : vector<16x32xf32>
    %716 = tpu.matmul %672, %715, %cst_648 {dimension_numbers = #tpu.dot_dimension_numbers<[1], [0], [0], [1], [0, 0, 1, 1], [], []>} : vector<16x32xf32>, vector<32x32xf32>, vector<16x32xf32> -> vector<16x32xf32>
    %c4_649 = arith.constant 4 : index
    %c0_650 = arith.constant 0 : index
    %c0_651 = arith.constant 0 : index
    %717 = vector.load %arg35[%c4_649, %c0_650, %c0_651] : memref<5x16x16xf32, #tpu.memory_space<vmem>>, vector<1x16x16xf32>
    %718 = vector.shape_cast %717 : vector<1x16x16xf32> to vector<16x16xf32>
    %cst_652 = arith.constant dense<0.000000e+00> : vector<16x32xf32>
    %719 = tpu.matmul %718, %716, %cst_652 {dimension_numbers = #tpu.dot_dimension_numbers<[1], [0], [0], [1], [0, 0, 1, 1], [], []>} : vector<16x16xf32>, vector<16x32xf32>, vector<16x32xf32> -> vector<16x32xf32>
    %720 = arith.addf %713, %719 : vector<16x32xf32>
    %721 = vector.broadcast %676 : vector<1x32xf32> to vector<16x32xf32>
    %722 = arith.addf %720, %721 : vector<16x32xf32>
    %cst_653 = arith.constant 0.000000e+00 : f32
    %723 = vector.broadcast %cst_653 : f32 to vector<16x32xf32>
    %724 = arith.maximumf %722, %723 : vector<16x32xf32>
    %725 = vector.broadcast %682 : vector<1x32xf32> to vector<16x32xf32>
    %726 = arith.subf %724, %725 : vector<16x32xf32>
    %cst_654 = arith.constant 9.99999974E-6 : f32
    %727 = vector.broadcast %cst_654 : f32 to vector<1x32xf32>
    %728 = arith.addf %684, %727 : vector<1x32xf32>
    %729 = math.rsqrt %728 : vector<1x32xf32>
    %730 = vector.broadcast %729 : vector<1x32xf32> to vector<16x32xf32>
    %731 = arith.mulf %726, %730 : vector<16x32xf32>
    %732 = vector.broadcast %678 : vector<1x32xf32> to vector<16x32xf32>
    %733 = arith.mulf %731, %732 : vector<16x32xf32>
    %734 = vector.broadcast %680 : vector<1x32xf32> to vector<16x32xf32>
    %735 = arith.addf %733, %734 : vector<16x32xf32>
    %736 = arith.addf %735, %689 : vector<16x32xf32>
    %c0_655 = arith.constant 0 : index
    %c0_656 = arith.constant 0 : index
    %737 = vector.load %arg17[%c0_655, %c0_656] : memref<32x16xf32, #tpu.memory_space<vmem>>, vector<32x16xf32>
    %cst_657 = arith.constant dense<0.000000e+00> : vector<16x16xf32>
    %738 = tpu.matmul %736, %737, %cst_657 {dimension_numbers = #tpu.dot_dimension_numbers<[1], [0], [0], [1], [0, 0, 1, 1], [], []>} : vector<16x32xf32>, vector<32x16xf32>, vector<16x16xf32> -> vector<16x16xf32>
    %c0_658 = arith.constant 0 : index
    %c0_659 = arith.constant 0 : index
    %739 = vector.load %arg16[%c0_658, %c0_659] : memref<1x16xf32, #tpu.memory_space<vmem>>, vector<1x16xf32>
    %740 = vector.broadcast %739 : vector<1x16xf32> to vector<16x16xf32>
    %741 = arith.addf %738, %740 : vector<16x16xf32>
    %742 = arith.addf %741, %608 : vector<16x16xf32>
    %c0_660 = arith.constant 0 : index
    %c0_661 = arith.constant 0 : index
    %743 = vector.load %arg43[%c0_660, %c0_661] : memref<16x16xf32, #tpu.memory_space<vmem>>, vector<16x16xf32>
    tpu.vector_store %arg43[%c0_660, %c0_661], %608 {strides = array<i32>} : memref<16x16xf32, #tpu.memory_space<vmem>>, vector<16x16xf32>,
    %c0_662 = arith.constant 0 : index
    %c0_663 = arith.constant 0 : index
    %744 = vector.load %arg42[%c0_662, %c0_663] : memref<16x16xf32, #tpu.memory_space<vmem>>, vector<16x16xf32>
    tpu.vector_store %arg42[%c0_662, %c0_663], %742 {strides = array<i32>} : memref<16x16xf32, #tpu.memory_space<vmem>>, vector<16x16xf32>,
    return
  }
}

</mosaic_0001>

<bundles_post_ra>
// kernel: tpu_custom_call.1
= control target key start
LH: loop header
LB: loop body
LE: loop exit
PB: predicated region body
PF: predicated region fallthrough
CT: control target
= control target key end

     0   :  { %s5146_s6 = smov 1   ;;  %s5147_s10 = smov 2   ;;  %s6451_s0 = inlined_call_operand.smem [shape: u32[44], index: -1, kind: input, shape index: {}] }
   0x1   :  { %s5202_s5 = sld [smem:[%s6451_s0]]   ;;  %s5148_s14 = smov 3  }
   0x2   :  { %s5207_s9 = sld [smem:[%s6451_s0 + %s5146_s6]]   ;;  %s5149_s18 = smov 4  }
   0x3   :  { %s5212_s13 = sld [smem:[%s6451_s0 + %s5147_s10]]   ;;  %s5150_s22 = smov 5  }
   0x4   :  { %s5217_s17 = sld [smem:[%s6451_s0 + %s5148_s14]]   ;;  %s5151_s26 = smov 6  }
   0x5   :  { %s5222_s21 = sld [smem:[%s6451_s0 + %s5149_s18]]   ;;  %s5152_s30 = smov 7  }
   0x6   :  { %s5227_s25 = sld [smem:[%s6451_s0 + %s5150_s22]]   ;;  %s5153_s4 = smov 8  }
   0x7   :  { %s5232_s29 = sld [smem:[%s6451_s0 + %s5151_s26]]   ;;  %s5154_s10 = smov 9  }
   0x8   :  { %s5237_s3 = sld [smem:[%s6451_s0 + %s5152_s30]]   ;;  %s5155_s15 = smov 10  }
   0x9   :  { %6476 = sst [smem:[#allocation8_spill]] %s5212_s13  ;;  %s5156_s20 = smov 11  }
   0xa   :  { %6477 = sst [smem:[#allocation9_spill]] %s5217_s17  ;;  %s5157_s26 = smov 12  }
   0xb   :  { %s5242_s8 = sld [smem:[%s6451_s0 + %s5153_s4]]   ;;  %s5158_s1 = smov 13  }
   0xc   :  { %6478 = sst [smem:[#allocation10_spill]] %s5227_s25  ;;  %s5159_s7 = smov 14  }
   0xd   :  { %6479 = sst [smem:[#allocation11_spill]] %s5232_s29  ;;  %s5161_s22 = smov 16  }
   0xe   :  { %6480 = sst [smem:[#allocation12_spill]] %s5237_s3  ;;  %s5162_s28 = smov 17  }
   0xf   :  { %s5247_s14 = sld [smem:[%s6451_s0 + %s5154_s10]]  }
  0x10   :  { %s5252_s19 = sld [smem:[%s6451_s0 + %s5155_s15]]   ;;  %s5160_s15 = smov 15  }
  0x11   :  { %6481 = sst [smem:[#allocation13_spill]] %s5242_s8 }
  0x12   :  { %s5257_s24 = sld [smem:[%s6451_s0 + %s5156_s20]]  }
  0x13   :  { %s5262_s30 = sld [smem:[%s6451_s0 + %s5157_s26]]  }
  0x14   :  { %s5267_s6 = sld [smem:[%s6451_s0 + %s5158_s1]]  }
  0x15   :  { %s5272_s12 = sld [smem:[%s6451_s0 + %s5159_s7]]   ;;  %s5163_s7 = smov 18  }
  0x16   :  { %s5277_s20 = sld [smem:[%s6451_s0 + %s5160_s15]]   ;;  %s5164_s15 = smov 19  }
  0x17   :  { %s5282_s27 = sld [smem:[%s6451_s0 + %s5161_s22]]   ;;  %s5165_s22 = smov 20  }
  0x18   :  { %s5287_s4 = sld [smem:[%s6451_s0 + %s5162_s28]]   ;;  %s5166_s28 = smov 21  }
  0x19   :  { %6482 = sst [smem:[#allocation14_spill]] %s5262_s30 }
  0x1a   :  { %6483 = sst [smem:[#allocation15_spill]] %s5267_s6 }
  0x1b   :  { %6484 = sst [smem:[#allocation16_spill]] %s5272_s12 }
  0x1c   :  { %6485 = sst [smem:[#allocation17_spill]] %s5277_s20 }
  0x1d   :  { %6486 = sst [smem:[#allocation18_spill]] %s5282_s27 }
  0x1e   :  { %6487 = sst [smem:[#allocation19_spill]] %s5287_s4 }
  0x1f   :  { %s5292_s25 = sld [smem:[%s6451_s0 + %s5163_s7]]   ;;  %s5167_s7 = smov 22  }
  0x20   :  { %s5297_s30 = sld [smem:[%s6451_s0 + %s5164_s15]]   ;;  %s5168_s15 = smov 23  }
  0x21   :  { %s5302_s27 = sld [smem:[%s6451_s0 + %s5165_s22]]   ;;  %s5169_s22 = smov 24  }
  0x22   :  { %s5307_s4 = sld [smem:[%s6451_s0 + %s5166_s28]]   ;;  %s5170_s28 = smov 25  }
  0x23   :  { %s5322_s29 = sld [smem:[%s6451_s0 + %s5169_s22]]   ;;  %s5173_s22 = smov 28  }
  0x24   :  { %s5327_s3 = sld [smem:[%s6451_s0 + %s5170_s28]]   ;;  %s5174_s28 = smov 29  }
  0x25   :  { %6488 = sst [smem:[#allocation20_spill]] %s5292_s25 }
  0x26   :  { %6489 = sst [smem:[#allocation21_spill]] %s5297_s30 }
  0x27   :  { %s5312_s25 = sld [smem:[%s6451_s0 + %s5167_s7]]   ;;  %s5171_s7 = smov 26  }
  0x28   :  { %s5317_s30 = sld [smem:[%s6451_s0 + %s5168_s15]]   ;;  %s5172_s15 = smov 27  }
  0x29   :  { %6491 = sst [smem:[#allocation23_spill]] %s5322_s29 }
  0x2a   :  { %6492 = sst [smem:[#allocation24_spill]] %s5327_s3 }
  0x2b   :  { %s5332_s12 = sld [smem:[%s6451_s0 + %s5171_s7]]   ;;  %s5175_s7 = smov 30  }
  0x2c   :  { %s5337_s8 = sld [smem:[%s6451_s0 + %s5172_s15]]   ;;  %s5176_s15 = smov 31  }
  0x2d   :  { %6490 = sst [smem:[#allocation22_spill]] %s5312_s25 }
  0x2e   :  { %s5342_s29 = sld [smem:[%s6451_s0 + %s5173_s22]]   ;;  %s5177_s22 = smov 32  }
  0x2f   :  { %s5347_s3 = sld [smem:[%s6451_s0 + %s5174_s28]]   ;;  %s5178_s28 = smov 33  }
  0x31   :  { %6493 = sst [smem:[#allocation25_spill]] %s5332_s12 }
  0x32   :  { %6494 = sst [smem:[#allocation26_spill]] %s5337_s8 }
  0x33   :  { %s5352_s12 = sld [smem:[%s6451_s0 + %s5175_s7]]   ;;  %s5179_s7 = smov 34  }
  0x34   :  { %6495 = sst [smem:[#allocation27_spill]] %s5342_s29 }
  0x35   :  { %6496 = sst [smem:[#allocation28_spill]] %s5347_s3 }
  0x36   :  { %s5357_s8 = sld [smem:[%s6451_s0 + %s5176_s15]]   ;;  %s5180_s15 = smov 35  }
  0x37   :  { %s5362_s29 = sld [smem:[%s6451_s0 + %s5177_s22]]   ;;  %s5181_s22 = smov 36  }
  0x38   :  { %s5367_s3 = sld [smem:[%s6451_s0 + %s5178_s28]]   ;;  %s5182_s28 = smov 37  }
  0x39   :  { %6497 = sst [smem:[#allocation29_spill]] %s5352_s12 }
  0x3a   :  { %s5372_s12 = sld [smem:[%s6451_s0 + %s5179_s7]]   ;;  %s5183_s7 = smov 38  }
  0x3b   :  { %s5392_s20 = sld [smem:[%s6451_s0 + %s5183_s7]]   ;;  %s5187_s7 = smov 42  }
  0x3c   :  { %6498 = sst [smem:[#allocation30_spill]] %s5357_s8 }
  0x3d   :  { %6499 = sst [smem:[#allocation31_spill]] %s5362_s29 }
  0x3e   :  { %6500 = sst [smem:[#allocation32_spill]] %s5367_s3 }
  0x3f   :  { %s5377_s8 = sld [smem:[%s6451_s0 + %s5180_s15]]   ;;  %s5184_s15 = smov 39  }
  0x40   :  { %s5382_s29 = sld [smem:[%s6451_s0 + %s5181_s22]]   ;;  %s5185_s22 = smov 40  }
  0x41   :  { %s5387_s3 = sld [smem:[%s6451_s0 + %s5182_s28]]   ;;  %s5186_s28 = smov 41  }
  0x42   :  { %s5402_s6 = sld [smem:[%s6451_s0 + %s5185_s22]]  }
  0x43   :  { %s5407_s17 = sld [smem:[%s6451_s0 + %s5186_s28]]  }
  0x44   :  { %s5412_s13 = sld [smem:[%s6451_s0 + %s5187_s7]]  }
  0x45   :  { %6501 = sst [smem:[#allocation33_spill]] %s5377_s8 }
  0x46   :  { %s5397_s8 = sld [smem:[%s6451_s0 + %s5184_s15]]   ;;  %s5188_s15 = smov 43  }
  0x47   :  { %s5417_s25 = sld [smem:[%s6451_s0 + %s5188_s15]]  }
  0x48   :  { %93 = vsyncpa [#allocation3], 0  ;;  %v190_v0 = vld [vmem:[%s5307_s4 + $0x18] sm:$0xff]  ;;  %v189_v1 = vld [vmem:[%s5307_s4 + $0x10] sm:$0xff]  ;;  %vm195_vm0 = vcmask 261120  }
  0x49   :  { %214 = vmatpush.msra.mxu0 %v190_v0  ;;  %v179_v2 = vld [vmem:[%s5202_s5] sm:$0xff]  ;;  %v188_v4 = vld [vmem:[%s5307_s4 + $0x8] sm:$0xff]  ;;  %v232_v6 = vld [vmem:[%s5402_s6 + $0x38] sm:$0xff] }
  0x4a   :  { %v181_v3 = vld [vmem:[%s5372_s12] sm:$0xff]  ;;  %252 = vmatpush.msra.mxu1 %v232_v6  ;;  %v274_v7 = vld [vmem:[%s5392_s20 + $0x38] sm:$0xff]  ;;  %v231_v9 = vld [vmem:[%s5402_s6 + $0x30] sm:$0xff] }
  0x4b   :  { %v187_v5 = vld [vmem:[%s5307_s4] sm:$0xff]  ;;  %215 = vmatpush.msra.mxu0 %v189_v1  ;;  %v309_v8 = vld [vmem:[%s5407_s17 + $0x38] sm:$0xff]  ;;  %v183_v10 = vadd.f32 %v181_v3, %v179_v2  ;;  %287 = vmatpush.msra.mxu2 %v274_v7  ;;  %v273_v11 = vld [vmem:[%s5392_s20 + $0x30] sm:$0xff] }
  0x4c   :  { %322 = vmatpush.msra.mxu3 %v309_v8  ;;  %v308_v12 = vld [vmem:[%s5407_s17 + $0x30] sm:$0xff]  ;;  %v230_v13 = vld [vmem:[%s5402_s6 + $0x28] sm:$0xff]  ;;  %253 = vmatpush.msra.mxu1 %v231_v9  ;;  %v229_v16 = vld [vmem:[%s5402_s6 + $0x20] sm:$0xff] }
  0x4d   :  { %216 = vmatpush.msra.mxu0 %v188_v4  ;;  %v272_v14 = vld [vmem:[%s5392_s20 + $0x28] sm:$0xff]  ;;  %288 = vmatpush.msra.mxu2 %v273_v11  ;;  %v271_v17 = vld [vmem:[%s5392_s20 + $0x20] sm:$0xff]  ;;  %v228_v21 = vld [vmem:[%s5402_s6 + $0x18] sm:$0xff] }
  0x4e   :  { %323 = vmatpush.msra.mxu3 %v308_v12  ;;  %v307_v15 = vld [vmem:[%s5407_s17 + $0x28] sm:$0xff]  ;;  %254 = vmatpush.msra.mxu1 %v230_v13  ;;  %v306_v20 = vld [vmem:[%s5407_s17 + $0x20] sm:$0xff]  ;;  %v270_v22 = vld [vmem:[%s5392_s20 + $0x18] sm:$0xff] }
  0x4f   :  { %217 = vmatpush.msra.mxu0 %v187_v5  ;;  %v180_v18 = vld [vmem:[%s5202_s5 + $0x8] sm:$0xff]  ;;  %289 = vmatpush.msra.mxu2 %v272_v14  ;;  %v305_v23 = vld [vmem:[%s5407_s17 + $0x18] sm:$0xff]  ;;  %v227_v24 = vld [vmem:[%s5402_s6 + $0x10] sm:$0xff] }
  0x50   :  { %v182_v19 = vld [vmem:[%s5372_s12 + $0x8] sm:$0xff]  ;;  %4307 = vmatmul.msk.f32.vlgmr.msra.gmra.mxu0 %vm195_vm0, %v183_v10  ;;  %324 = vmatpush.msra.mxu3 %v307_v15  ;;  %v269_v25 = vld [vmem:[%s5392_s20 + $0x10] sm:$0xff] }
  0x51   :  { %255 = vmatpush.msra.mxu1 %v229_v16  ;;  %290 = vmatpush.msra.mxu2 %v271_v17  ;;  %v304_v26 = vld [vmem:[%s5407_s17 + $0x10] sm:$0xff]  ;;  %v184_v27 = vadd.f32 %v182_v19, %v180_v18 }
  0x52   :  { %325 = vmatpush.msra.mxu3 %v306_v20 }
  0x53   :  { %256 = vmatpush.msra.mxu1 %v228_v21  ;;  %291 = vmatpush.msra.mxu2 %v270_v22 }
  0x54   :  { %326 = vmatpush.msra.mxu3 %v305_v23 }
  0x55   :  { %257 = vmatpush.msra.mxu1 %v227_v24  ;;  %292 = vmatpush.msra.mxu2 %v269_v25 }
  0x56   :  { %327 = vmatpush.msra.mxu3 %v304_v26 }
  0x58   :  { %4308 = vmatmul.msk.f32.gmra.mxu0 %vm195_vm0, %v184_v27 }
  0x59   :  { %94 = vsyncpa [#allocation5], 0  ;;  %v226_v28 = vld [vmem:[%s5402_s6 + $0x8] sm:$0xff]  ;;  %v225_v31 = vld [vmem:[%s5402_s6] sm:$0xff]  ;;  %vm237_vm1 = vcmask 523264   ;;  %vm337_vm2 = vcmask 130048  }
  0x5a   :  { %v268_v29 = vld [vmem:[%s5392_s20 + $0x8] sm:$0xff]  ;;  %258 = vmatpush.msra.mxu1 %v226_v28  ;;  %v267_v32 = vld [vmem:[%s5392_s20] sm:$0xff]  ;;  %v4328_v34 = vld [vmem:[%s5402_s6 + $0x78] sm:$0xff]  ;;  %s6502_s0 = sld [smem:[#allocation22_spill]]  ;;  %s4247_s16 = sshll.u32 %s5417_s25, 4  ;;  %s4248_s16 = int_to_ptr.hbm [resolvable:$true] %s4247_s16 }
  0x5b   :  { %v303_v30 = vld [vmem:[%s5407_s17 + $0x8] sm:$0xff]  ;;  %293 = vmatpush.msra.mxu2 %v268_v29  ;;  %v302_v33 = vld [vmem:[%s5407_s17] sm:$0xff]  ;;  %v4339_v35 = vld [vmem:[%s5392_s20 + $0x78] sm:$0xff]  ;;  %s6503_s5 = sld [smem:[#allocation8_spill]]  ;;  %s5106_s18 = sshra.s32 %s4248_s16, 4  ;;  %s5107_s18 = int_to_ptr.hbm [resolvable:$true] %s5106_s18 }
  0x5c   :  { %328 = vmatpush.msra.mxu3 %v303_v30  ;;  %259 = vmatpush.msra.mxu1 %v225_v31  ;;  %v4327_v36 = vld [vmem:[%s5402_s6 + $0x70] sm:$0xff]  ;;  %v4326_v38 = vld [vmem:[%s5402_s6 + $0x68] sm:$0xff]  ;;  %v4325_v40 = vld [vmem:[%s5402_s6 + $0x60] sm:$0xff]  ;;  %s6504_s12 = sld [smem:[#allocation9_spill]]  ;;  %p5111_p1 = scmp.lt.s32.totalorder %s5107_s18, %s5417_s25 }
  0x5d   :  { %294 = vmatpush.msra.mxu2 %v267_v32  ;;  %v4338_v37 = vld [vmem:[%s5392_s20 + $0x70] sm:$0xff]  ;;  %v4337_v39 = vld [vmem:[%s5392_s20 + $0x68] sm:$0xff]  ;;  %v4336_v41 = vld [vmem:[%s5392_s20 + $0x60] sm:$0xff]  ;;  %s6505_s22 = sld [smem:[#allocation15_spill]] }
  0x5e   :  { %329 = vmatpush.msra.mxu3 %v302_v33  ;;  %v4324_v42 = vld [vmem:[%s5402_s6 + $0x58] sm:$0xff]  ;;  %v4323_v44 = vld [vmem:[%s5402_s6 + $0x50] sm:$0xff]  ;;  %v4322_v46 = vld [vmem:[%s5402_s6 + $0x48] sm:$0xff]  ;;  %s6506_s23 = sld [smem:[#allocation17_spill]] }
  0x5f   :  { %478 = vmatpush.msrb.mxu2 %v4328_v34  ;;  %v4335_v43 = vld [vmem:[%s5392_s20 + $0x58] sm:$0xff]  ;;  %v4334_v45 = vld [vmem:[%s5392_s20 + $0x50] sm:$0xff]  ;;  %v4333_v47 = vld [vmem:[%s5392_s20 + $0x48] sm:$0xff]  ;;  %s6507_s26 = sld [smem:[#allocation24_spill]] }
  0x60   :  { %515 = vmatpush.msrb.mxu3 %v4339_v35  ;;  %v4321_v48 = vld [vmem:[%s5402_s6 + $0x40] sm:$0xff]  ;;  %v4350_v3 = vld [vmem:[%s5407_s17 + $0x78] sm:$0xff]  ;;  %v4349_v5 = vld [vmem:[%s5407_s17 + $0x70] sm:$0xff]  ;;  %s6508_s28 = sld [smem:[#allocation23_spill]] }
  0x61   :  { %479 = vmatpush.msrb.mxu2 %v4327_v36  ;;  %v4332_v49 = vld [vmem:[%s5392_s20 + $0x40] sm:$0xff]  ;;  %v4348_v7 = vld [vmem:[%s5407_s17 + $0x68] sm:$0xff]  ;;  %v4346_v10 = vld [vmem:[%s5407_s17 + $0x58] sm:$0xff]  ;;  %s6509_s1 = sld [smem:[#allocation33_spill]] }
  0x62   :  { %516 = vmatpush.msrb.mxu3 %v4338_v37  ;;  %v4932_v50 = vld [vmem:[%s5302_s27] ss:$0 sm:$0xff]  ;;  %v4937_v12 = vld [vmem:[%s5222_s21 + $0x1] ss:$0 sm:$0xff]  ;;  %v4345_v13 = vld [vmem:[%s5407_s17 + $0x50] sm:$0xff]  ;;  %s6510_s2 = sld [smem:[#allocation13_spill]] }
  0x63   :  { %480 = vmatpush.msrb.mxu2 %v4326_v38  ;;  %v4934_v57 = vld [vmem:[%s5222_s21] ss:$0 sm:$0xff]  ;;  %v4344_v16 = vld [vmem:[%s5407_s17 + $0x48] sm:$0xff]  ;;  %v4938_v30 = vld [vmem:[%s5257_s24 + $0x1] ss:$0 sm:$0xff]  ;;  %s6514_s7 = sld [smem:[#allocation12_spill]] }
  0x64   :  { %517 = vmatpush.msrb.mxu3 %v4337_v39  ;;  %v4935_v59 = vld [vmem:[%s5257_s24] ss:$0 sm:$0xff]  ;;  %v5522_v25 = vld [vmem:[%s5207_s9 + $0x8] sm:$0xff]  ;;  %s6515_s10 = sld [smem:[#allocation11_spill]] }
  0x65   :  { %481 = vmatpush.msrb.mxu2 %v4325_v40  ;;  %v4933_v0 = vld [vmem:[%s5252_s19] ss:$0 sm:$0xff]  ;;  %s6516_s11 = sld [smem:[#allocation14_spill]] }
  0x66   :  { %518 = vmatpush.msrb.mxu3 %v4336_v41  ;;  %v4347_v8 = vld [vmem:[%s5407_s17 + $0x60] sm:$0xff]  ;;  %s6517_s15 = sld [smem:[#allocation10_spill]] }
  0x67   :  { %482 = vmatpush.msrb.mxu2 %v4324_v42  ;;  %v4343_v17 = vld [vmem:[%s5407_s17 + $0x40] sm:$0xff] }
  0x68   :  { %519 = vmatpush.msrb.mxu3 %v4335_v43  ;;  %v5517_v20 = vld [vmem:[%s5207_s9] sm:$0xff] }
  0x69   :  { %483 = vmatpush.msrb.mxu2 %v4323_v44 }
  0x6a   :  { %520 = vmatpush.msrb.mxu3 %v4334_v45 }
  0x6b   :  { %484 = vmatpush.msrb.mxu2 %v4322_v46 }
  0x6c   :  { %521 = vmatpush.msrb.mxu3 %v4333_v47 }
  0x6d   :  { %485 = vmatpush.msrb.mxu2 %v4321_v48 }
  0x6e   :  { %522 = vmatpush.msrb.mxu3 %v4332_v49 }
  0xcd   :  { %v219_v51 = vpop.f32.mrf.mxu0 }
  0xce   :  { %v5470_v52 = vadd.f32 %v4932_v50, %v219_v51 }
  0xd0   :  { %4309 = vmatmul.msk.f32.vlgmr.msra.gmra.mxu1 %vm237_vm1, %v5470_v52  ;;  %4311 = vmatmul.msk.f32.vlgmr.msra.gmra.mxu2 %vm237_vm1, %v5470_v52 }
  0xd1   :  { %4313 = vmatmul.msk.f32.vlgmr.msra.gmra.mxu3 %vm237_vm1, %v5470_v52 }
  0xd5   :  { %v222_v53 = vpop.f32.mrf.mxu0 }
  0xd6   :  { %v5478_v54 = vadd.f32 %v4932_v50, %v222_v53 }
  0xd8   :  { %4310 = vmatmul.msk.f32.gmra.mxu1 %vm237_vm1, %v5478_v54  ;;  %4312 = vmatmul.msk.f32.gmra.mxu2 %vm237_vm1, %v5478_v54 }
  0xd9   :  { %4314 = vmatmul.msk.f32.gmra.mxu3 %vm237_vm1, %v5478_v54 }
  0xe0   :  { %4330 = vmatmul.msk.f32.vlgmr.msrb.gmra.mxu2 %vm237_vm1, %v5470_v52 }
  0xe1   :  { %4341 = vmatmul.msk.f32.vlgmr.msrb.gmra.mxu3 %vm237_vm1, %v5470_v52 }
  0xe8   :  { %4331 = vmatmul.msk.f32.gmra.mxu2 %vm237_vm1, %v5478_v54 }
  0xe9   :  { %4342 = vmatmul.msk.f32.gmra.mxu3 %vm237_vm1, %v5478_v54 }
 0x14d   :  { %v261_v63 = vpop.f32.mrf.mxu1 }
 0x14e   :  { %v262_v4 = vadd.f32 %v4933_v0, %v261_v63 }
 0x153   :  { %v296_v55 = vpop.f32.mrf.mxu2 }
 0x154   :  { %v331_v56 = vpop.f32.mrf.mxu3  ;;  %v297_v2 = vadd.f32 %v4934_v57, %v296_v55 }
 0x155   :  { %v332_v1 = vadd.f32 %v4935_v59, %v331_v56  ;;  %v264_v9 = vpop.f32.mrf.mxu1 }
 0x156   :  { %v265_v11 = vadd.f32 %v4933_v0, %v264_v9 }
 0x15b   :  { %v299_v58 = vpop.f32.mrf.mxu2 }
 0x15c   :  { %v300_v60 = vadd.f32 %v4934_v57, %v299_v58  ;;  %v334_v61 = vpop.f32.mrf.mxu3 }
 0x15d   :  { %v335_v62 = vadd.f32 %v4935_v59, %v334_v61 }
 0x15e   :  { %4315 = vmatpush.xpose.msk.msrb.mxu0 %vm337_vm2, %v300_v60 }
 0x15f   :  { %445 = vmatpush.msrb.mxu1 %v335_v62  ;;  %v4373_v62 = vld [vmem:[%s5402_s6 + $0xb8] sm:$0xff] }
 0x161   :  { %446 = vmatpush.msrb.mxu1 %v332_v1 }
 0x162   :  { %4316 = vmatpush.xpose.msk.msrb.mxu0 %vm337_vm2, %v297_v2  ;;  %v4372_v2 = vld [vmem:[%s5402_s6 + $0xb0] sm:$0xff] }
 0x164   :  { %v524_v6 = vpop.f32.mrf.mxu3 }
 0x165   :  { %4317 = vmatmul.msk.f32.vlgmr.msrb.gmra.mxu0 %vm337_vm2, %v262_v4  ;;  %v525_v18 = vadd.f32 %v4937_v12, %v524_v6  ;;  %v4371_v4 = vld [vmem:[%s5402_s6 + $0xa8] sm:$0xff] }
 0x166   :  { %552 = vmatpush.msra.mxu0 %v4350_v3 }
 0x168   :  { %553 = vmatpush.msra.mxu0 %v4349_v5 }
 0x16a   :  { %554 = vmatpush.msra.mxu0 %v4348_v7  ;;  %v4370_v7 = vld [vmem:[%s5402_s6 + $0xa0] sm:$0xff] }
 0x16c   :  { %555 = vmatpush.msra.mxu0 %v4347_v8  ;;  %v527_v14 = vpop.f32.mrf.mxu3 }
 0x16d   :  { %v528_v15 = vadd.f32 %v4937_v12, %v527_v14  ;;  %4318 = vmatmul.msk.f32.gmra.mxu0 %vm337_vm2, %v265_v11  ;;  %v4368_v11 = vld [vmem:[%s5402_s6 + $0x90] sm:$0xff]  ;;  %v455_v12 = vld [vmem:[%s5397_s8 + $0x8] sm:$0xff]  ;;  %v4936_v14 = vld [vmem:[%s5252_s19 + $0x1] ss:$0 sm:$0xff] }
 0x16e   :  { %556 = vmatpush.msra.mxu0 %v4346_v10  ;;  %v4369_v10 = vld [vmem:[%s5402_s6 + $0x98] sm:$0xff] }
 0x16f   :  { %4354 = vmatpush.xpose.msk.msra.mxu1 %vm337_vm2, %v528_v15  ;;  %v4367_v15 = vld [vmem:[%s5402_s6 + $0x88] sm:$0xff] }
 0x170   :  { %557 = vmatpush.msra.mxu0 %v4345_v13  ;;  %v487_v13 = vpop.f32.mrf.mxu2 }
 0x172   :  { %558 = vmatpush.msra.mxu0 %v4344_v16  ;;  %v4366_v16 = vld [vmem:[%s5402_s6 + $0x80] sm:$0xff] }
 0x173   :  { %4355 = vmatpush.xpose.msk.msra.mxu1 %vm337_vm2, %v525_v18 }
 0x174   :  { %559 = vmatpush.msra.mxu0 %v4343_v17  ;;  %v488_v17 = vadd.f32 %v4936_v14, %v487_v13 }
 0x175   :  { %4352 = vmatmul.msk.f32.vlgmr.msra.gmra.mxu0 %vm237_vm1, %v5470_v52 }
 0x176   :  { %735 = vmatpush.msrb.mxu0 %v455_v12 }
 0x178   :  { %v490_v18 = vpop.f32.mrf.mxu2 }
 0x17d   :  { %4353 = vmatmul.msk.f32.gmra.mxu0 %vm237_vm1, %v5478_v54 }
 0x1e2   :  { %v367_v19 = vpop.f32.mrf.mxu0 }
 0x1e3   :  { %v373_v21 = vmul.f32 0.25, %v367_v19  ;;  %v491_v19 = vadd.f32 %v4936_v14, %v490_v18  ;;  %v4360_v14 = vld [vmem:[%s5397_s8 + $0x10] sm:$0xff]  ;;  %v4392_v18 = vld [vmem:[%s5407_s17 + $0xa0] sm:$0xff] }
 0x1e5   :  { %v375_v22 = vadd.f32 %v373_v21, %v5517_v20  ;;  %v454_v21 = vld [vmem:[%s5397_s8] sm:$0xff] }
 0x1e6   :  { %736 = vmatpush.msrb.mxu0 %v454_v21  ;;  %v4390_v21 = vld [vmem:[%s5407_s17 + $0x90] sm:$0xff] }
 0x1e7   :  { %v377_v23 = vsel %vm337_vm2, %v375_v22, -inf }
 0x1e8   :  { %378 = vmax.xlane.f32.xlu0 %v377_v23 }
 0x1ea   :  { %v370_v24 = vpop.f32.mrf.mxu0 }
 0x1eb   :  { %v374_v26 = vmul.f32 0.25, %v370_v24 }
 0x1ed   :  { %v376_v27 = vadd.f32 %v374_v26, %v5522_v25 }
 0x1ef   :  { %v380_v28 = vsel %vm337_vm2, %v376_v27, -inf }
 0x1f0   :  { %381 = vmax.xlane.f32.xlu0 %v380_v28 }
 0x1f2   :  { %v561_v29 = vpop.f32.mrf.mxu0 }
 0x1f3   :  { %v562_v33 = vadd.f32 %v4938_v30, %v561_v29 }
 0x1fa   :  { %v564_v31 = vpop.f32.mrf.mxu0 }
 0x1fb   :  { %v565_v32 = vadd.f32 %v4938_v30, %v564_v31 }
 0x1fd   :  { %674 = vmatpush.msra.mxu2 %v565_v32 }
 0x1ff   :  { %675 = vmatpush.msra.mxu2 %v562_v33 }
 0x25b   :  { %v379_v34 = vpop.xlane.xlu0 %378 }
 0x25c   :  { %v383_v35 = vsub.f32 %v375_v22, %v379_v34 }
 0x25e   :  { %v385_v36 = vmul.f32 1.442695, %v383_v35 }
 0x260   :  { %4994 = vpow2.f32 %v385_v36 }
 0x263   :  { %v382_v37 = vpop.xlane.xlu0 %381 }
 0x264   :  { %v384_v38 = vsub.f32 %v376_v27, %v382_v37 }
 0x266   :  { %v4995_v39 = vpop.eup %4994  ;;  %v387_v40 = vmul.f32 1.442695, %v384_v38 }
 0x267   :  { %v389_v41 = vsel %vm337_vm2, %v4995_v39, 0.0 }
 0x268   :  { %4996 = vpow2.f32 %v387_v40  ;;  %390 = vadd.xlane.f32.xlu1 %v389_v41 }
 0x26e   :  { %v4997_v42 = vpop.eup %4996 }
 0x26f   :  { %v392_v43 = vsel %vm337_vm2, %v4997_v42, 0.0 }
 0x270   :  { %393 = vadd.xlane.f32.xlu1 %v392_v43  ;;  %v4384_v43 = vld [vmem:[%s5392_s20 + $0xb8] sm:$0xff] }
 0x271   :  { %803 = vmatpush.msrb.mxu2 %v4384_v43 }
 0x2db   :  { %v391_v44 = vpop.xlane.xlu1 %390 }
 0x2dc   :  { %4998 = vrcp.f32 %v391_v44  ;;  %v406_v49 = vand.u32 2147483648, %v391_v44  ;;  %v404_v51 = vand.u32 2147483647, %v391_v44  ;;  %vm400_vm4 = vweird.f32 %v391_v44 }
 0x2de   :  { %v407_v56 = vor.u32 1.1754944e-38, %v406_v49  ;;  %vm405_vm6 = vcmp.eq.f32.partialorder %v404_v51, 8.507059e+37  ;;  %v4378_v49 = vld [vmem:[%s5392_s20 + $0x88] sm:$0xff]  ;;  %v4377_v51 = vld [vmem:[%s5392_s20 + $0x80] sm:$0xff] }
 0x2e2   :  { %v4999_v45 = vpop.eup %4998 }
 0x2e3   :  { %v396_v46 = vmul.f32 %v4999_v45, %v391_v44  ;;  %v394_v47 = vpop.xlane.xlu1 %393  ;;  %vm401_vm3 = vweird.f32 %v4999_v45  ;;  %v4383_v44 = vld [vmem:[%s5392_s20 + $0xb0] sm:$0xff] }
 0x2e4   :  { %5000 = vrcp.f32 %v394_v47  ;;  %vm402_vm5 = vmor %vm400_vm4, %vm401_vm3  ;;  %v421_v63 = vand.u32 2147483648, %v394_v47  ;;  %v419_v1 = vand.u32 2147483647, %v394_v47  ;;  %vm415_vm8 = vweird.f32 %v394_v47  ;;  %804 = vmatpush.msrb.mxu2 %v4383_v44  ;;  %v4426_v44 = vld [vmem:[%s5392_s20 + $0xf0] sm:$0xff] }
 0x2e5   :  { %v397_v48 = vsub.f32 1.0, %v396_v46  ;;  %v4381_v46 = vld [vmem:[%s5392_s20 + $0xa0] sm:$0xff] }
 0x2e6   :  { %v422_v5 = vor.u32 1.1754944e-38, %v421_v63  ;;  %vm420_vm10 = vcmp.eq.f32.partialorder %v419_v1, 8.507059e+37 }
 0x2e7   :  { %v398_v50 = vmul.f32 %v4999_v45, %v397_v48  ;;  %v4379_v48 = vld [vmem:[%s5392_s20 + $0x90] sm:$0xff] }
 0x2e9   :  { %v399_v53 = vadd.f32 %v4999_v45, %v398_v50 }
 0x2ea   :  { %v5001_v55 = vpop.eup %5000 }
 0x2eb   :  { %v411_v57 = vmul.f32 %v5001_v55, %v394_v47  ;;  %v403_v58 = vsel %vm402_vm5, %v4999_v45, %v399_v53  ;;  %vm416_vm7 = vweird.f32 %v5001_v55  ;;  %v4382_v45 = vld [vmem:[%s5392_s20 + $0xa8] sm:$0xff]  ;;  %v4380_v47 = vld [vmem:[%s5392_s20 + $0x98] sm:$0xff] }
 0x2ec   :  { %v408_v59 = vsel %vm405_vm6, %v407_v56, %v403_v58  ;;  %vm417_vm9 = vmor %vm415_vm8, %vm416_vm7  ;;  %805 = vmatpush.msrb.mxu2 %v4382_v45  ;;  %v4425_v45 = vld [vmem:[%s5392_s20 + $0xe8] sm:$0xff] }
 0x2ed   :  { %v412_v60 = vsub.f32 1.0, %v411_v57  ;;  %v409_v61 = vmul.f32 %v4995_v39, %v408_v59 }
 0x2ee   :  { %806 = vmatpush.msrb.mxu2 %v4381_v46  ;;  %v4424_v46 = vld [vmem:[%s5392_s20 + $0xe0] sm:$0xff] }
 0x2ef   :  { %v413_v0 = vmul.f32 %v5001_v55, %v412_v60  ;;  %4319 = vmatmul.msk.f32.vlgmr.msrb.gmra.mxu1 %vm337_vm2, %v409_v61  ;;  %v4361_v61 = vld [vmem:[%s5397_s8 + $0x18] sm:$0xff] }
 0x2f0   :  { %766 = vmatpush.msrb.mxu1 %v4373_v62  ;;  %807 = vmatpush.msrb.mxu2 %v4380_v47 }
 0x2f1   :  { %v414_v3 = vadd.f32 %v5001_v55, %v413_v0  ;;  %706 = vmatpush.msra.mxu3 %v4361_v61  ;;  %v4405_v61 = vld [vmem:[%s5397_s8 + $0x20] sm:$0xff] }
 0x2f2   :  { %767 = vmatpush.msrb.mxu1 %v4372_v2  ;;  %808 = vmatpush.msrb.mxu2 %v4379_v48  ;;  %v4423_v48 = vld [vmem:[%s5392_s20 + $0xd8] sm:$0xff] }
 0x2f3   :  { %v418_v6 = vsel %vm417_vm9, %v5001_v55, %v414_v3  ;;  %707 = vmatpush.msra.mxu3 %v4360_v14 }
 0x2f4   :  { %v423_v8 = vsel %vm420_vm10, %v422_v5, %v418_v6  ;;  %768 = vmatpush.msrb.mxu1 %v4371_v4  ;;  %809 = vmatpush.msrb.mxu2 %v4378_v49 }
 0x2f5   :  { %v424_v9 = vmul.f32 %v4997_v42, %v423_v8 }
 0x2f6   :  { %769 = vmatpush.msrb.mxu1 %v4370_v7  ;;  %810 = vmatpush.msrb.mxu2 %v4377_v51  ;;  %v4421_v51 = vld [vmem:[%s5392_s20 + $0xc8] sm:$0xff] }
 0x2f7   :  { %4320 = vmatmul.msk.f32.gmra.mxu1 %vm337_vm2, %v424_v9 }
 0x2f8   :  { %770 = vmatpush.msrb.mxu1 %v4369_v10 }
 0x2fa   :  { %771 = vmatpush.msrb.mxu1 %v4368_v11 }
 0x2fc   :  { %772 = vmatpush.msrb.mxu1 %v4367_v15  ;;  %v4395_v15 = vld [vmem:[%s5407_s17 + $0xb8] sm:$0xff] }
 0x2fd   :  { %840 = vmatpush.msrb.mxu3 %v4395_v15 }
 0x2fe   :  { %773 = vmatpush.msrb.mxu1 %v4366_v16  ;;  %v4394_v16 = vld [vmem:[%s5407_s17 + $0xb0] sm:$0xff] }
 0x2ff   :  { %4356 = vmatmul.msk.f32.vlgmr.msra.gmra.mxu1 %vm337_vm2, %v488_v17  ;;  %v4393_v17 = vld [vmem:[%s5407_s17 + $0xa8] sm:$0xff]  ;;  %841 = vmatpush.msrb.mxu3 %v4394_v16 }
 0x301   :  { %842 = vmatpush.msrb.mxu3 %v4393_v17 }
 0x303   :  { %843 = vmatpush.msrb.mxu3 %v4392_v18 }
 0x307   :  { %4357 = vmatmul.msk.f32.gmra.mxu1 %vm337_vm2, %v491_v19  ;;  %v4391_v19 = vld [vmem:[%s5407_s17 + $0x98] sm:$0xff] }
 0x308   :  { %844 = vmatpush.msrb.mxu3 %v4391_v19 }
 0x30a   :  { %845 = vmatpush.msrb.mxu3 %v4390_v21 }
 0x30f   :  { %4375 = vmatmul.msk.f32.vlgmr.msrb.gmra.mxu1 %vm237_vm1, %v5470_v52 }
 0x317   :  { %4376 = vmatmul.msk.f32.gmra.mxu1 %vm237_vm1, %v5478_v54 }
 0x36c   :  { %v448_v22 = vpop.f32.mrf.mxu1 }
 0x36d   :  { %4364 = vmatmul.msk.f32.vlgmr.msrb.gmra.mxu0 %vm337_vm2, %v448_v22  ;;  %v4389_v22 = vld [vmem:[%s5407_s17 + $0x88] sm:$0xff] }
 0x36e   :  { %846 = vmatpush.msrb.mxu3 %v4389_v22 }
 0x374   :  { %v451_v23 = vpop.f32.mrf.mxu1 }
 0x375   :  { %4365 = vmatmul.msk.f32.gmra.mxu0 %vm337_vm2, %v451_v23  ;;  %v4388_v23 = vld [vmem:[%s5407_s17 + $0x80] sm:$0xff] }
 0x376   :  { %847 = vmatpush.msrb.mxu3 %v4388_v23 }
 0x37c   :  { %v596_v24 = vpop.f32.mrf.mxu1 }
 0x37d   :  { %v602_v26 = vmul.f32 0.25, %v596_v24  ;;  %v4416_v24 = vld [vmem:[%s5402_s6 + $0xf8] sm:$0xff] }
 0x37f   :  { %v604_v27 = vadd.f32 %v602_v26, %v5517_v20 }
 0x381   :  { %v606_v28 = vsel %vm337_vm2, %v604_v27, -inf }
 0x382   :  { %607 = vmax.xlane.f32.xlu2 %v606_v28  ;;  %v4414_v28 = vld [vmem:[%s5402_s6 + $0xe8] sm:$0xff] }
 0x384   :  { %v599_v29 = vpop.f32.mrf.mxu1 }
 0x385   :  { %v603_v30 = vmul.f32 0.25, %v599_v29  ;;  %v4413_v29 = vld [vmem:[%s5402_s6 + $0xe0] sm:$0xff] }
 0x387   :  { %v605_v31 = vadd.f32 %v603_v30, %v5522_v25  ;;  %v4412_v30 = vld [vmem:[%s5402_s6 + $0xd8] sm:$0xff] }
 0x389   :  { %v609_v32 = vsel %vm337_vm2, %v605_v31, -inf }
 0x38a   :  { %610 = vmax.xlane.f32.xlu2 %v609_v32  ;;  %v4411_v32 = vld [vmem:[%s5402_s6 + $0xd0] sm:$0xff] }
 0x3f5   :  { %v608_v33 = vpop.xlane.xlu2 %607 }
 0x3f6   :  { %v612_v34 = vsub.f32 %v604_v27, %v608_v33  ;;  %v4415_v27 = vld [vmem:[%s5402_s6 + $0xf0] sm:$0xff]  ;;  %v4410_v33 = vld [vmem:[%s5402_s6 + $0xc8] sm:$0xff] }
 0x3f8   :  { %v614_v35 = vmul.f32 1.442695, %v612_v34  ;;  %v4409_v34 = vld [vmem:[%s5402_s6 + $0xc0] sm:$0xff] }
 0x3fa   :  { %5002 = vpow2.f32 %v614_v35 }
 0x3fd   :  { %v611_v36 = vpop.xlane.xlu2 %610 }
 0x3fe   :  { %v613_v37 = vsub.f32 %v605_v31, %v611_v36  ;;  %v4940_v36 = vld [vmem:[%s5222_s21 + $0x2] ss:$0 sm:$0xff] }
 0x400   :  { %v5003_v38 = vpop.eup %5002  ;;  %v616_v39 = vmul.f32 1.442695, %v613_v37 }
 0x401   :  { %v618_v40 = vsel %vm337_vm2, %v5003_v38, 0.0 }
 0x402   :  { %5004 = vpow2.f32 %v616_v39  ;;  %619 = vadd.xlane.f32.xlu0 %v618_v40  ;;  %v775_v39 = vpop.f32.mrf.mxu1  ;;  %v4939_v40 = vld [vmem:[%s5252_s19 + $0x2] ss:$0 sm:$0xff] }
 0x403   :  { %v776_v43 = vadd.f32 %v4939_v40, %v775_v39 }
 0x408   :  { %v5005_v41 = vpop.eup %5004 }
 0x409   :  { %v621_v42 = vsel %vm337_vm2, %v5005_v41, 0.0 }
 0x40a   :  { %622 = vadd.xlane.f32.xlu1 %v621_v42  ;;  %v4427_v42 = vld [vmem:[%s5392_s20 + $0xf8] sm:$0xff]  ;;  %v778_v47 = vpop.f32.mrf.mxu1 }
 0x40b   :  { %v779_v49 = vadd.f32 %v4939_v40, %v778_v47 }
 0x475   :  { %v620_v50 = vpop.xlane.xlu0 %619 }
 0x476   :  { %5006 = vrcp.f32 %v620_v50  ;;  %v635_v58 = vand.u32 2147483648, %v620_v50  ;;  %v633_v60 = vand.u32 2147483647, %v620_v50  ;;  %vm629_vm12 = vweird.f32 %v620_v50 }
 0x478   :  { %v636_v0 = vor.u32 1.1754944e-38, %v635_v58  ;;  %vm634_vm14 = vcmp.eq.f32.partialorder %v633_v60, 8.507059e+37  ;;  %v4406_v58 = vld [vmem:[%s5397_s8 + $0x28] sm:$0xff] }
 0x47c   :  { %v5007_v53 = vpop.eup %5006 }
 0x47d   :  { %v625_v55 = vmul.f32 %v5007_v53, %v620_v50  ;;  %v623_v56 = vpop.xlane.xlu1 %622  ;;  %vm630_vm11 = vweird.f32 %v5007_v53  ;;  %v4422_v50 = vld [vmem:[%s5392_s20 + $0xd0] sm:$0xff] }
 0x47e   :  { %5008 = vrcp.f32 %v623_v56  ;;  %vm631_vm13 = vmor %vm629_vm12, %vm630_vm11  ;;  %v650_v6 = vand.u32 2147483648, %v623_v56  ;;  %v648_v8 = vand.u32 2147483647, %v623_v56  ;;  %vm644_vm3 = vweird.f32 %v623_v56 }
 0x47f   :  { %v626_v57 = vsub.f32 1.0, %v625_v55 }
 0x480   :  { %v651_v10 = vor.u32 1.1754944e-38, %v650_v6  ;;  %vm649_vm5 = vcmp.eq.f32.partialorder %v648_v8, 8.507059e+37 }
 0x481   :  { %v627_v59 = vmul.f32 %v5007_v53, %v626_v57  ;;  %v5620_v57 = vpop.f32.mrf.mxu0 }
 0x483   :  { %v628_v62 = vadd.f32 %v5007_v53, %v627_v59 }
 0x484   :  { %v5009_v63 = vpop.eup %5008 }
 0x485   :  { %v632_v1 = vsel %vm631_vm13, %v5007_v53, %v628_v62  ;;  %v640_v2 = vmul.f32 %v5009_v63, %v623_v56  ;;  %vm645_vm15 = vweird.f32 %v5009_v63  ;;  %v4420_v53 = vld [vmem:[%s5392_s20 + $0xc0] sm:$0xff] }
 0x486   :  { %v637_v3 = vsel %vm634_vm14, %v636_v0, %v632_v1  ;;  %vm646_vm4 = vmor %vm644_vm3, %vm645_vm15  ;;  %v4941_v62 = vld [vmem:[%s5257_s24 + $0x2] ss:$0 sm:$0xff] }
 0x487   :  { %v641_v4 = vsub.f32 1.0, %v640_v2  ;;  %v638_v5 = vmul.f32 %v5003_v38, %v637_v3 }
 0x489   :  { %v642_v7 = vmul.f32 %v5009_v63, %v641_v4  ;;  %4358 = vmatmul.msk.f32.vlgmr.msra.gmra.mxu2 %vm337_vm2, %v638_v5  ;;  %v5623_v60 = vpop.f32.mrf.mxu0 }
 0x48a   :  { %994 = vmatpush.msra.mxu2 %v4406_v58 }
 0x48b   :  { %v643_v9 = vadd.f32 %v5009_v63, %v642_v7 }
 0x48c   :  { %995 = vmatpush.msra.mxu2 %v4405_v61 }
 0x48d   :  { %v647_v11 = vsel %vm646_vm4, %v5009_v63, %v643_v9 }
 0x48e   :  { %v652_v12 = vsel %vm649_vm5, %v651_v10, %v647_v11  ;;  %v4943_v11 = vld [vmem:[%s5222_s21 + $0x3] ss:$0 sm:$0xff] }
 0x48f   :  { %v653_v13 = vmul.f32 %v5005_v41, %v652_v12 }
 0x491   :  { %4359 = vmatmul.msk.f32.gmra.mxu2 %vm337_vm2, %v653_v13 }
 0x499   :  { %4386 = vmatmul.msk.f32.vlgmr.msrb.gmra.mxu2 %vm237_vm1, %v5470_v52 }
 0x4a1   :  { %4387 = vmatmul.msk.f32.gmra.mxu2 %vm237_vm1, %v5478_v54 }
 0x50c   :  { %v677_v26 = vpop.f32.mrf.mxu2 }
 0x50d   :  { %4362 = vmatmul.msk.f32.vlgmr.msra.gmra.mxu3 %vm337_vm2, %v677_v26 }
 0x50e   :  { %1027 = vmatpush.msra.mxu3 %v4416_v24 }
 0x510   :  { %1028 = vmatpush.msra.mxu3 %v4415_v27  ;;  %v4438_v27 = vld [vmem:[%s5407_s17 + $0xf8] sm:$0xff] }
 0x512   :  { %1029 = vmatpush.msra.mxu3 %v4414_v28  ;;  %v4437_v28 = vld [vmem:[%s5407_s17 + $0xf0] sm:$0xff] }
 0x514   :  { %v680_v31 = vpop.f32.mrf.mxu2  ;;  %1030 = vmatpush.msra.mxu3 %v4413_v29  ;;  %v4436_v29 = vld [vmem:[%s5407_s17 + $0xe8] sm:$0xff] }
 0x515   :  { %4363 = vmatmul.msk.f32.gmra.mxu3 %vm337_vm2, %v680_v31  ;;  %v4434_v31 = vld [vmem:[%s5407_s17 + $0xd8] sm:$0xff] }
 0x516   :  { %1031 = vmatpush.msra.mxu3 %v4412_v30  ;;  %v4435_v30 = vld [vmem:[%s5407_s17 + $0xe0] sm:$0xff] }
 0x518   :  { %1032 = vmatpush.msra.mxu3 %v4411_v32  ;;  %v4433_v32 = vld [vmem:[%s5407_s17 + $0xd0] sm:$0xff] }
 0x51a   :  { %1033 = vmatpush.msra.mxu3 %v4410_v33  ;;  %v4432_v33 = vld [vmem:[%s5407_s17 + $0xc8] sm:$0xff] }
 0x51c   :  { %v812_v35 = vpop.f32.mrf.mxu2  ;;  %1034 = vmatpush.msra.mxu3 %v4409_v34 }
 0x51d   :  { %4397 = vmatmul.msk.f32.vlgmr.msrb.gmra.mxu3 %vm237_vm1, %v5470_v52  ;;  %v813_v41 = vadd.f32 %v4940_v36, %v812_v35  ;;  %v4431_v35 = vld [vmem:[%s5407_s17 + $0xc0] sm:$0xff] }
 0x524   :  { %v815_v37 = vpop.f32.mrf.mxu2 }
 0x525   :  { %v816_v38 = vadd.f32 %v4940_v36, %v815_v37  ;;  %4398 = vmatmul.msk.f32.gmra.mxu3 %vm237_vm1, %v5478_v54 }
 0x527   :  { %4399 = vmatpush.xpose.msk.msra.mxu0 %vm337_vm2, %v816_v38 }
 0x52b   :  { %4400 = vmatpush.xpose.msk.msra.mxu0 %vm337_vm2, %v813_v41 }
 0x52d   :  { %4418 = vmatmul.msk.f32.vlgmr.msra.gmra.mxu3 %vm237_vm1, %v5470_v52 }
 0x52e   :  { %4401 = vmatmul.msk.f32.vlgmr.msra.gmra.mxu0 %vm337_vm2, %v776_v43 }
 0x52f   :  { %1064 = vmatpush.msrb.mxu0 %v4427_v42 }
 0x531   :  { %1065 = vmatpush.msrb.mxu0 %v4426_v44 }
 0x533   :  { %1066 = vmatpush.msrb.mxu0 %v4425_v45 }
 0x535   :  { %1067 = vmatpush.msrb.mxu0 %v4424_v46  ;;  %4419 = vmatmul.msk.f32.gmra.mxu3 %vm237_vm1, %v5478_v54 }
 0x536   :  { %4402 = vmatmul.msk.f32.gmra.mxu0 %vm337_vm2, %v779_v49 }
 0x537   :  { %1068 = vmatpush.msrb.mxu0 %v4423_v48 }
 0x539   :  { %1069 = vmatpush.msrb.mxu0 %v4422_v50 }
 0x53b   :  { %1070 = vmatpush.msrb.mxu0 %v4421_v51 }
 0x53d   :  { %1071 = vmatpush.msrb.mxu0 %v4420_v53 }
 0x53e   :  { %4429 = vmatmul.msk.f32.vlgmr.msrb.gmra.mxu0 %vm237_vm1, %v5470_v52 }
 0x546   :  { %4430 = vmatmul.msk.f32.gmra.mxu0 %vm237_vm1, %v5478_v54 }
 0x590   :  { %v5616_v55 = vpop.f32.mrf.mxu3 }
 0x598   :  { %v5618_v56 = vpop.f32.mrf.mxu3 }
 0x5a0   :  { %v849_v59 = vpop.f32.mrf.mxu3 }
 0x5a1   :  { %v850_v1 = vadd.f32 %v4941_v62, %v849_v59 }
 0x5a8   :  { %v852_v63 = vpop.f32.mrf.mxu3 }
 0x5a9   :  { %v853_v0 = vadd.f32 %v4941_v62, %v852_v63 }
 0x5ab   :  { %v884_v2 = vpop.f32.mrf.mxu0  ;;  %962 = vmatpush.msra.mxu1 %v853_v0 }
 0x5ac   :  { %v890_v3 = vmul.f32 0.25, %v884_v2 }
 0x5ad   :  { %963 = vmatpush.msra.mxu1 %v850_v1 }
 0x5ae   :  { %v892_v4 = vadd.f32 %v890_v3, %v5517_v20 }
 0x5af   :  { %1101 = vmatpush.msrb.mxu1 %v4438_v27 }
 0x5b0   :  { %v894_v5 = vsel %vm337_vm2, %v892_v4, -inf  ;;  %v1036_v3 = vpop.f32.mrf.mxu3 }
 0x5b1   :  { %895 = vmax.xlane.f32.xlu2 %v894_v5  ;;  %1102 = vmatpush.msrb.mxu1 %v4437_v28 }
 0x5b3   :  { %v887_v6 = vpop.f32.mrf.mxu0  ;;  %1103 = vmatpush.msrb.mxu1 %v4436_v29 }
 0x5b4   :  { %v891_v7 = vmul.f32 0.25, %v887_v6 }
 0x5b5   :  { %1104 = vmatpush.msrb.mxu1 %v4435_v30 }
 0x5b6   :  { %v893_v8 = vadd.f32 %v891_v7, %v5522_v25 }
 0x5b7   :  { %1105 = vmatpush.msrb.mxu1 %v4434_v31 }
 0x5b8   :  { %v897_v9 = vsel %vm337_vm2, %v893_v8, -inf  ;;  %v1039_v7 = vpop.f32.mrf.mxu3 }
 0x5b9   :  { %898 = vmax.xlane.f32.xlu0 %v897_v9  ;;  %1106 = vmatpush.msrb.mxu1 %v4433_v32  ;;  %v4944_v9 = vld [vmem:[%s5257_s24 + $0x3] ss:$0 sm:$0xff] }
 0x5bb   :  { %v1073_v10 = vpop.f32.mrf.mxu0  ;;  %1107 = vmatpush.msrb.mxu1 %v4432_v33 }
 0x5bc   :  { %v1074_v14 = vadd.f32 %v4943_v11, %v1073_v10 }
 0x5bd   :  { %1108 = vmatpush.msrb.mxu1 %v4431_v35 }
 0x5c3   :  { %v1076_v12 = vpop.f32.mrf.mxu0 }
 0x5c4   :  { %v1077_v13 = vadd.f32 %v4943_v11, %v1076_v12 }
 0x5c6   :  { %4442 = vmatpush.xpose.msk.msrb.mxu2 %vm337_vm2, %v1077_v13 }
 0x5ca   :  { %4443 = vmatpush.xpose.msk.msrb.mxu2 %vm337_vm2, %v1074_v14 }
 0x624   :  { %v896_v15 = vpop.xlane.xlu2 %895 }
 0x625   :  { %v900_v16 = vsub.f32 %v892_v4, %v896_v15  ;;  %v4942_v4 = vld [vmem:[%s5252_s19 + $0x3] ss:$0 sm:$0xff] }
 0x626   :  { %v1037_v5 = vadd.f32 %v4942_v4, %v1036_v3  ;;  %v739_v3 = vadd.f32 %v5620_v57, %v5616_v55 }
 0x627   :  { %v902_v17 = vmul.f32 1.442695, %v900_v16 }
 0x629   :  { %5010 = vpow2.f32 %v902_v17 }
 0x62c   :  { %v899_v18 = vpop.xlane.xlu0 %898 }
 0x62d   :  { %v901_v19 = vsub.f32 %v893_v8, %v899_v18  ;;  %v1040_v8 = vadd.f32 %v4942_v4, %v1039_v7 }
 0x62f   :  { %v5011_v21 = vpop.eup %5010  ;;  %v904_v22 = vmul.f32 1.442695, %v901_v19 }
 0x630   :  { %v906_v23 = vsel %vm337_vm2, %v5011_v21, 0.0 }
 0x631   :  { %5012 = vpow2.f32 %v904_v22  ;;  %907 = vadd.xlane.f32.xlu1 %v906_v23 }
 0x637   :  { %v5013_v24 = vpop.eup %5012 }
 0x638   :  { %v909_v26 = vsel %vm337_vm2, %v5013_v24, 0.0 }
 0x639   :  { %910 = vadd.xlane.f32.xlu2 %v909_v26 }
 0x6a4   :  { %v908_v34 = vpop.xlane.xlu1 %907 }
 0x6a5   :  { %5014 = vrcp.f32 %v908_v34  ;;  %v923_v40 = vand.u32 2147483648, %v908_v34  ;;  %v921_v42 = vand.u32 2147483647, %v908_v34  ;;  %vm917_vm7 = vweird.f32 %v908_v34 }
 0x6a7   :  { %v924_v45 = vor.u32 1.1754944e-38, %v923_v40  ;;  %vm922_vm9 = vcmp.eq.f32.partialorder %v921_v42, 8.507059e+37 }
 0x6ab   :  { %v5015_v36 = vpop.eup %5014 }
 0x6ac   :  { %v913_v37 = vmul.f32 %v5015_v36, %v908_v34  ;;  %v911_v38 = vpop.xlane.xlu2 %910  ;;  %vm918_vm6 = vweird.f32 %v5015_v36 }
 0x6ad   :  { %5016 = vrcp.f32 %v911_v38  ;;  %vm919_vm8 = vmor %vm917_vm7, %vm918_vm6  ;;  %v938_v51 = vand.u32 2147483648, %v911_v38  ;;  %v936_v58 = vand.u32 2147483647, %v911_v38  ;;  %vm932_vm11 = vweird.f32 %v911_v38 }
 0x6ae   :  { %v914_v39 = vsub.f32 1.0, %v913_v37 }
 0x6af   :  { %v939_v61 = vor.u32 1.1754944e-38, %v938_v51  ;;  %vm937_vm13 = vcmp.eq.f32.partialorder %v936_v58, 8.507059e+37 }
 0x6b0   :  { %v915_v41 = vmul.f32 %v5015_v36, %v914_v39 }
 0x6b2   :  { %v916_v43 = vadd.f32 %v5015_v36, %v915_v41 }
 0x6b3   :  { %v5017_v44 = vpop.eup %5016 }
 0x6b4   :  { %v920_v46 = vsel %vm919_vm8, %v5015_v36, %v916_v43  ;;  %v928_v47 = vmul.f32 %v5017_v44, %v911_v38  ;;  %vm933_vm10 = vweird.f32 %v5017_v44 }
 0x6b5   :  { %v925_v48 = vsel %vm922_vm9, %v924_v45, %v920_v46  ;;  %vm934_vm12 = vmor %vm932_vm11, %vm933_vm10 }
 0x6b6   :  { %v929_v49 = vsub.f32 1.0, %v928_v47  ;;  %v926_v50 = vmul.f32 %v5011_v21, %v925_v48 }
 0x6b8   :  { %v930_v53 = vmul.f32 %v5017_v44, %v929_v49  ;;  %4403 = vmatmul.msk.f32.vlgmr.msra.gmra.mxu1 %vm337_vm2, %v926_v50 }
 0x6ba   :  { %v931_v59 = vadd.f32 %v5017_v44, %v930_v53 }
 0x6bc   :  { %v935_v62 = vsel %vm934_vm12, %v5017_v44, %v931_v59 }
 0x6bd   :  { %v940_v63 = vsel %vm937_vm13, %v939_v61, %v935_v62 }
 0x6be   :  { %v941_v0 = vmul.f32 %v5013_v24, %v940_v63 }
 0x6c0   :  { %4404 = vmatmul.msk.f32.gmra.mxu1 %vm337_vm2, %v941_v0  ;;  %v4448_v0 = vld [vmem:[%s5397_s8 + $0x30] sm:$0xff] }
 0x6c8   :  { %4440 = vmatmul.msk.f32.vlgmr.msrb.gmra.mxu1 %vm237_vm1, %v5470_v52 }
 0x6d0   :  { %4441 = vmatmul.msk.f32.gmra.mxu1 %vm237_vm1, %v5478_v54 }
 0x735   :  { %v965_v1 = vpop.f32.mrf.mxu1 }
 0x736   :  { %4407 = vmatmul.msk.f32.vlgmr.msra.gmra.mxu2 %vm337_vm2, %v965_v1 }
 0x73d   :  { %v968_v2 = vpop.f32.mrf.mxu1 }
 0x73e   :  { %4408 = vmatmul.msk.f32.gmra.mxu2 %vm337_vm2, %v968_v2 }
 0x745   :  { %v1110_v6 = vpop.f32.mrf.mxu1 }
 0x746   :  { %4444 = vmatmul.msk.f32.vlgmr.msrb.gmra.mxu2 %vm337_vm2, %v1037_v5  ;;  %v1111_v12 = vadd.f32 %v4944_v9, %v1110_v6  ;;  %v4945_v5 = vld [vmem:[%s5247_s14] ss:$0 sm:$0xff] }
 0x74d   :  { %v1113_v10 = vpop.f32.mrf.mxu1 }
 0x74e   :  { %v1114_v11 = vadd.f32 %v4944_v9, %v1113_v10  ;;  %4445 = vmatmul.msk.f32.gmra.mxu2 %vm337_vm2, %v1040_v8  ;;  %v742_v9 = vadd.f32 %v5623_v60, %v5618_v56 }
 0x750   :  { %1223 = vmatpush.msrb.mxu3 %v1114_v11 }
 0x752   :  { %1224 = vmatpush.msrb.mxu3 %v1111_v12 }
 0x7b9   :  { %v5656_v13 = vpop.f32.mrf.mxu2 }
 0x7ba   :  { %v1003_v4 = vadd.f32 %v5656_v13, %v739_v3  ;;  %v5189_v13 = vmov 64.0  }
 0x7c1   :  { %v5658_v14 = vpop.f32.mrf.mxu2 }
 0x7c2   :  { %v1004_v11 = vadd.f32 %v5658_v14, %v742_v9 }
 0x7c9   :  { %v1145_v15 = vpop.f32.mrf.mxu2 }
 0x7ca   :  { %v1151_v16 = vmul.f32 0.25, %v1145_v15 }
 0x7cc   :  { %v1153_v17 = vadd.f32 %v1151_v16, %v5517_v20 }
 0x7ce   :  { %v1155_v18 = vsel %vm337_vm2, %v1153_v17, -inf }
 0x7cf   :  { %1156 = vmax.xlane.f32.xlu0 %v1155_v18 }
 0x7d1   :  { %v1148_v19 = vpop.f32.mrf.mxu2 }
 0x7d2   :  { %v1152_v21 = vmul.f32 0.25, %v1148_v19 }
 0x7d4   :  { %v1154_v22 = vadd.f32 %v1152_v21, %v5522_v25  ;;  %v4449_v25 = vld [vmem:[%s5397_s8 + $0x38] sm:$0xff] }
 0x7d5   :  { %1255 = vmatpush.msra.mxu0 %v4449_v25  ;;  %v1340_v25 = vld [vmem:[%s5382_s29 + $0x18] sm:$0xff] }
 0x7d6   :  { %v1158_v23 = vsel %vm337_vm2, %v1154_v22, -inf }
 0x7d7   :  { %1159 = vmax.xlane.f32.xlu1 %v1158_v23  ;;  %1256 = vmatpush.msra.mxu0 %v4448_v0 }
 0x842   :  { %v1157_v24 = vpop.xlane.xlu0 %1156 }
 0x843   :  { %v1161_v26 = vsub.f32 %v1153_v17, %v1157_v24 }
 0x845   :  { %v1163_v27 = vmul.f32 1.442695, %v1161_v26 }
 0x847   :  { %5018 = vpow2.f32 %v1163_v27 }
 0x84a   :  { %v1160_v28 = vpop.xlane.xlu1 %1159 }
 0x84b   :  { %v1162_v29 = vsub.f32 %v1154_v22, %v1160_v28 }
 0x84d   :  { %v5019_v30 = vpop.eup %5018  ;;  %v1165_v31 = vmul.f32 1.442695, %v1162_v29 }
 0x84e   :  { %v1167_v20 = vsel %vm337_vm2, %v5019_v30, 0.0 }
 0x84f   :  { %5020 = vpow2.f32 %v1165_v31  ;;  %1168 = vadd.xlane.f32.xlu2 %v1167_v20  ;;  %v1344_v31 = vld [vmem:[%s5382_s29 + $0x38] sm:$0xff]  ;;  %v1343_v20 = vld [vmem:[%s5382_s29 + $0x30] sm:$0xff] }
 0x850   :  { %1363 = vmatpush.msra.mxu1 %v1344_v31 }
 0x852   :  { %1364 = vmatpush.msra.mxu1 %v1343_v20 }
 0x855   :  { %v5021_v32 = vpop.eup %5020 }
 0x856   :  { %v1170_v33 = vsel %vm337_vm2, %v5021_v32, 0.0 }
 0x857   :  { %1171 = vadd.xlane.f32.xlu0 %v1170_v33  ;;  %v1341_v33 = vld [vmem:[%s5382_s29 + $0x20] sm:$0xff] }
 0x8c2   :  { %v1169_v34 = vpop.xlane.xlu2 %1168 }
 0x8c3   :  { %5022 = vrcp.f32 %v1169_v34  ;;  %v1184_v39 = vand.u32 2147483648, %v1169_v34  ;;  %v1182_v41 = vand.u32 2147483647, %v1169_v34  ;;  %vm1178_vm15 = vweird.f32 %v1169_v34 }
 0x8c5   :  { %v1185_v44 = vor.u32 1.1754944e-38, %v1184_v39  ;;  %vm1183_vm4 = vcmp.eq.f32.partialorder %v1182_v41, 8.507059e+37  ;;  %v1386_v41 = vld [vmem:[%s5387_s3 + $0x30] sm:$0xff] }
 0x8c9   :  { %v5023_v35 = vpop.eup %5022 }
 0x8ca   :  { %v1174_v36 = vmul.f32 %v5023_v35, %v1169_v34  ;;  %v1172_v37 = vpop.xlane.xlu0 %1171  ;;  %vm1179_vm14 = vweird.f32 %v5023_v35  ;;  %v1339_v34 = vld [vmem:[%s5382_s29 + $0x10] sm:$0xff] }
 0x8cb   :  { %5024 = vrcp.f32 %v1172_v37  ;;  %vm1180_vm3 = vmor %vm1178_vm15, %vm1179_vm14  ;;  %v1199_v50 = vand.u32 2147483648, %v1172_v37  ;;  %v1197_v53 = vand.u32 2147483647, %v1172_v37  ;;  %vm1193_vm6 = vweird.f32 %v1172_v37 }
 0x8cc   :  { %v1175_v38 = vsub.f32 1.0, %v1174_v36  ;;  %5026 = vrcp.f32 %v5189_v13  ;;  %v1337_v36 = vld [vmem:[%s5382_s29] sm:$0xff] }
 0x8cd   :  { %v1200_v59 = vor.u32 1.1754944e-38, %v1199_v50  ;;  %vm1198_vm8 = vcmp.eq.f32.partialorder %v1197_v53, 8.507059e+37 }
 0x8ce   :  { %v1176_v40 = vmul.f32 %v5023_v35, %v1175_v38 }
 0x8d0   :  { %v1177_v42 = vadd.f32 %v5023_v35, %v1176_v40  ;;  %v1387_v40 = vld [vmem:[%s5387_s3 + $0x38] sm:$0xff] }
 0x8d1   :  { %v5025_v43 = vpop.eup %5024  ;;  %1406 = vmatpush.msra.mxu2 %v1387_v40  ;;  %v1540_v40 = vld [vmem:[%s6506_s23 + $0x30] sm:$0xff] }
 0x8d2   :  { %v1181_v45 = vsel %vm1180_vm3, %v5023_v35, %v1177_v42  ;;  %v1189_v46 = vmul.f32 %v5025_v43, %v1172_v37  ;;  %vm1194_vm5 = vweird.f32 %v5025_v43  ;;  %v5027_v18 = vpop.eup %5026  ;;  %v1338_v35 = vld [vmem:[%s5382_s29 + $0x8] sm:$0xff] }
 0x8d3   :  { %v1186_v47 = vsel %vm1183_vm4, %v1185_v44, %v1181_v45  ;;  %vm1195_vm7 = vmor %vm1193_vm6, %vm1194_vm5  ;;  %v1283_v19 = vmul.f32 64.0, %v5027_v18  ;;  %vm1287_vm9 = vweird.f32 %v5027_v18  ;;  %v1385_v42 = vld [vmem:[%s5387_s3 + $0x28] sm:$0xff]  ;;  %1407 = vmatpush.msra.mxu2 %v1386_v41  ;;  %v1384_v45 = vld [vmem:[%s5387_s3 + $0x20] sm:$0xff] }
 0x8d4   :  { %v1190_v48 = vsub.f32 1.0, %v1189_v46  ;;  %v1187_v49 = vmul.f32 %v5019_v30, %v1186_v47  ;;  %v4464_v41 = vld [vmem:[%s6506_s23 + $0xb0] sm:$0xff] }
 0x8d5   :  { %v1284_v56 = vsub.f32 1.0, %v1283_v19  ;;  %1408 = vmatpush.msra.mxu2 %v1385_v42  ;;  %v1490_v42 = vld [vmem:[%s6505_s22 + $0x28] sm:$0xff] }
 0x8d6   :  { %v1191_v51 = vmul.f32 %v5025_v43, %v1190_v48  ;;  %4446 = vmatmul.msk.f32.vlgmr.msrb.gmra.mxu3 %vm337_vm2, %v1187_v49  ;;  %v1383_v48 = vld [vmem:[%s5387_s3 + $0x18] sm:$0xff] }
 0x8d7   :  { %v1285_v60 = vmul.f32 %v5027_v18, %v1284_v56  ;;  %1409 = vmatpush.msra.mxu2 %v1384_v45  ;;  %v1489_v45 = vld [vmem:[%s6505_s22 + $0x20] sm:$0xff] }
 0x8d8   :  { %v1192_v58 = vadd.f32 %v5025_v43, %v1191_v51 }
 0x8d9   :  { %1410 = vmatpush.msra.mxu2 %v1383_v48  ;;  %v1488_v48 = vld [vmem:[%s6505_s22 + $0x18] sm:$0xff] }
 0x8da   :  { %v1196_v61 = vsel %vm1195_vm7, %v5025_v43, %v1192_v58 }
 0x8db   :  { %v1201_v62 = vsel %vm1198_vm8, %v1200_v59, %v1196_v61 }
 0x8dc   :  { %v1202_v63 = vmul.f32 %v5021_v32, %v1201_v62  ;;  %v1342_v32 = vld [vmem:[%s5382_s29 + $0x28] sm:$0xff]  ;;  %v4946_v62 = vld [vmem:[%s5317_s30] ss:$0 sm:$0xff] }
 0x8dd   :  { %1365 = vmatpush.msra.mxu1 %v1342_v32 }
 0x8de   :  { %4447 = vmatmul.msk.f32.gmra.mxu3 %vm337_vm2, %v1202_v63 }
 0x8df   :  { %1366 = vmatpush.msra.mxu1 %v1341_v33 }
 0x8e1   :  { %1367 = vmatpush.msra.mxu1 %v1340_v25 }
 0x8e3   :  { %1368 = vmatpush.msra.mxu1 %v1339_v34 }
 0x8e5   :  { %1369 = vmatpush.msra.mxu1 %v1338_v35 }
 0x8e7   :  { %1370 = vmatpush.msra.mxu1 %v1337_v36  ;;  %v1492_v36 = vld [vmem:[%s6505_s22 + $0x38] sm:$0xff] }
 0x8e8   :  { %1510 = vmatpush.msra.mxu3 %v1492_v36  ;;  %v4504_v36 = vld [vmem:[%s6506_s23 + $0x120] sm:$0xff] }
 0x959   :  { %v1226_v1 = vpop.f32.mrf.mxu3 }
 0x95a   :  { %4450 = vmatmul.msk.f32.vlgmr.msra.gmra.mxu0 %vm337_vm2, %v1226_v1 }
 0x961   :  { %v1229_v2 = vpop.f32.mrf.mxu3 }
 0x962   :  { %4451 = vmatmul.msk.f32.gmra.mxu0 %vm337_vm2, %v1229_v2  ;;  %v4947_v2 = vld [vmem:[%s6502_s0] ss:$0 sm:$0xff] }
 0x9d7   :  { %v1258_v6 = vpop.f32.mrf.mxu0 }
 0x9d8   :  { %v1264_v7 = vadd.f32 %v1258_v6, %v1003_v4 }
 0x9da   :  { %v1270_v8 = vadd.f32 %v4945_v5, %v1264_v7 }
 0x9dc   :  { %v1272_v10 = vadd.f32 %v1270_v8, %v5470_v52  ;;  %v1286_v52 = vadd.f32 %v5027_v18, %v1285_v60  ;;  %v4949_v60 = vld [vmem:[%s6504_s12] ss:$0 sm:$0xff] }
 0x9de   :  { %v1276_v12 = vsel %vm237_vm1, %v1272_v10, 0.0  ;;  %v5683_v14 = vsel %vm1287_vm9, %v5027_v18, %v1286_v52 }
 0x9df   :  { %1277 = vadd.xlane.f32.xlu1 %v1276_v12  ;;  %v1261_v15 = vpop.f32.mrf.mxu0  ;;  %v1382_v12 = vld [vmem:[%s5387_s3 + $0x10] sm:$0xff] }
 0x9e0   :  { %v1265_v16 = vadd.f32 %v1261_v15, %v1004_v11  ;;  %1411 = vmatpush.msra.mxu2 %v1382_v12  ;;  %v1381_v15 = vld [vmem:[%s5387_s3 + $0x8] sm:$0xff] }
 0x9e1   :  { %v4473_v12 = vld [vmem:[%s6506_s23 + $0x48] sm:$0xff] }
 0x9e2   :  { %v1271_v17 = vadd.f32 %v4945_v5, %v1265_v16  ;;  %1412 = vmatpush.msra.mxu2 %v1381_v15  ;;  %v1380_v16 = vld [vmem:[%s5387_s3] sm:$0xff] }
 0x9e4   :  { %v1273_v55 = vadd.f32 %v1271_v17, %v5478_v54  ;;  %1413 = vmatpush.msra.mxu2 %v1380_v16  ;;  %v4948_v17 = vld [vmem:[%s6503_s5] ss:$0 sm:$0xff] }
 0x9e5   :  { %v4472_v16 = vld [vmem:[%s6506_s23 + $0x40] sm:$0xff] }
 0x9e6   :  { %v1279_v57 = vsel %vm237_vm1, %v1273_v55, 0.0 }
 0x9e7   :  { %1280 = vadd.xlane.f32.xlu2 %v1279_v57 }
 0xa52   :  { %v1278_v21 = vpop.xlane.xlu1 %1277 }
 0xa53   :  { %v1289_v22 = vmul.f32 %v5683_v14, %v1278_v21 }
 0xa55   :  { %v1291_v54 = vsub.f32 %v1272_v10, %v1289_v22 }
 0xa57   :  { %v1293_v23 = vmul.f32 %v1291_v54, %v1291_v54 }
 0xa59   :  { %v1295_v24 = vsel %vm237_vm1, %v1293_v23, 0.0 }
 0xa5a   :  { %1296 = vadd.xlane.f32.xlu0 %v1295_v24  ;;  %v1281_v26 = vpop.xlane.xlu2 %1280 }
 0xa5b   :  { %v1290_v27 = vmul.f32 %v5683_v14, %v1281_v26 }
 0xa5d   :  { %v5688_v28 = vsub.f32 %v1273_v55, %v1290_v27 }
 0xa5f   :  { %v1294_v29 = vmul.f32 %v5688_v28, %v5688_v28 }
 0xa61   :  { %v1298_v30 = vsel %vm237_vm1, %v1294_v29, 0.0 }
 0xa62   :  { %1299 = vadd.xlane.f32.xlu1 %v1298_v30 }
 0xacd   :  { %v1297_v37 = vpop.xlane.xlu0 %1296 }
 0xace   :  { %v1301_v38 = vmul.f32 %v1297_v37, %v5683_v14  ;;  %v1541_v37 = vld [vmem:[%s6506_s23 + $0x38] sm:$0xff] }
 0xacf   :  { %1550 = vmatpush.msrb.mxu0 %v1541_v37 }
 0xad0   :  { %v1303_v39 = vadd.f32 1e-05, %v1301_v38  ;;  %v4465_v38 = vld [vmem:[%s6506_s23 + $0xb8] sm:$0xff] }
 0xad1   :  { %1604 = vmatpush.msrb.mxu2 %v4465_v38  ;;  %1551 = vmatpush.msrb.mxu0 %v1540_v40  ;;  %v4503_v38 = vld [vmem:[%s6506_s23 + $0x118] sm:$0xff]  ;;  %v4500_v40 = vld [vmem:[%s6506_s23 + $0x100] sm:$0xff] }
 0xad2   :  { %5028 = vrsqrt.f32 %v1303_v39  ;;  %vm1311_vm11 = vweird.f32 %v1303_v39 }
 0xad3   :  { %1605 = vmatpush.msrb.mxu2 %v4464_v41 }
 0xad5   :  { %v1300_v43 = vpop.xlane.xlu1 %1299 }
 0xad6   :  { %v1302_v44 = vmul.f32 %v1300_v43, %v5683_v14  ;;  %v1539_v43 = vld [vmem:[%s6506_s23 + $0x28] sm:$0xff] }
 0xad7   :  { %1552 = vmatpush.msrb.mxu0 %v1539_v43 }
 0xad8   :  { %v5029_v46 = vpop.eup %5028  ;;  %v1304_v47 = vadd.f32 1e-05, %v1302_v44  ;;  %v4463_v44 = vld [vmem:[%s6506_s23 + $0xa8] sm:$0xff] }
 0xad9   :  { %v1306_v49 = vmul.f32 %v5029_v46, %v1303_v39  ;;  %vm1312_vm10 = vweird.f32 %v5029_v46  ;;  %v1491_v39 = vld [vmem:[%s6505_s22 + $0x30] sm:$0xff]  ;;  %1606 = vmatpush.msrb.mxu2 %v4463_v44  ;;  %v1565_v44 = vld [vmem:[%s6509_s1] sm:$0xff] }
 0xada   :  { %5030 = vrsqrt.f32 %v1304_v47  ;;  %vm1313_vm12 = vmor %vm1311_vm11, %vm1312_vm10  ;;  %vm1321_vm14 = vweird.f32 %v1304_v47  ;;  %1511 = vmatpush.msra.mxu3 %v1491_v39  ;;  %v4502_v39 = vld [vmem:[%s6506_s23 + $0x110] sm:$0xff] }
 0xadb   :  { %v1307_v50 = vmul.f32 %v5029_v46, %v1306_v49  ;;  %v1537_v49 = vld [vmem:[%s6506_s23 + $0x18] sm:$0xff] }
 0xadc   :  { %1512 = vmatpush.msra.mxu3 %v1490_v42 }
 0xadd   :  { %v1308_v51 = vmul.f32 0.5, %v1307_v50  ;;  %v4461_v50 = vld [vmem:[%s6506_s23 + $0x98] sm:$0xff] }
 0xade   :  { %1513 = vmatpush.msra.mxu3 %v1489_v45  ;;  %v4493_v45 = vld [vmem:[%s6506_s23 + $0xf8] sm:$0xff] }
 0xadf   :  { %v1309_v53 = vsub.f32 1.5, %v1308_v51  ;;  %v1487_v51 = vld [vmem:[%s6505_s22 + $0x10] sm:$0xff] }
 0xae0   :  { %v5031_v58 = vpop.eup %5030  ;;  %1514 = vmatpush.msra.mxu3 %v1488_v48  ;;  %v4491_v48 = vld [vmem:[%s6506_s23 + $0xe8] sm:$0xff] }
 0xae1   :  { %v1310_v59 = vmul.f32 %v5029_v46, %v1309_v53  ;;  %v1316_v61 = vmul.f32 %v5031_v58, %v1304_v47  ;;  %vm1322_vm13 = vweird.f32 %v5031_v58  ;;  %v4462_v47 = vld [vmem:[%s6506_s23 + $0xa0] sm:$0xff]  ;;  %v1536_v53 = vld [vmem:[%s6506_s23 + $0x10] sm:$0xff] }
 0xae2   :  { %vm1323_vm15 = vmor %vm1321_vm14, %vm1322_vm13  ;;  %1607 = vmatpush.msrb.mxu2 %v4462_v47  ;;  %1515 = vmatpush.msra.mxu3 %v1487_v51  ;;  %v4489_v51 = vld [vmem:[%s6506_s23 + $0xd8] sm:$0xff] }
 0xae3   :  { %v1314_v63 = vsel %vm1313_vm12, %v5029_v46, %v1310_v59  ;;  %v1317_v0 = vmul.f32 %v5031_v58, %v1316_v61  ;;  %v1538_v46 = vld [vmem:[%s6506_s23 + $0x20] sm:$0xff]  ;;  %v1486_v59 = vld [vmem:[%s6505_s22 + $0x8] sm:$0xff] }
 0xae4   :  { %v1325_v1 = vmul.f32 %v1314_v63, %v1291_v54  ;;  %1553 = vmatpush.msrb.mxu0 %v1538_v46  ;;  %1608 = vmatpush.msrb.mxu2 %v4461_v50  ;;  %v1535_v61 = vld [vmem:[%s6506_s23 + $0x8] sm:$0xff]  ;;  %v1485_v63 = vld [vmem:[%s6505_s22] sm:$0xff]  ;;  %v4492_v46 = vld [vmem:[%s6506_s23 + $0xf0] sm:$0xff] }
 0xae5   :  { %v1318_v3 = vmul.f32 0.5, %v1317_v0  ;;  %1516 = vmatpush.msra.mxu3 %v1486_v59  ;;  %v1534_v0 = vld [vmem:[%s6506_s23] sm:$0xff]  ;;  %v1566_v50 = vld [vmem:[%s6509_s1 + $0x8] sm:$0xff] }
 0xae6   :  { %v1330_v4 = vmul.f32 %v4946_v62, %v1325_v1  ;;  %1554 = vmatpush.msrb.mxu0 %v1537_v49  ;;  %v4458_v1 = vld [vmem:[%s6506_s23 + $0x80] sm:$0xff]  ;;  %v4487_v59 = vld [vmem:[%s6506_s23 + $0xc8] sm:$0xff] }
 0xae7   :  { %v1319_v5 = vsub.f32 1.5, %v1318_v3  ;;  %1517 = vmatpush.msra.mxu3 %v1485_v63  ;;  %v4490_v49 = vld [vmem:[%s6506_s23 + $0xe0] sm:$0xff]  ;;  %v4482_v63 = vld [vmem:[%s6509_s1 + $0x10] sm:$0xff] }
 0xae8   :  { %v1335_v6 = vadd.f32 %v4947_v2, %v1330_v4  ;;  %1555 = vmatpush.msrb.mxu0 %v1536_v53  ;;  %v4478_v4 = vld [vmem:[%s6506_s23 + $0x70] sm:$0xff] }
 0xae9   :  { %v1320_v7 = vmul.f32 %v5031_v58, %v1319_v5  ;;  %v4488_v53 = vld [vmem:[%s6506_s23 + $0xd0] sm:$0xff] }
 0xaea   :  { %4452 = vmatmul.msk.f32.vlgmr.msra.gmra.mxu1 %vm237_vm1, %v1335_v6  ;;  %1556 = vmatpush.msrb.mxu0 %v1535_v61  ;;  %v4486_v61 = vld [vmem:[%s6506_s23 + $0xc0] sm:$0xff] }
 0xaeb   :  { %v1324_v8 = vsel %vm1323_vm15, %v5031_v58, %v1320_v7  ;;  %v4460_v58 = vld [vmem:[%s6506_s23 + $0x90] sm:$0xff] }
 0xaec   :  { %v1326_v9 = vmul.f32 %v1324_v8, %v5688_v28  ;;  %1609 = vmatpush.msrb.mxu2 %v4460_v58  ;;  %1557 = vmatpush.msrb.mxu0 %v1534_v0  ;;  %v4476_v8 = vld [vmem:[%s6506_s23 + $0x60] sm:$0xff] }
 0xaee   :  { %v1331_v10 = vmul.f32 %v4946_v62, %v1326_v9  ;;  %v4459_v62 = vld [vmem:[%s6506_s23 + $0x88] sm:$0xff]  ;;  %v4475_v9 = vld [vmem:[%s6506_s23 + $0x58] sm:$0xff] }
 0xaef   :  { %1610 = vmatpush.msrb.mxu2 %v4459_v62 }
 0xaf0   :  { %v1336_v11 = vadd.f32 %v4947_v2, %v1331_v10  ;;  %v4479_v2 = vld [vmem:[%s6506_s23 + $0x78] sm:$0xff]  ;;  %v4474_v10 = vld [vmem:[%s6506_s23 + $0x50] sm:$0xff] }
 0xaf1   :  { %1611 = vmatpush.msrb.mxu2 %v4458_v1  ;;  %1636 = vmatpush.msrb.mxu3 %v4479_v2  ;;  %v4483_v1 = vld [vmem:[%s6509_s1 + $0x18] sm:$0xff] }
 0xaf2   :  { %4453 = vmatmul.msk.f32.gmra.mxu1 %vm237_vm1, %v1336_v11 }
 0xaf3   :  { %1637 = vmatpush.msrb.mxu3 %v4478_v4  ;;  %v4510_v4 = vld [vmem:[%s6509_s1 + $0x40] sm:$0xff] }
 0xb67   :  { %v1372_v55 = vpop.f32.mrf.mxu1 }
 0xb68   :  { %v1373_v57 = vadd.f32 %v4948_v17, %v1372_v55 }
 0xb6a   :  { %v1378_v13 = vmax.f32 %v1373_v57, 0.0 }
 0xb6c   :  { %4454 = vmatmul.msk.f32.vlgmr.msra.gmra.mxu2 %vm237_vm1, %v1378_v13 }
 0xb6f   :  { %v1375_v18 = vpop.f32.mrf.mxu1 }
 0xb70   :  { %v1376_v19 = vadd.f32 %v4948_v17, %v1375_v18 }
 0xb72   :  { %v1379_v56 = vmax.f32 %v1376_v19, 0.0 }
 0xb74   :  { %4455 = vmatmul.msk.f32.gmra.mxu2 %vm237_vm1, %v1379_v56 }
 0xbef   :  { %v1415_v52 = vpop.f32.mrf.mxu2 }
 0xbf0   :  { %v1416_v21 = vadd.f32 %v4949_v60, %v1415_v52 }
 0xbf2   :  { %v1421_v22 = vadd.f32 %v1416_v21, %v1335_v6  ;;  %v4477_v6 = vld [vmem:[%s6506_s23 + $0x68] sm:$0xff]  ;;  %v4950_v21 = vld [vmem:[%s6507_s26] ss:$0 sm:$0xff] }
 0xbf3   :  { %1638 = vmatpush.msrb.mxu3 %v4477_v6  ;;  %v4511_v6 = vld [vmem:[%s6509_s1 + $0x48] sm:$0xff] }
 0xbf4   :  { %v1425_v54 = vsel %vm237_vm1, %v1421_v22, 0.0 }
 0xbf5   :  { %1426 = vadd.xlane.f32.xlu2 %v1425_v54  ;;  %1639 = vmatpush.msrb.mxu3 %v4476_v8 }
 0xbf7   :  { %v1418_v23 = vpop.f32.mrf.mxu2  ;;  %1640 = vmatpush.msrb.mxu3 %v4475_v9  ;;  %v4496_v9 = vld [vmem:[%s6509_s1 + $0x30] sm:$0xff] }
 0xbf8   :  { %v1419_v24 = vadd.f32 %v4949_v60, %v1418_v23  ;;  %v4951_v23 = vld [vmem:[%s6508_s28] ss:$0 sm:$0xff] }
 0xbf9   :  { %1641 = vmatpush.msrb.mxu3 %v4474_v10  ;;  %v4497_v10 = vld [vmem:[%s6509_s1 + $0x38] sm:$0xff] }
 0xbfa   :  { %v1422_v26 = vadd.f32 %v1419_v24, %v1336_v11 }
 0xbfb   :  { %1642 = vmatpush.msrb.mxu3 %v4473_v12 }
 0xbfc   :  { %v1428_v27 = vsel %vm237_vm1, %v1422_v26, 0.0 }
 0xbfd   :  { %1429 = vadd.xlane.f32.xlu0 %v1428_v27  ;;  %1643 = vmatpush.msrb.mxu3 %v4472_v16  ;;  %v4517_v16 = vld [vmem:[%s5307_s4 + $0x38] sm:$0xff] }
 0xc68   :  { %v1427_v28 = vpop.xlane.xlu2 %1426 }
 0xc69   :  { %v1431_v29 = vmul.f32 %v1427_v28, %v5683_v14 }
 0xc6b   :  { %v5723_v30 = vsub.f32 %v1421_v22, %v1431_v29 }
 0xc6d   :  { %v1435_v31 = vmul.f32 %v5723_v30, %v5723_v30 }
 0xc6f   :  { %v1437_v20 = vsel %vm237_vm1, %v1435_v31, 0.0  ;;  %v4507_v31 = vld [vmem:[%s6506_s23 + $0x138] sm:$0xff] }
 0xc70   :  { %v1430_v32 = vpop.xlane.xlu0 %1429  ;;  %1438 = vadd.xlane.f32.xlu1 %v1437_v20 }
 0xc71   :  { %v1432_v33 = vmul.f32 %v1430_v32, %v5683_v14  ;;  %v4506_v32 = vld [vmem:[%s6506_s23 + $0x130] sm:$0xff] }
 0xc73   :  { %v5729_v25 = vsub.f32 %v1422_v26, %v1432_v33 }
 0xc75   :  { %v1436_v34 = vmul.f32 %v5729_v25, %v5729_v25 }
 0xc77   :  { %v1440_v35 = vsel %vm237_vm1, %v1436_v34, 0.0  ;;  %v4505_v34 = vld [vmem:[%s6506_s23 + $0x128] sm:$0xff] }
 0xc78   :  { %1441 = vadd.xlane.f32.xlu2 %v1440_v35 }
 0xce3   :  { %v1439_v3 = vpop.xlane.xlu1 %1438 }
 0xce4   :  { %v1443_v5 = vmul.f32 %v1439_v3, %v5683_v14 }
 0xce6   :  { %v1445_v7 = vadd.f32 1e-05, %v1443_v5 }
 0xce8   :  { %5032 = vrsqrt.f32 %v1445_v7  ;;  %vm1453_vm4 = vweird.f32 %v1445_v7 }
 0xceb   :  { %v1442_v11 = vpop.xlane.xlu2 %1441 }
 0xcec   :  { %v1444_v15 = vmul.f32 %v1442_v11, %v5683_v14  ;;  %v1484_v11 = vld [vmem:[%s6510_s2] sm:$0x1] }
 0xced   :  { %v1829_v12 = vadd.f32 1e-05, %v1484_v11 }
 0xcee   :  { %v5033_v17 = vpop.eup %5032  ;;  %v1446_v55 = vadd.f32 1e-05, %v1444_v15 }
 0xcef   :  { %v1448_v57 = vmul.f32 %v5033_v17, %v1445_v7  ;;  %vm1454_vm3 = vweird.f32 %v5033_v17  ;;  %vm1836_vm9 = vweird.f32 %v1829_v12 }
 0xcf0   :  { %5034 = vrsqrt.f32 %v1446_v55  ;;  %vm1455_vm5 = vmor %vm1453_vm4, %vm1454_vm3  ;;  %vm1463_vm7 = vweird.f32 %v1446_v55 }
 0xcf1   :  { %v1449_v13 = vmul.f32 %v5033_v17, %v1448_v57  ;;  %5036 = vrsqrt.f32 %v1829_v12  ;;  %v4516_v57 = vld [vmem:[%s5307_s4 + $0x30] sm:$0xff] }
 0xcf3   :  { %v1450_v18 = vmul.f32 0.5, %v1449_v13 }
 0xcf5   :  { %v1451_v19 = vsub.f32 1.5, %v1450_v18  ;;  %v4515_v18 = vld [vmem:[%s5307_s4 + $0x28] sm:$0xff] }
 0xcf6   :  { %v5035_v56 = vpop.eup %5034 }
 0xcf7   :  { %v1452_v60 = vmul.f32 %v5033_v17, %v1451_v19  ;;  %v1458_v52 = vmul.f32 %v5035_v56, %v1446_v55  ;;  %vm1464_vm6 = vweird.f32 %v5035_v56  ;;  %v4514_v19 = vld [vmem:[%s5307_s4 + $0x20] sm:$0xff]  ;;  %s6511_s4 = sld [smem:[#allocation16_spill]] }
 0xcf8   :  { %vm1465_vm8 = vmor %vm1463_vm7, %vm1464_vm6 }
 0xcf9   :  { %v1456_v22 = vsel %vm1455_vm5, %v5033_v17, %v1452_v60  ;;  %v1459_v54 = vmul.f32 %v5035_v56, %v1458_v52  ;;  %v5824_v17 = vpop.eup %5036 }
 0xcfa   :  { %v1467_v24 = vmul.f32 %v1456_v22, %v5723_v30  ;;  %v1831_v13 = vmul.f32 %v5824_v17, %v1829_v12  ;;  %v4528_v22 = vld [vmem:[%s5402_s6 + $0x138] sm:$0xff]  ;;  %vm1837_vm10 = vweird.f32 %v5824_v17 }
 0xcfb   :  { %v1460_v26 = vmul.f32 0.5, %v1459_v54  ;;  %v4539_v54 = vld [vmem:[%s5392_s20 + $0x138] sm:$0xff]  ;;  %vm5849_vm11 = vmor %vm1836_vm9, %vm1837_vm10 }
 0xcfc   :  { %v1472_v27 = vmul.f32 %v4950_v21, %v1467_v24 }
 0xcfd   :  { %v1461_v28 = vsub.f32 1.5, %v1460_v26  ;;  %v4527_v26 = vld [vmem:[%s5402_s6 + $0x130] sm:$0xff] }
 0xcfe   :  { %v1477_v29 = vadd.f32 %v4951_v23, %v1472_v27  ;;  %v4538_v27 = vld [vmem:[%s5392_s20 + $0x130] sm:$0xff] }
 0xcff   :  { %v1462_v20 = vmul.f32 %v5035_v56, %v1461_v28  ;;  %v4549_v28 = vld [vmem:[%s5407_s17 + $0x130] sm:$0xff] }
 0xd00   :  { %4456 = vmatmul.msk.f32.vlgmr.msra.gmra.mxu3 %vm237_vm1, %v1477_v29  ;;  %4466 = vmatmul.msk.f32.vlgmr.msrb.gmra.mxu0 %vm237_vm1, %v1477_v29 }
 0xd01   :  { %v1466_v33 = vsel %vm1465_vm8, %v5035_v56, %v1462_v20  ;;  %4470 = vmatmul.msk.f32.vlgmr.msrb.gmra.mxu2 %vm237_vm1, %v1477_v29  ;;  %1768 = vmatpush.msra.mxu3 %v4507_v31  ;;  %v1832_v56 = vmul.f32 %v5824_v17, %v1831_v13  ;;  %v4526_v31 = vld [vmem:[%s5402_s6 + $0x128] sm:$0xff] }
 0xd02   :  { %v1468_v30 = vmul.f32 %v1466_v33, %v5729_v25  ;;  %v4501_v25 = vld [vmem:[%s6506_s23 + $0x108] sm:$0xff] }
 0xd03   :  { %1769 = vmatpush.msra.mxu3 %v4506_v32  ;;  %v4537_v20 = vld [vmem:[%s5392_s20 + $0x128] sm:$0xff] }
 0xd04   :  { %v1473_v35 = vmul.f32 %v4950_v21, %v1468_v30  ;;  %v1833_v21 = vmul.f32 0.5, %v1832_v56  ;;  %v4548_v33 = vld [vmem:[%s5407_s17 + $0x128] sm:$0xff] }
 0xd05   :  { %1770 = vmatpush.msra.mxu3 %v4505_v34  ;;  %v4525_v34 = vld [vmem:[%s5402_s6 + $0x120] sm:$0xff]  ;;  %v4544_v56 = vld [vmem:[%s5407_s17 + $0x108] sm:$0xff] }
 0xd06   :  { %v1478_v37 = vadd.f32 %v4951_v23, %v1473_v35  ;;  %v4550_v23 = vld [vmem:[%s5407_s17 + $0x138] sm:$0xff]  ;;  %v1834_v24 = vsub.f32 1.5, %v1833_v21  ;;  %v4536_v35 = vld [vmem:[%s5392_s20 + $0x120] sm:$0xff] }
 0xd07   :  { %1771 = vmatpush.msra.mxu3 %v4504_v36  ;;  %v4543_v21 = vld [vmem:[%s5407_s17 + $0x100] sm:$0xff] }
 0xd08   :  { %4457 = vmatmul.msk.f32.gmra.mxu3 %vm237_vm1, %v1478_v37  ;;  %4467 = vmatmul.msk.f32.gmra.mxu0 %vm237_vm1, %v1478_v37 }
 0xd09   :  { %4471 = vmatmul.msk.f32.gmra.mxu2 %vm237_vm1, %v1478_v37  ;;  %1772 = vmatpush.msra.mxu3 %v4503_v38  ;;  %v1835_v38 = vmul.f32 %v5824_v17, %v1834_v24  ;;  %v4567_v24 = vld [vmem:[%s5402_s6 + $0x168] sm:$0xff] }
 0xd0b   :  { %1773 = vmatpush.msra.mxu3 %v4502_v39  ;;  %v4547_v39 = vld [vmem:[%s5407_s17 + $0x120] sm:$0xff] }
 0xd0d   :  { %1774 = vmatpush.msra.mxu3 %v4501_v25 }
 0xd0f   :  { %1775 = vmatpush.msra.mxu3 %v4500_v40 }
 0xd10   :  { %4480 = vmatmul.msk.f32.vlgmr.msrb.gmra.mxu3 %vm237_vm1, %v1477_v29 }
 0xd11   :  { %1961 = vmatpush.msrb.mxu3 %v4539_v54  ;;  %v4568_v54 = vld [vmem:[%s5402_s6 + $0x170] sm:$0xff] }
 0xd13   :  { %1962 = vmatpush.msrb.mxu3 %v4538_v27  ;;  %v4566_v27 = vld [vmem:[%s5402_s6 + $0x160] sm:$0xff] }
 0xd15   :  { %1963 = vmatpush.msrb.mxu3 %v4537_v20  ;;  %v4564_v20 = vld [vmem:[%s5402_s6 + $0x150] sm:$0xff] }
 0xd17   :  { %1964 = vmatpush.msrb.mxu3 %v4536_v35  ;;  %v4573_v35 = vld [vmem:[%s5392_s20 + $0x140] sm:$0xff] }
 0xd18   :  { %4481 = vmatmul.msk.f32.gmra.mxu3 %vm237_vm1, %v1478_v37 }
 0xd20   :  { %4508 = vmatmul.msk.f32.vlgmr.msra.gmra.mxu3 %vm237_vm1, %v1477_v29 }
 0xd28   :  { %4509 = vmatmul.msk.f32.gmra.mxu3 %vm237_vm1, %v1478_v37 }
 0xd7d   :  { %v1559_v41 = vpop.f32.mrf.mxu0 }
 0xd83   :  { %v5790_v42 = vpop.f32.mrf.mxu3 }
 0xd84   :  { %v1613_v55 = vpop.f32.mrf.mxu2 }
 0xd85   :  { %v1562_v43 = vpop.f32.mrf.mxu0 }
 0xd86   :  { %1587 = vmatpush.msrb.mxu1 %v1562_v43  ;;  %v4535_v43 = vld [vmem:[%s5392_s20 + $0x118] sm:$0xff] }
 0xd87   :  { %1965 = vmatpush.msrb.mxu3 %v4535_v43  ;;  %v4958_v43 = vld [vmem:[%s5257_s24 + $0x4] ss:$0 sm:$0xff] }
 0xd88   :  { %1588 = vmatpush.msrb.mxu1 %v1559_v41  ;;  %v4524_v41 = vld [vmem:[%s5402_s6 + $0x118] sm:$0xff] }
 0xd89   :  { %4468 = vmatmul.msk.f32.vlgmr.msrb.gmra.mxu1 %vm337_vm2, %v1565_v44  ;;  %v4546_v44 = vld [vmem:[%s5407_s17 + $0x118] sm:$0xff] }
 0xd8a   :  { %1702 = vmatpush.msra.mxu1 %v4493_v45 }
 0xd8b   :  { %v5796_v47 = vpop.f32.mrf.mxu3 }
 0xd8c   :  { %1703 = vmatpush.msra.mxu1 %v4492_v46  ;;  %v1616_v52 = vpop.f32.mrf.mxu2  ;;  %v4523_v46 = vld [vmem:[%s5402_s6 + $0x110] sm:$0xff] }
 0xd8e   :  { %1704 = vmatpush.msra.mxu1 %v4491_v48  ;;  %v4534_v48 = vld [vmem:[%s5392_s20 + $0x110] sm:$0xff] }
 0xd8f   :  { %1966 = vmatpush.msrb.mxu3 %v4534_v48  ;;  %v4960_v48 = vld [vmem:[%s5222_s21 + $0x4] ss:$0 sm:$0xff] }
 0xd90   :  { %1705 = vmatpush.msra.mxu1 %v4490_v49  ;;  %v1839_v49 = vsel %vm5849_vm11, %v5824_v17, %v1835_v38 }
 0xd91   :  { %4469 = vmatmul.msk.f32.gmra.mxu1 %vm337_vm2, %v1566_v50  ;;  %v4545_v50 = vld [vmem:[%s5407_s17 + $0x110] sm:$0xff] }
 0xd92   :  { %1706 = vmatpush.msra.mxu1 %v4489_v51 }
 0xd93   :  { %v1645_v58 = vpop.f32.mrf.mxu3 }
 0xd94   :  { %1707 = vmatpush.msra.mxu1 %v4488_v53 }
 0xd96   :  { %1708 = vmatpush.msra.mxu1 %v4487_v59 }
 0xd98   :  { %1709 = vmatpush.msra.mxu1 %v4486_v61 }
 0xd99   :  { %4494 = vmatmul.msk.f32.vlgmr.msra.gmra.mxu1 %vm237_vm1, %v1477_v29 }
 0xd9a   :  { %1885 = vmatpush.msrb.mxu1 %v4517_v16 }
 0xd9b   :  { %v1648_v62 = vpop.f32.mrf.mxu3 }
 0xd9c   :  { %1674 = vmatpush.msra.mxu0 %v1648_v62  ;;  %1886 = vmatpush.msrb.mxu1 %v4516_v57  ;;  %v1841_v62 = vperm.slane %v1839_v49, 0 }
 0xd9e   :  { %1675 = vmatpush.msra.mxu0 %v1645_v58  ;;  %1887 = vmatpush.msrb.mxu1 %v4515_v18  ;;  %v4954_v58 = vld [vmem:[%s6514_s7] ss:$0 sm:$0xff] }
 0xd9f   :  { %4484 = vmatmul.msk.f32.vlgmr.msra.gmra.mxu0 %vm337_vm2, %v4482_v63 }
 0xda0   :  { %1888 = vmatpush.msrb.mxu1 %v4514_v19  ;;  %v4533_v19 = vld [vmem:[%s5392_s20 + $0x108] sm:$0xff] }
 0xda1   :  { %4495 = vmatmul.msk.f32.gmra.mxu1 %vm237_vm1, %v1478_v37  ;;  %v4953_v37 = vld [vmem:[%s6511_s4] ss:$0 sm:$0xff]  ;;  %1967 = vmatpush.msrb.mxu3 %v4533_v19 }
 0xda3   :  { %v1777_v0 = vpop.f32.mrf.mxu3 }
 0xda7   :  { %4485 = vmatmul.msk.f32.gmra.mxu0 %vm337_vm2, %v4483_v1 }
 0xdab   :  { %v1780_v2 = vpop.f32.mrf.mxu3 }
 0xdac   :  { %1806 = vmatpush.msrb.mxu0 %v1780_v2  ;;  %v4955_v2 = vld [vmem:[%s6515_s10] ss:$0 sm:$0xff] }
 0xdae   :  { %1807 = vmatpush.msrb.mxu0 %v1777_v0 }
 0xdaf   :  { %4512 = vmatmul.msk.f32.vlgmr.msrb.gmra.mxu0 %vm337_vm2, %v4510_v4  ;;  %v4952_v4 = vld [vmem:[%s6516_s11] ss:$0 sm:$0xff] }
 0xdb0   :  { %1998 = vmatpush.msra.mxu0 %v4550_v23  ;;  %v1523_v57 = vadd.f32 %v4952_v4, %v5796_v47  ;;  %v4569_v47 = vld [vmem:[%s5402_s6 + $0x178] sm:$0xff]  ;;  %v4579_v23 = vld [vmem:[%s5392_s20 + $0x170] sm:$0xff] }
 0xdb2   :  { %1999 = vmatpush.msra.mxu0 %v4549_v28  ;;  %v4577_v28 = vld [vmem:[%s5392_s20 + $0x160] sm:$0xff] }
 0xdb4   :  { %2000 = vmatpush.msra.mxu0 %v4548_v33  ;;  %v4563_v33 = vld [vmem:[%s5402_s6 + $0x148] sm:$0xff] }
 0xdb6   :  { %2001 = vmatpush.msra.mxu0 %v4547_v39 }
 0xdb7   :  { %4513 = vmatmul.msk.f32.gmra.mxu0 %vm337_vm2, %v4511_v6 }
 0xdb8   :  { %2002 = vmatpush.msra.mxu0 %v4546_v44 }
 0xdba   :  { %2003 = vmatpush.msra.mxu0 %v4545_v50 }
 0xdbc   :  { %2004 = vmatpush.msra.mxu0 %v4544_v56 }
 0xdbe   :  { %2005 = vmatpush.msra.mxu0 %v4543_v21 }
 0xe06   :  { %v1590_v3 = vpop.f32.mrf.mxu1 }
 0xe07   :  { %v1614_v29 = vadd.f32 %v1613_v55, %v1590_v3 }
 0xe0e   :  { %v5814_v5 = vpop.f32.mrf.mxu1 }
 0xe0f   :  { %v1617_v51 = vadd.f32 %v1616_v52, %v5814_v5  ;;  %v4532_v52 = vld [vmem:[%s5392_s20 + $0x100] sm:$0xff] }
 0xe10   :  { %1968 = vmatpush.msrb.mxu3 %v4532_v52 }
 0xe12   :  { %2154 = vmatpush.msra.mxu3 %v4569_v47 }
 0xe14   :  { %2155 = vmatpush.msra.mxu3 %v4568_v54 }
 0xe16   :  { %v1711_v7 = vpop.f32.mrf.mxu1  ;;  %2156 = vmatpush.msra.mxu3 %v4567_v24 }
 0xe18   :  { %2157 = vmatpush.msra.mxu3 %v4566_v27 }
 0xe1c   :  { %v1677_v15 = vpop.f32.mrf.mxu0 }
 0xe1d   :  { %v1683_v30 = vadd.f32 %v1677_v15, %v1614_v29  ;;  %v4565_v29 = vld [vmem:[%s5402_s6 + $0x158] sm:$0xff] }
 0xe1e   :  { %v1714_v8 = vpop.f32.mrf.mxu1  ;;  %2158 = vmatpush.msra.mxu3 %v4565_v29 }
 0xe1f   :  { %1740 = vmatpush.msra.mxu2 %v1714_v8 }
 0xe20   :  { %2159 = vmatpush.msra.mxu3 %v4564_v20 }
 0xe21   :  { %1741 = vmatpush.msra.mxu2 %v1711_v7  ;;  %v4956_v7 = vld [vmem:[%s6517_s15] ss:$0 sm:$0xff] }
 0xe22   :  { %4498 = vmatmul.msk.f32.vlgmr.msra.gmra.mxu2 %vm337_vm2, %v4496_v9  ;;  %2160 = vmatpush.msra.mxu3 %v4563_v33 }
 0xe23   :  { %1924 = vmatpush.msrb.mxu2 %v4528_v22  ;;  %v4580_v22 = vld [vmem:[%s5392_s20 + $0x178] sm:$0xff] }
 0xe24   :  { %v1680_v60 = vpop.f32.mrf.mxu0  ;;  %2191 = vmatpush.msrb.mxu0 %v4580_v22 }
 0xe25   :  { %1925 = vmatpush.msrb.mxu2 %v4527_v26  ;;  %v1684_v59 = vadd.f32 %v1680_v60, %v1617_v51  ;;  %v4521_v60 = vld [vmem:[%s5402_s6 + $0x100] sm:$0xff]  ;;  %v4578_v26 = vld [vmem:[%s5392_s20 + $0x168] sm:$0xff] }
 0xe26   :  { %2192 = vmatpush.msrb.mxu0 %v4579_v23 }
 0xe27   :  { %1926 = vmatpush.msrb.mxu2 %v4526_v31  ;;  %v4576_v31 = vld [vmem:[%s5392_s20 + $0x158] sm:$0xff] }
 0xe28   :  { %2193 = vmatpush.msrb.mxu0 %v4578_v26 }
 0xe29   :  { %1927 = vmatpush.msrb.mxu2 %v4525_v34  ;;  %v4562_v34 = vld [vmem:[%s5402_s6 + $0x140] sm:$0xff] }
 0xe2a   :  { %4499 = vmatmul.msk.f32.gmra.mxu2 %vm337_vm2, %v4497_v10  ;;  %v1520_v10 = vadd.f32 %v4952_v4, %v5790_v42  ;;  %v4522_v42 = vld [vmem:[%s5402_s6 + $0x108] sm:$0xff]  ;;  %2194 = vmatpush.msrb.mxu0 %v4577_v28  ;;  %v4588_v4 = vld [vmem:[%s5407_s17 + $0x160] sm:$0xff] }
 0xe2b   :  { %1928 = vmatpush.msrb.mxu2 %v4524_v41  ;;  %2161 = vmatpush.msra.mxu3 %v4562_v34 }
 0xe2c   :  { %v1809_v32 = vpop.f32.mrf.mxu0  ;;  %2195 = vmatpush.msrb.mxu0 %v4576_v31 }
 0xe2d   :  { %1929 = vmatpush.msrb.mxu2 %v4523_v46 }
 0xe2f   :  { %1930 = vmatpush.msrb.mxu2 %v4522_v42 }
 0xe31   :  { %1931 = vmatpush.msrb.mxu2 %v4521_v60  ;;  %v4963_v60 = vld [vmem:[%s5257_s24 + $0x5] ss:$0 sm:$0xff] }
 0xe34   :  { %v1812_v0 = vpop.f32.mrf.mxu0 }
 0xea5   :  { %v1743_v36 = vpop.f32.mrf.mxu2 }
 0xea6   :  { %v1749_v25 = vadd.f32 %v1743_v36, %v1683_v30  ;;  %v4574_v30 = vld [vmem:[%s5392_s20 + $0x148] sm:$0xff]  ;;  %v4957_v36 = vld [vmem:[%s5302_s27 + $0x1] ss:$0 sm:$0xff] }
 0xea8   :  { %v1815_v45 = vadd.f32 %v1809_v32, %v1749_v25  ;;  %v4575_v32 = vld [vmem:[%s5392_s20 + $0x150] sm:$0xff] }
 0xea9   :  { %2196 = vmatpush.msrb.mxu0 %v4575_v32 }
 0xeaa   :  { %v1820_v53 = vadd.f32 %v4953_v37, %v1815_v45 }
 0xeab   :  { %2197 = vmatpush.msrb.mxu0 %v4574_v30 }
 0xeac   :  { %v1822_v61 = vmax.f32 %v1820_v53, 0.0 }
 0xead   :  { %v1746_v63 = vpop.f32.mrf.mxu2  ;;  %2198 = vmatpush.msrb.mxu0 %v4573_v35 }
 0xeae   :  { %v1827_v1 = vsub.f32 %v1822_v61, %v4954_v58  ;;  %v1750_v3 = vadd.f32 %v1746_v63, %v1684_v59  ;;  %v4591_v61 = vld [vmem:[%s5407_s17 + $0x178] sm:$0xff]  ;;  %v4590_v63 = vld [vmem:[%s5407_s17 + $0x170] sm:$0xff] }
 0xeb0   :  { %v1843_v6 = vmul.f32 %v1841_v62, %v1827_v1  ;;  %v1816_v5 = vadd.f32 %v1812_v0, %v1750_v3  ;;  %v4961_v0 = vld [vmem:[%s5222_s21 + $0x5] ss:$0 sm:$0xff]  ;;  %v4589_v1 = vld [vmem:[%s5407_s17 + $0x168] sm:$0xff] }
 0xeb2   :  { %v1848_v8 = vmul.f32 %v4955_v2, %v1843_v6  ;;  %v1821_v9 = vadd.f32 %v4953_v37, %v1816_v5 }
 0xeb4   :  { %v1853_v11 = vadd.f32 %v4956_v7, %v1848_v8  ;;  %v1823_v12 = vmax.f32 %v1821_v9, 0.0  ;;  %v4586_v9 = vld [vmem:[%s5407_s17 + $0x150] sm:$0xff] }
 0xeb6   :  { %v1828_v15 = vsub.f32 %v1823_v12, %v4954_v58  ;;  %v1855_v16 = vadd.f32 %v1853_v11, %v1520_v10  ;;  %v4959_v58 = vld [vmem:[%s5252_s19 + $0x4] ss:$0 sm:$0xff]  ;;  %v4585_v10 = vld [vmem:[%s5407_s17 + $0x148] sm:$0xff] }
 0xeb7   :  { %v4584_v11 = vld [vmem:[%s5407_s17 + $0x140] sm:$0xff] }
 0xeb8   :  { %v1844_v17 = vmul.f32 %v1841_v62, %v1828_v15  ;;  %4519 = vmatmul.msk.f32.vlgmr.msrb.gmra.mxu1 %vm195_vm0, %v1855_v16  ;;  %v5941_v16 = vld [vmem:[%s5207_s9] sm:$0xff] }
 0xeba   :  { %v1849_v55 = vmul.f32 %v4955_v2, %v1844_v17 }
 0xebc   :  { %v1854_v13 = vadd.f32 %v4956_v7, %v1849_v55  ;;  %v4587_v7 = vld [vmem:[%s5407_s17 + $0x158] sm:$0xff] }
 0xebe   :  { %v1856_v18 = vadd.f32 %v1854_v13, %v1523_v57 }
 0xec0   :  { %4520 = vmatmul.msk.f32.gmra.mxu1 %vm195_vm0, %v1856_v18  ;;  %v5946_v18 = vld [vmem:[%s5207_s9 + $0x8] sm:$0xff]  ;;  %s6518_s9 = sld [smem:[#allocation21_spill]] }
 0xf35   :  { %v1890_v37 = vpop.f32.mrf.mxu1 }
 0xf36   :  { %v5894_v38 = vadd.f32 %v4957_v36, %v1890_v37 }
 0xf38   :  { %4530 = vmatmul.msk.f32.vlgmr.msrb.gmra.mxu2 %vm237_vm1, %v5894_v38  ;;  %4541 = vmatmul.msk.f32.vlgmr.msrb.gmra.mxu3 %vm237_vm1, %v5894_v38 }
 0xf39   :  { %4552 = vmatmul.msk.f32.vlgmr.msra.gmra.mxu0 %vm237_vm1, %v5894_v38 }
 0xf3d   :  { %v1893_v39 = vpop.f32.mrf.mxu1 }
 0xf3e   :  { %v5902_v25 = vadd.f32 %v4957_v36, %v1893_v39 }
 0xf40   :  { %4531 = vmatmul.msk.f32.gmra.mxu2 %vm237_vm1, %v5902_v25  ;;  %4542 = vmatmul.msk.f32.gmra.mxu3 %vm237_vm1, %v5902_v25 }
 0xf41   :  { %4553 = vmatmul.msk.f32.gmra.mxu0 %vm237_vm1, %v5902_v25 }
 0xf48   :  { %4571 = vmatmul.msk.f32.vlgmr.msra.gmra.mxu3 %vm237_vm1, %v5894_v38 }
 0xf49   :  { %4582 = vmatmul.msk.f32.vlgmr.msrb.gmra.mxu0 %vm237_vm1, %v5894_v38 }
 0xf50   :  { %4572 = vmatmul.msk.f32.gmra.mxu3 %vm237_vm1, %v5902_v25 }
 0xf51   :  { %4583 = vmatmul.msk.f32.gmra.mxu0 %vm237_vm1, %v5902_v25 }
 0xfb6   :  { %v2007_v40 = vpop.f32.mrf.mxu0 }
 0xfb7   :  { %v2008_v46 = vadd.f32 %v4958_v43, %v2007_v40 }
 0xfbb   :  { %v1970_v41 = vpop.f32.mrf.mxu3  ;;  %v1933_v51 = vpop.f32.mrf.mxu2 }
 0xfbc   :  { %v1971_v59 = vadd.f32 %v4960_v48, %v1970_v41  ;;  %v1934_v62 = vadd.f32 %v4959_v58, %v1933_v51 }
 0xfbe   :  { %v2010_v44 = vpop.f32.mrf.mxu0 }
 0xfbf   :  { %v2011_v45 = vadd.f32 %v4958_v43, %v2010_v44 }
 0xfc1   :  { %2120 = vmatpush.msra.mxu2 %v2011_v45 }
 0xfc3   :  { %2121 = vmatpush.msra.mxu2 %v2008_v46  ;;  %v1973_v49 = vpop.f32.mrf.mxu3  ;;  %v1936_v6 = vpop.f32.mrf.mxu2 }
 0xfc4   :  { %v1974_v50 = vadd.f32 %v4960_v48, %v1973_v49  ;;  %v1937_v5 = vadd.f32 %v4959_v58, %v1936_v6  ;;  %v4609_v6 = vld [vmem:[%s5402_s6 + $0x190] sm:$0xff] }
 0xfc6   :  { %v2200_v53 = vpop.f32.mrf.mxu0  ;;  %4554 = vmatpush.xpose.msk.msra.mxu1 %vm337_vm2, %v1974_v50  ;;  %v4614_v50 = vld [vmem:[%s5402_s6 + $0x1b8] sm:$0xff] }
 0xfc7   :  { %v2201_v8 = vadd.f32 %v4961_v0, %v2200_v53 }
 0xfca   :  { %4555 = vmatpush.xpose.msk.msra.mxu1 %vm337_vm2, %v1971_v59  ;;  %v4613_v59 = vld [vmem:[%s5402_s6 + $0x1b0] sm:$0xff] }
 0xfcd   :  { %4556 = vmatmul.msk.f32.vlgmr.msra.gmra.mxu1 %vm337_vm2, %v1934_v62  ;;  %v4612_v62 = vld [vmem:[%s5402_s6 + $0x1a8] sm:$0xff] }
 0xfce   :  { %2228 = vmatpush.msrb.mxu1 %v4591_v61  ;;  %v2203_v2 = vpop.f32.mrf.mxu0 }
 0xfcf   :  { %v2204_v3 = vadd.f32 %v4961_v0, %v2203_v2 }
 0xfd0   :  { %2229 = vmatpush.msrb.mxu1 %v4590_v63 }
 0xfd1   :  { %4595 = vmatpush.xpose.msk.msrb.mxu2 %vm337_vm2, %v2204_v3 }
 0xfd2   :  { %2230 = vmatpush.msrb.mxu1 %v4589_v1  ;;  %v4611_v1 = vld [vmem:[%s5402_s6 + $0x1a0] sm:$0xff] }
 0xfd4   :  { %2231 = vmatpush.msrb.mxu1 %v4588_v4  ;;  %v4610_v4 = vld [vmem:[%s5402_s6 + $0x198] sm:$0xff] }
 0xfd5   :  { %4596 = vmatpush.xpose.msk.msrb.mxu2 %vm337_vm2, %v2201_v8  ;;  %4557 = vmatmul.msk.f32.gmra.mxu1 %vm337_vm2, %v1937_v5  ;;  %v2163_v5 = vpop.f32.mrf.mxu3  ;;  %v4962_v8 = vld [vmem:[%s5252_s19 + $0x5] ss:$0 sm:$0xff] }
 0xfd6   :  { %2232 = vmatpush.msrb.mxu1 %v4587_v7  ;;  %v4561_v7 = vld [vmem:[%s5397_s8 + $0x48] sm:$0xff] }
 0xfd8   :  { %2233 = vmatpush.msrb.mxu1 %v4586_v9  ;;  %v4608_v9 = vld [vmem:[%s5402_s6 + $0x188] sm:$0xff] }
 0xfda   :  { %2234 = vmatpush.msrb.mxu1 %v4585_v10  ;;  %v4607_v10 = vld [vmem:[%s5402_s6 + $0x180] sm:$0xff] }
 0xfdc   :  { %2235 = vmatpush.msrb.mxu1 %v4584_v11  ;;  %v2164_v11 = vadd.f32 %v4962_v8, %v2163_v5 }
 0xfdd   :  { %4593 = vmatmul.msk.f32.vlgmr.msrb.gmra.mxu1 %vm237_vm1, %v5894_v38 }
 0xfde   :  { %2411 = vmatpush.msra.mxu1 %v4561_v7 }
 0xfe5   :  { %4594 = vmatmul.msk.f32.gmra.mxu1 %vm237_vm1, %v5902_v25 }
0x104a   :  { %v2042_v12 = vpop.f32.mrf.mxu1 }
0x104b   :  { %v2048_v15 = vmul.f32 0.25, %v2042_v12  ;;  %v2166_v12 = vpop.f32.mrf.mxu3 }
0x104d   :  { %v2050_v17 = vadd.f32 %v5941_v16, %v2048_v15  ;;  %v2167_v15 = vadd.f32 %v4962_v8, %v2166_v12  ;;  %v4634_v12 = vld [vmem:[%s5407_s17 + $0x1a8] sm:$0xff] }
0x104f   :  { %v2052_v55 = vsel %vm337_vm2, %v2050_v17, -inf }
0x1050   :  { %2053 = vmax.xlane.f32.xlu0 %v2052_v55 }
0x1052   :  { %v2045_v57 = vpop.f32.mrf.mxu1 }
0x1053   :  { %v2049_v13 = vmul.f32 0.25, %v2045_v57 }
0x1055   :  { %v2051_v42 = vadd.f32 %v5946_v18, %v2049_v13 }
0x1057   :  { %v2055_v19 = vsel %vm337_vm2, %v2051_v42, -inf }
0x1058   :  { %2056 = vmax.xlane.f32.xlu1 %v2055_v19 }
0x105a   :  { %v2237_v56 = vpop.f32.mrf.mxu1 }
0x105b   :  { %v2238_v47 = vadd.f32 %v4963_v60, %v2237_v56 }
0x1062   :  { %v2240_v52 = vpop.f32.mrf.mxu1 }
0x1063   :  { %v2241_v21 = vadd.f32 %v4963_v60, %v2240_v52 }
0x1065   :  { %2350 = vmatpush.msrb.mxu3 %v2241_v21 }
0x1067   :  { %2351 = vmatpush.msrb.mxu3 %v2238_v47 }
0x10c3   :  { %v2054_v22 = vpop.xlane.xlu0 %2053 }
0x10c4   :  { %v2058_v54 = vsub.f32 %v2050_v17, %v2054_v22  ;;  %v4560_v17 = vld [vmem:[%s5397_s8 + $0x40] sm:$0xff] }
0x10c5   :  { %2412 = vmatpush.msra.mxu1 %v4560_v17  ;;  %v4632_v17 = vld [vmem:[%s5407_s17 + $0x198] sm:$0xff] }
0x10c6   :  { %v2060_v23 = vmul.f32 1.442695, %v2058_v54 }
0x10c8   :  { %5038 = vpow2.f32 %v2060_v23 }
0x10cb   :  { %v2057_v24 = vpop.xlane.xlu1 %2056 }
0x10cc   :  { %v2059_v26 = vsub.f32 %v2051_v42, %v2057_v24 }
0x10ce   :  { %v5039_v27 = vpop.eup %5038  ;;  %v2062_v28 = vmul.f32 1.442695, %v2059_v26 }
0x10cf   :  { %v2064_v29 = vsel %vm337_vm2, %v5039_v27, 0.0 }
0x10d0   :  { %5040 = vpow2.f32 %v2062_v28  ;;  %2065 = vadd.xlane.f32.xlu2 %v2064_v29 }
0x10d6   :  { %v5041_v31 = vpop.eup %5040 }
0x10d7   :  { %v2067_v20 = vsel %vm337_vm2, %v5041_v31, 0.0 }
0x10d8   :  { %2068 = vadd.xlane.f32.xlu0 %v2067_v20 }
0x1143   :  { %v2066_v32 = vpop.xlane.xlu2 %2065 }
0x1144   :  { %5042 = vrcp.f32 %v2066_v32  ;;  %v2081_v36 = vand.u32 2147483648, %v2066_v32  ;;  %v2079_v39 = vand.u32 2147483647, %v2066_v32  ;;  %vm2075_vm13 = vweird.f32 %v2066_v32 }
0x1146   :  { %v2082_v43 = vor.u32 1.1754944e-38, %v2081_v36  ;;  %vm2080_vm15 = vcmp.eq.f32.partialorder %v2079_v39, 8.507059e+37  ;;  %v4620_v36 = vld [vmem:[%s5392_s20 + $0x190] sm:$0xff] }
0x114a   :  { %v5043_v33 = vpop.eup %5042 }
0x114b   :  { %v2071_v30 = vmul.f32 %v5043_v33, %v2066_v32  ;;  %v2069_v34 = vpop.xlane.xlu0 %2068  ;;  %vm2076_vm12 = vweird.f32 %v5043_v33  ;;  %v4625_v32 = vld [vmem:[%s5392_s20 + $0x1b8] sm:$0xff] }
0x114c   :  { %5044 = vrcp.f32 %v2069_v34  ;;  %vm2077_vm14 = vmor %vm2075_vm13, %vm2076_vm12  ;;  %v2096_v51 = vand.u32 2147483648, %v2069_v34  ;;  %v2094_v58 = vand.u32 2147483647, %v2069_v34  ;;  %vm2090_vm4 = vweird.f32 %v2069_v34  ;;  %2479 = vmatpush.msra.mxu3 %v4625_v32  ;;  %v4668_v32 = vld [vmem:[%s5392_s20 + $0x1f8] sm:$0xff] }
0x114d   :  { %v2072_v35 = vsub.f32 1.0, %v2071_v30  ;;  %v4623_v30 = vld [vmem:[%s5392_s20 + $0x1a8] sm:$0xff] }
0x114e   :  { %v2097_v63 = vor.u32 1.1754944e-38, %v2096_v51  ;;  %vm2095_vm6 = vcmp.eq.f32.partialorder %v2094_v58, 8.507059e+37 }
0x114f   :  { %v2073_v37 = vmul.f32 %v5043_v33, %v2072_v35  ;;  %v4621_v35 = vld [vmem:[%s5392_s20 + $0x198] sm:$0xff] }
0x1151   :  { %v2074_v40 = vadd.f32 %v5043_v33, %v2073_v37  ;;  %v4619_v37 = vld [vmem:[%s5392_s20 + $0x188] sm:$0xff] }
0x1152   :  { %v5045_v41 = vpop.eup %5044 }
0x1153   :  { %v2078_v44 = vsel %vm2077_vm14, %v5043_v33, %v2074_v40  ;;  %v2086_v45 = vmul.f32 %v5045_v41, %v2069_v34  ;;  %vm2091_vm3 = vweird.f32 %v5045_v41  ;;  %v4624_v33 = vld [vmem:[%s5392_s20 + $0x1b0] sm:$0xff]  ;;  %v4622_v34 = vld [vmem:[%s5392_s20 + $0x1a0] sm:$0xff] }
0x1154   :  { %v2083_v46 = vsel %vm2080_vm15, %v2082_v43, %v2078_v44  ;;  %vm2092_vm5 = vmor %vm2090_vm4, %vm2091_vm3  ;;  %2480 = vmatpush.msra.mxu3 %v4624_v33  ;;  %v4618_v40 = vld [vmem:[%s5392_s20 + $0x180] sm:$0xff] }
0x1155   :  { %v2087_v48 = vsub.f32 1.0, %v2086_v45  ;;  %v2084_v49 = vmul.f32 %v5039_v27, %v2083_v46 }
0x1156   :  { %2481 = vmatpush.msra.mxu3 %v4623_v30  ;;  %v4667_v30 = vld [vmem:[%s5392_s20 + $0x1f0] sm:$0xff] }
0x1157   :  { %v2088_v53 = vmul.f32 %v5045_v41, %v2087_v48  ;;  %4558 = vmatmul.msk.f32.vlgmr.msra.gmra.mxu2 %vm337_vm2, %v2084_v49 }
0x1158   :  { %2442 = vmatpush.msra.mxu2 %v4614_v50  ;;  %2482 = vmatpush.msra.mxu3 %v4622_v34  ;;  %v4602_v50 = vld [vmem:[%s5397_s8 + $0x58] sm:$0xff]  ;;  %v4666_v34 = vld [vmem:[%s5392_s20 + $0x1e8] sm:$0xff] }
0x1159   :  { %v2089_v61 = vadd.f32 %v5045_v41, %v2088_v53  ;;  %2382 = vmatpush.msra.mxu0 %v4602_v50 }
0x115a   :  { %2443 = vmatpush.msra.mxu2 %v4613_v59  ;;  %2483 = vmatpush.msra.mxu3 %v4621_v35  ;;  %v4665_v35 = vld [vmem:[%s5392_s20 + $0x1e0] sm:$0xff] }
0x115b   :  { %v2093_v0 = vsel %vm2092_vm5, %v5045_v41, %v2089_v61 }
0x115c   :  { %v2098_v2 = vsel %vm2095_vm6, %v2097_v63, %v2093_v0  ;;  %2444 = vmatpush.msra.mxu2 %v4612_v62  ;;  %2484 = vmatpush.msra.mxu3 %v4620_v36 }
0x115d   :  { %v2099_v3 = vmul.f32 %v5041_v31, %v2098_v2 }
0x115e   :  { %2445 = vmatpush.msra.mxu2 %v4611_v1  ;;  %2485 = vmatpush.msra.mxu3 %v4619_v37  ;;  %v4664_v37 = vld [vmem:[%s5392_s20 + $0x1d8] sm:$0xff] }
0x115f   :  { %4559 = vmatmul.msk.f32.gmra.mxu2 %vm337_vm2, %v2099_v3 }
0x1160   :  { %2446 = vmatpush.msra.mxu2 %v4610_v4  ;;  %2486 = vmatpush.msra.mxu3 %v4618_v40  ;;  %v4663_v40 = vld [vmem:[%s5392_s20 + $0x1d0] sm:$0xff] }
0x1162   :  { %2447 = vmatpush.msra.mxu2 %v4609_v6 }
0x1164   :  { %2448 = vmatpush.msra.mxu2 %v4608_v9  ;;  %v4601_v9 = vld [vmem:[%s5397_s8 + $0x50] sm:$0xff] }
0x1165   :  { %2383 = vmatpush.msra.mxu0 %v4601_v9 }
0x1166   :  { %2449 = vmatpush.msra.mxu2 %v4607_v10  ;;  %v4636_v10 = vld [vmem:[%s5407_s17 + $0x1b8] sm:$0xff] }
0x1167   :  { %4597 = vmatmul.msk.f32.vlgmr.msrb.gmra.mxu2 %vm337_vm2, %v2164_v11  ;;  %v4635_v11 = vld [vmem:[%s5407_s17 + $0x1b0] sm:$0xff]  ;;  %2516 = vmatpush.msrb.mxu0 %v4636_v10 }
0x1169   :  { %2517 = vmatpush.msrb.mxu0 %v4635_v11 }
0x116b   :  { %2518 = vmatpush.msrb.mxu0 %v4634_v12 }
0x116f   :  { %4598 = vmatmul.msk.f32.gmra.mxu2 %vm337_vm2, %v2167_v15  ;;  %v4633_v15 = vld [vmem:[%s5407_s17 + $0x1a0] sm:$0xff] }
0x1170   :  { %2519 = vmatpush.msrb.mxu0 %v4633_v15 }
0x1172   :  { %2520 = vmatpush.msrb.mxu0 %v4632_v17 }
0x1177   :  { %4616 = vmatmul.msk.f32.vlgmr.msra.gmra.mxu2 %vm237_vm1, %v5894_v38 }
0x117f   :  { %4617 = vmatmul.msk.f32.gmra.mxu2 %vm237_vm1, %v5902_v25 }
0x11da   :  { %v2123_v55 = vpop.f32.mrf.mxu2 }
0x11db   :  { %4605 = vmatmul.msk.f32.vlgmr.msra.gmra.mxu1 %vm337_vm2, %v2123_v55  ;;  %v4631_v55 = vld [vmem:[%s5407_s17 + $0x190] sm:$0xff] }
0x11dc   :  { %2521 = vmatpush.msrb.mxu0 %v4631_v55 }
0x11e2   :  { %v2126_v57 = vpop.f32.mrf.mxu2 }
0x11e3   :  { %4606 = vmatmul.msk.f32.gmra.mxu1 %vm337_vm2, %v2126_v57  ;;  %v4630_v57 = vld [vmem:[%s5407_s17 + $0x188] sm:$0xff] }
0x11e4   :  { %2522 = vmatpush.msrb.mxu0 %v4630_v57 }
0x11ea   :  { %v2272_v13 = vpop.f32.mrf.mxu2 }
0x11eb   :  { %v2278_v42 = vmul.f32 0.25, %v2272_v13  ;;  %v4629_v13 = vld [vmem:[%s5407_s17 + $0x180] sm:$0xff] }
0x11ec   :  { %2523 = vmatpush.msrb.mxu0 %v4629_v13 }
0x11ed   :  { %v2280_v19 = vadd.f32 %v5941_v16, %v2278_v42  ;;  %v4657_v42 = vld [vmem:[%s5402_s6 + $0x1f8] sm:$0xff] }
0x11ef   :  { %v2282_v56 = vsel %vm337_vm2, %v2280_v19, -inf }
0x11f0   :  { %2283 = vmax.xlane.f32.xlu1 %v2282_v56  ;;  %v4656_v56 = vld [vmem:[%s5402_s6 + $0x1f0] sm:$0xff] }
0x11f2   :  { %v2275_v60 = vpop.f32.mrf.mxu2 }
0x11f3   :  { %v2279_v52 = vmul.f32 0.25, %v2275_v60  ;;  %v4655_v60 = vld [vmem:[%s5402_s6 + $0x1e8] sm:$0xff] }
0x11f5   :  { %v2281_v21 = vadd.f32 %v5946_v18, %v2279_v52  ;;  %v4654_v52 = vld [vmem:[%s5402_s6 + $0x1e0] sm:$0xff] }
0x11f7   :  { %v2285_v47 = vsel %vm337_vm2, %v2281_v21, -inf }
0x11f8   :  { %2286 = vmax.xlane.f32.xlu2 %v2285_v47 }
0x1263   :  { %v2284_v22 = vpop.xlane.xlu1 %2283 }
0x1264   :  { %v2288_v54 = vsub.f32 %v2280_v19, %v2284_v22  ;;  %v4652_v22 = vld [vmem:[%s5402_s6 + $0x1d0] sm:$0xff] }
0x1266   :  { %v2290_v23 = vmul.f32 1.442695, %v2288_v54  ;;  %v4651_v54 = vld [vmem:[%s5402_s6 + $0x1c8] sm:$0xff] }
0x1268   :  { %5046 = vpow2.f32 %v2290_v23  ;;  %v4650_v23 = vld [vmem:[%s5402_s6 + $0x1c0] sm:$0xff] }
0x126b   :  { %v2287_v24 = vpop.xlane.xlu2 %2286 }
0x126c   :  { %v2289_v26 = vsub.f32 %v2281_v21, %v2287_v24  ;;  %v4653_v21 = vld [vmem:[%s5402_s6 + $0x1d8] sm:$0xff]  ;;  %s6528_s6 = sld [smem:[#allocation19_spill]] }
0x126e   :  { %v5047_v27 = vpop.eup %5046  ;;  %v2292_v28 = vmul.f32 1.442695, %v2289_v26  ;;  %v4965_v26 = vld [vmem:[%s5222_s21 + $0x6] ss:$0 sm:$0xff] }
0x126f   :  { %v2294_v29 = vsel %vm337_vm2, %v5047_v27, 0.0 }
0x1270   :  { %5048 = vpow2.f32 %v2292_v28  ;;  %2295 = vadd.xlane.f32.xlu0 %v2294_v29  ;;  %v2451_v29 = vpop.f32.mrf.mxu2 }
0x1276   :  { %v5049_v31 = vpop.eup %5048 }
0x1277   :  { %v2297_v20 = vsel %vm337_vm2, %v5049_v31, 0.0 }
0x1278   :  { %2298 = vadd.xlane.f32.xlu1 %v2297_v20  ;;  %v2454_v36 = vpop.f32.mrf.mxu2 }
0x12e3   :  { %v2296_v39 = vpop.xlane.xlu0 %2295 }
0x12e4   :  { %5050 = vrcp.f32 %v2296_v39  ;;  %v2311_v46 = vand.u32 2147483648, %v2296_v39  ;;  %v2309_v49 = vand.u32 2147483647, %v2296_v39  ;;  %vm2305_vm8 = vweird.f32 %v2296_v39 }
0x12e6   :  { %v2312_v58 = vor.u32 1.1754944e-38, %v2311_v46  ;;  %vm2310_vm10 = vcmp.eq.f32.partialorder %v2309_v49, 8.507059e+37 }
0x12ea   :  { %v5051_v41 = vpop.eup %5050 }
0x12eb   :  { %v2301_v43 = vmul.f32 %v5051_v41, %v2296_v39  ;;  %v2299_v44 = vpop.xlane.xlu1 %2298  ;;  %vm2306_vm7 = vweird.f32 %v5051_v41 }
0x12ec   :  { %5052 = vrcp.f32 %v2299_v44  ;;  %vm2307_vm9 = vmor %vm2305_vm8, %vm2306_vm7  ;;  %v2326_v1 = vand.u32 2147483648, %v2299_v44  ;;  %v2324_v3 = vand.u32 2147483647, %v2299_v44  ;;  %vm2320_vm12 = vweird.f32 %v2299_v44 }
0x12ed   :  { %v2302_v45 = vsub.f32 1.0, %v2301_v43  ;;  %v4661_v43 = vld [vmem:[%s5392_s20 + $0x1c0] sm:$0xff] }
0x12ee   :  { %v2327_v6 = vor.u32 1.1754944e-38, %v2326_v1  ;;  %vm2325_vm14 = vcmp.eq.f32.partialorder %v2324_v3, 8.507059e+37 }
0x12ef   :  { %v2303_v48 = vmul.f32 %v5051_v41, %v2302_v45 }
0x12f1   :  { %v2304_v51 = vadd.f32 %v5051_v41, %v2303_v48 }
0x12f2   :  { %v5053_v53 = vpop.eup %5052 }
0x12f3   :  { %v2308_v59 = vsel %vm2307_vm9, %v5051_v41, %v2304_v51  ;;  %v2316_v61 = vmul.f32 %v5053_v53, %v2299_v44  ;;  %vm2321_vm11 = vweird.f32 %v5053_v53  ;;  %v4662_v41 = vld [vmem:[%s5392_s20 + $0x1c8] sm:$0xff]  ;;  %v6040_v44 = vpop.f32.mrf.mxu1  ;;  %s5190_s20 = smov [#allocation4]  }
0x12f4   :  { %v2313_v62 = vsel %vm2310_vm10, %v2312_v58, %v2308_v59  ;;  %vm2322_vm13 = vmor %vm2320_vm12, %vm2321_vm11  ;;  %v4647_v51 = vld [vmem:[%s5397_s8 + $0x68] sm:$0xff]  ;;  %s4245_s27 = sshll.u32 %s5190_s20, 4  ;;  %s4246_s27 = int_to_ptr.vmem [resolvable:$true] %s4245_s27 }
0x12f5   :  { %v2317_v63 = vsub.f32 1.0, %v2316_v61  ;;  %v2314_v0 = vmul.f32 %v5047_v27, %v2313_v62  ;;  %v4646_v61 = vld [vmem:[%s5397_s8 + $0x60] sm:$0xff] }
0x12f7   :  { %v2318_v2 = vmul.f32 %v5053_v53, %v2317_v63  ;;  %4599 = vmatmul.msk.f32.vlgmr.msrb.gmra.mxu3 %vm337_vm2, %v2314_v0 }
0x12f8   :  { %2670 = vmatpush.msrb.mxu3 %v4647_v51 }
0x12f9   :  { %v2319_v4 = vadd.f32 %v5053_v53, %v2318_v2 }
0x12fa   :  { %2671 = vmatpush.msrb.mxu3 %v4646_v61 }
0x12fb   :  { %v2323_v7 = vsel %vm2322_vm13, %v5053_v53, %v2319_v4  ;;  %v2417_v46 = vpop.f32.mrf.mxu1  ;;  %v4966_v53 = vld [vmem:[%s5257_s24 + $0x6] ss:$0 sm:$0xff] }
0x12fc   :  { %v2328_v5 = vsel %vm2325_vm14, %v2327_v6, %v2323_v7 }
0x12fd   :  { %v2329_v8 = vmul.f32 %v5049_v31, %v2328_v5  ;;  %v4964_v31 = vld [vmem:[%s5252_s19 + $0x6] ss:$0 sm:$0xff] }
0x12fe   :  { %v2452_v33 = vadd.f32 %v4964_v31, %v2451_v29  ;;  %v2455_v39 = vadd.f32 %v4964_v31, %v2454_v36 }
0x12ff   :  { %4600 = vmatmul.msk.f32.gmra.mxu3 %vm337_vm2, %v2329_v8  ;;  %v4968_v8 = vld [vmem:[%s5222_s21 + $0x7] ss:$0 sm:$0xff]  ;;  %s6520_s21 = sld [smem:[#allocation32_spill]] }
0x1307   :  { %4627 = vmatmul.msk.f32.vlgmr.msra.gmra.mxu3 %vm237_vm1, %v5894_v38 }
0x130f   :  { %4628 = vmatmul.msk.f32.gmra.mxu3 %vm237_vm1, %v5902_v25 }
0x137a   :  { %v2353_v19 = vpop.f32.mrf.mxu3 }
0x137b   :  { %4603 = vmatmul.msk.f32.vlgmr.msra.gmra.mxu0 %vm337_vm2, %v2353_v19 }
0x137c   :  { %2703 = vmatpush.msra.mxu0 %v4657_v42 }
0x137e   :  { %2704 = vmatpush.msra.mxu0 %v4656_v56 }
0x1380   :  { %2705 = vmatpush.msra.mxu0 %v4655_v60 }
0x1382   :  { %v2356_v47 = vpop.f32.mrf.mxu3  ;;  %2706 = vmatpush.msra.mxu0 %v4654_v52  ;;  %v4679_v52 = vld [vmem:[%s5407_s17 + $0x1f8] sm:$0xff] }
0x1383   :  { %4604 = vmatmul.msk.f32.gmra.mxu0 %vm337_vm2, %v2356_v47  ;;  %v4677_v47 = vld [vmem:[%s5407_s17 + $0x1e8] sm:$0xff] }
0x1384   :  { %2707 = vmatpush.msra.mxu0 %v4653_v21  ;;  %v4678_v21 = vld [vmem:[%s5407_s17 + $0x1f0] sm:$0xff] }
0x1386   :  { %2708 = vmatpush.msra.mxu0 %v4652_v22  ;;  %v4676_v22 = vld [vmem:[%s5407_s17 + $0x1e0] sm:$0xff] }
0x1388   :  { %2709 = vmatpush.msra.mxu0 %v4651_v54  ;;  %v4675_v54 = vld [vmem:[%s5407_s17 + $0x1d8] sm:$0xff] }
0x138a   :  { %v2488_v24 = vpop.f32.mrf.mxu3  ;;  %2710 = vmatpush.msra.mxu0 %v4650_v23  ;;  %v4674_v23 = vld [vmem:[%s5407_s17 + $0x1d0] sm:$0xff] }
0x138b   :  { %4638 = vmatmul.msk.f32.vlgmr.msrb.gmra.mxu0 %vm237_vm1, %v5894_v38  ;;  %v2489_v20 = vadd.f32 %v4965_v26, %v2488_v24  ;;  %v4673_v24 = vld [vmem:[%s5407_s17 + $0x1c8] sm:$0xff] }
0x1392   :  { %v2491_v27 = vpop.f32.mrf.mxu3 }
0x1393   :  { %v2492_v28 = vadd.f32 %v4965_v26, %v2491_v27  ;;  %4639 = vmatmul.msk.f32.gmra.mxu0 %vm237_vm1, %v5902_v25  ;;  %v4672_v27 = vld [vmem:[%s5407_s17 + $0x1c0] sm:$0xff]  ;;  %s6519_s17 = sld [smem:[#allocation30_spill]] }
0x1395   :  { %4640 = vmatpush.xpose.msk.msrb.mxu1 %vm337_vm2, %v2492_v28 }
0x1399   :  { %4641 = vmatpush.xpose.msk.msrb.mxu1 %vm337_vm2, %v2489_v20 }
0x139b   :  { %4659 = vmatmul.msk.f32.vlgmr.msra.gmra.mxu0 %vm237_vm1, %v5894_v38 }
0x139c   :  { %4642 = vmatmul.msk.f32.vlgmr.msrb.gmra.mxu1 %vm337_vm2, %v2452_v33 }
0x139d   :  { %2740 = vmatpush.msra.mxu1 %v4668_v32 }
0x139f   :  { %2741 = vmatpush.msra.mxu1 %v4667_v30 }
0x13a1   :  { %2742 = vmatpush.msra.mxu1 %v4666_v34 }
0x13a3   :  { %2743 = vmatpush.msra.mxu1 %v4665_v35  ;;  %4660 = vmatmul.msk.f32.gmra.mxu0 %vm237_vm1, %v5902_v25 }
0x13a4   :  { %4643 = vmatmul.msk.f32.gmra.mxu1 %vm337_vm2, %v2455_v39 }
0x13a5   :  { %2744 = vmatpush.msra.mxu1 %v4664_v37 }
0x13a7   :  { %2745 = vmatpush.msra.mxu1 %v4663_v40 }
0x13a9   :  { %2746 = vmatpush.msra.mxu1 %v4662_v41 }
0x13ab   :  { %2747 = vmatpush.msra.mxu1 %v4661_v43 }
0x13ac   :  { %4670 = vmatmul.msk.f32.vlgmr.msra.gmra.mxu1 %vm237_vm1, %v5894_v38 }
0x13b4   :  { %4671 = vmatmul.msk.f32.gmra.mxu1 %vm237_vm1, %v5902_v25 }
0x13f8   :  { %v6042_v45 = vpop.f32.mrf.mxu0 }
0x1400   :  { %v2388_v48 = vpop.f32.mrf.mxu0 }
0x1401   :  { %v6044_v49 = vadd.f32 %v2417_v46, %v2388_v48 }
0x1408   :  { %v2525_v50 = vpop.f32.mrf.mxu0 }
0x1409   :  { %v2526_v62 = vadd.f32 %v4966_v53, %v2525_v50 }
0x1410   :  { %v2528_v58 = vpop.f32.mrf.mxu0 }
0x1411   :  { %v2529_v59 = vadd.f32 %v4966_v53, %v2528_v58 }
0x1413   :  { %2638 = vmatpush.msrb.mxu2 %v2529_v59 }
0x1415   :  { %2639 = vmatpush.msrb.mxu2 %v2526_v62 }
0x1417   :  { %2777 = vmatpush.msra.mxu2 %v4679_v52 }
0x1419   :  { %v2560_v63 = vpop.f32.mrf.mxu1  ;;  %2778 = vmatpush.msra.mxu2 %v4678_v21 }
0x141a   :  { %v2566_v0 = vmul.f32 0.25, %v2560_v63 }
0x141b   :  { %2779 = vmatpush.msra.mxu2 %v4677_v47 }
0x141c   :  { %v2568_v1 = vadd.f32 %v5941_v16, %v2566_v0  ;;  %v2712_v0 = vpop.f32.mrf.mxu0 }
0x141d   :  { %2780 = vmatpush.msra.mxu2 %v4676_v22 }
0x141e   :  { %v2570_v2 = vsel %vm337_vm2, %v2568_v1, -inf }
0x141f   :  { %2571 = vmax.xlane.f32.xlu2 %v2570_v2  ;;  %2781 = vmatpush.msra.mxu2 %v4675_v54 }
0x1421   :  { %v2563_v3 = vpop.f32.mrf.mxu1  ;;  %2782 = vmatpush.msra.mxu2 %v4674_v23 }
0x1422   :  { %v2567_v4 = vmul.f32 0.25, %v2563_v3 }
0x1423   :  { %2783 = vmatpush.msra.mxu2 %v4673_v24 }
0x1424   :  { %v2569_v6 = vadd.f32 %v5946_v18, %v2567_v4  ;;  %v2715_v4 = vpop.f32.mrf.mxu0 }
0x1425   :  { %2784 = vmatpush.msra.mxu2 %v4672_v27 }
0x1426   :  { %v2573_v7 = vsel %vm337_vm2, %v2569_v6, -inf }
0x1427   :  { %2574 = vmax.xlane.f32.xlu0 %v2573_v7  ;;  %v4969_v7 = vld [vmem:[%s5257_s24 + $0x7] ss:$0 sm:$0xff]  ;;  %s6526_s24 = sld [smem:[#allocation29_spill]] }
0x1429   :  { %v2749_v5 = vpop.f32.mrf.mxu1 }
0x142a   :  { %v2750_v11 = vadd.f32 %v4968_v8, %v2749_v5 }
0x1431   :  { %v2752_v9 = vpop.f32.mrf.mxu1 }
0x1432   :  { %v2753_v10 = vadd.f32 %v4968_v8, %v2752_v9 }
0x1434   :  { %4683 = vmatpush.xpose.msk.msra.mxu3 %vm337_vm2, %v2753_v10  ;;  %v2415_v10 = vadd.f32 %v6040_v44, %v6042_v45 }
0x1438   :  { %4684 = vmatpush.xpose.msk.msra.mxu3 %vm337_vm2, %v2750_v11 }
0x1492   :  { %v2572_v12 = vpop.xlane.xlu2 %2571 }
0x1493   :  { %v2576_v15 = vsub.f32 %v2568_v1, %v2572_v12  ;;  %v4967_v1 = vld [vmem:[%s5252_s19 + $0x7] ss:$0 sm:$0xff]  ;;  %s6525_s19 = sld [smem:[#allocation26_spill]] }
0x1494   :  { %v2713_v2 = vadd.f32 %v4967_v1, %v2712_v0  ;;  %v4970_v0 = vld [vmem:[%s5247_s14 + $0x1] ss:$0 sm:$0xff]  ;;  %s6524_s14 = sld [smem:[#allocation27_spill]] }
0x1495   :  { %v2578_v17 = vmul.f32 1.442695, %v2576_v15 }
0x1497   :  { %5054 = vpow2.f32 %v2578_v17 }
0x149a   :  { %v2575_v55 = vpop.xlane.xlu0 %2574 }
0x149b   :  { %v2577_v57 = vsub.f32 %v2569_v6, %v2575_v55  ;;  %v2716_v6 = vadd.f32 %v4967_v1, %v2715_v4 }
0x149d   :  { %v5055_v13 = vpop.eup %5054  ;;  %v2580_v42 = vmul.f32 1.442695, %v2577_v57 }
0x149e   :  { %v2582_v19 = vsel %vm337_vm2, %v5055_v13, 0.0 }
0x149f   :  { %5056 = vpow2.f32 %v2580_v42  ;;  %2583 = vadd.xlane.f32.xlu1 %v2582_v19 }
0x14a5   :  { %v5057_v56 = vpop.eup %5056 }
0x14a6   :  { %v2585_v60 = vsel %vm337_vm2, %v5057_v56, 0.0 }
0x14a7   :  { %2586 = vadd.xlane.f32.xlu2 %v2585_v60 }
0x1512   :  { %v2584_v26 = vpop.xlane.xlu1 %2583 }
0x1513   :  { %5058 = vrcp.f32 %v2584_v26  ;;  %v2599_v32 = vand.u32 2147483648, %v2584_v26  ;;  %v2597_v30 = vand.u32 2147483647, %v2584_v26  ;;  %vm2593_vm3 = vweird.f32 %v2584_v26 }
0x1515   :  { %v2600_v36 = vor.u32 1.1754944e-38, %v2599_v32  ;;  %vm2598_vm5 = vcmp.eq.f32.partialorder %v2597_v30, 8.507059e+37 }
0x1519   :  { %v5059_v28 = vpop.eup %5058 }
0x151a   :  { %v2589_v29 = vmul.f32 %v5059_v28, %v2584_v26  ;;  %v2587_v31 = vpop.xlane.xlu2 %2586  ;;  %vm2594_vm15 = vweird.f32 %v5059_v28 }
0x151b   :  { %5060 = vrcp.f32 %v2587_v31  ;;  %vm2595_vm4 = vmor %vm2593_vm3, %vm2594_vm15  ;;  %v2614_v46 = vand.u32 2147483648, %v2587_v31  ;;  %v2612_v50 = vand.u32 2147483647, %v2587_v31  ;;  %vm2608_vm7 = vweird.f32 %v2587_v31 }
0x151c   :  { %v2590_v20 = vsub.f32 1.0, %v2589_v29 }
0x151d   :  { %v2615_v53 = vor.u32 1.1754944e-38, %v2614_v46  ;;  %vm2613_vm9 = vcmp.eq.f32.partialorder %v2612_v50, 8.507059e+37 }
0x151e   :  { %v2591_v33 = vmul.f32 %v5059_v28, %v2590_v20 }
0x1520   :  { %v2592_v34 = vadd.f32 %v5059_v28, %v2591_v33 }
0x1521   :  { %v5061_v35 = vpop.eup %5060 }
0x1522   :  { %v2596_v37 = vsel %vm2595_vm4, %v5059_v28, %v2592_v34  ;;  %v2604_v39 = vmul.f32 %v5061_v35, %v2587_v31  ;;  %vm2609_vm6 = vweird.f32 %v5061_v35 }
0x1523   :  { %v2601_v40 = vsel %vm2598_vm5, %v2600_v36, %v2596_v37  ;;  %vm2610_vm8 = vmor %vm2608_vm7, %vm2609_vm6 }
0x1524   :  { %v2602_v41 = vmul.f32 %v5055_v13, %v2601_v40  ;;  %v2605_v43 = vsub.f32 1.0, %v2604_v39 }
0x1526   :  { %v2606_v48 = vmul.f32 %v5061_v35, %v2605_v43  ;;  %4644 = vmatmul.msk.f32.vlgmr.msrb.gmra.mxu2 %vm337_vm2, %v2602_v41 }
0x1528   :  { %v2607_v51 = vadd.f32 %v5061_v35, %v2606_v48 }
0x152a   :  { %v2611_v58 = vsel %vm2610_vm8, %v5061_v35, %v2607_v51 }
0x152b   :  { %v2616_v59 = vsel %vm2613_vm9, %v2615_v53, %v2611_v58 }
0x152c   :  { %v2617_v61 = vmul.f32 %v5057_v56, %v2616_v59 }
0x152e   :  { %4645 = vmatmul.msk.f32.gmra.mxu2 %vm337_vm2, %v2617_v61  ;;  %v4689_v61 = vld [vmem:[%s5397_s8 + $0x70] sm:$0xff] }
0x1536   :  { %4681 = vmatmul.msk.f32.vlgmr.msra.gmra.mxu2 %vm237_vm1, %v5894_v38 }
0x153e   :  { %4682 = vmatmul.msk.f32.gmra.mxu2 %vm237_vm1, %v5902_v25 }
0x15a9   :  { %v2641_v62 = vpop.f32.mrf.mxu2 }
0x15aa   :  { %4648 = vmatmul.msk.f32.vlgmr.msrb.gmra.mxu3 %vm337_vm2, %v2641_v62 }
0x15b1   :  { %v2644_v63 = vpop.f32.mrf.mxu2 }
0x15b2   :  { %4649 = vmatmul.msk.f32.gmra.mxu3 %vm337_vm2, %v2644_v63 }
0x15b9   :  { %v2786_v3 = vpop.f32.mrf.mxu2 }
0x15ba   :  { %4685 = vmatmul.msk.f32.vlgmr.msra.gmra.mxu3 %vm337_vm2, %v2713_v2  ;;  %v2787_v9 = vadd.f32 %v4969_v7, %v2786_v3 }
0x15c1   :  { %v2789_v5 = vpop.f32.mrf.mxu2 }
0x15c2   :  { %v2790_v8 = vadd.f32 %v4969_v7, %v2789_v5  ;;  %4686 = vmatmul.msk.f32.gmra.mxu3 %vm337_vm2, %v2716_v6 }
0x15c4   :  { %2899 = vmatpush.msrb.mxu0 %v2790_v8 }
0x15c6   :  { %2900 = vmatpush.msrb.mxu0 %v2787_v9 }
0x162d   :  { %v2673_v11 = vpop.f32.mrf.mxu3 }
0x162e   :  { %v6080_v12 = vadd.f32 %v2673_v11, %v2415_v10 }
0x1635   :  { %v2676_v15 = vpop.f32.mrf.mxu3 }
0x1636   :  { %v6083_v17 = vadd.f32 %v2676_v15, %v6044_v49 }
0x163d   :  { %v2821_v55 = vpop.f32.mrf.mxu3 }
0x163e   :  { %v2827_v57 = vmul.f32 0.25, %v2821_v55 }
0x1640   :  { %v2829_v13 = vadd.f32 %v5941_v16, %v2827_v57 }
0x1642   :  { %v2831_v42 = vsel %vm337_vm2, %v2829_v13, -inf }
0x1643   :  { %2832 = vmax.xlane.f32.xlu0 %v2831_v42 }
0x1645   :  { %v2824_v19 = vpop.f32.mrf.mxu3 }
0x1646   :  { %v2828_v56 = vmul.f32 0.25, %v2824_v19  ;;  %v4703_v19 = vld [vmem:[%s5382_s29 + $0x78] sm:$0xff] }
0x1647   :  { %3037 = vmatpush.msrb.mxu2 %v4703_v19 }
0x1648   :  { %v2830_v60 = vadd.f32 %v5946_v18, %v2828_v56  ;;  %v4690_v18 = vld [vmem:[%s5397_s8 + $0x78] sm:$0xff]  ;;  %v4702_v56 = vld [vmem:[%s5382_s29 + $0x70] sm:$0xff]  ;;  %s6523_s8 = sld [smem:[#allocation31_spill]] }
0x1649   :  { %2931 = vmatpush.msrb.mxu1 %v4690_v18  ;;  %3038 = vmatpush.msrb.mxu2 %v4702_v56 }
0x164a   :  { %v2834_v44 = vsel %vm337_vm2, %v2830_v60, -inf }
0x164b   :  { %2835 = vmax.xlane.f32.xlu1 %v2834_v44  ;;  %2932 = vmatpush.msrb.mxu1 %v4689_v61  ;;  %v4700_v44 = vld [vmem:[%s5382_s29 + $0x60] sm:$0xff] }
0x16b6   :  { %v2833_v45 = vpop.xlane.xlu0 %2832 }
0x16b7   :  { %v2837_v52 = vsub.f32 %v2829_v13, %v2833_v45  ;;  %v4699_v45 = vld [vmem:[%s5382_s29 + $0x58] sm:$0xff] }
0x16b9   :  { %v2839_v21 = vmul.f32 1.442695, %v2837_v52  ;;  %v4698_v52 = vld [vmem:[%s5382_s29 + $0x50] sm:$0xff] }
0x16bb   :  { %5062 = vpow2.f32 %v2839_v21  ;;  %v4697_v21 = vld [vmem:[%s5382_s29 + $0x48] sm:$0xff] }
0x16be   :  { %v2836_v49 = vpop.xlane.xlu1 %2835 }
0x16bf   :  { %v2838_v47 = vsub.f32 %v2830_v60, %v2836_v49  ;;  %v4701_v60 = vld [vmem:[%s5382_s29 + $0x68] sm:$0xff]  ;;  %v4696_v49 = vld [vmem:[%s5382_s29 + $0x40] sm:$0xff]  ;;  %s6521_s29 = sld [smem:[#allocation20_spill]] }
0x16c0   :  { %3039 = vmatpush.msrb.mxu2 %v4701_v60 }
0x16c1   :  { %v5063_v22 = vpop.eup %5062  ;;  %v2841_v54 = vmul.f32 1.442695, %v2838_v47 }
0x16c2   :  { %v2843_v16 = vsel %vm337_vm2, %v5063_v22, 0.0  ;;  %3040 = vmatpush.msrb.mxu2 %v4700_v44 }
0x16c3   :  { %5064 = vpow2.f32 %v2841_v54  ;;  %2844 = vadd.xlane.f32.xlu2 %v2843_v16  ;;  %v4714_v16 = vld [vmem:[%s5387_s3 + $0x78] sm:$0xff] }
0x16c4   :  { %3041 = vmatpush.msrb.mxu2 %v4699_v45  ;;  %3082 = vmatpush.msrb.mxu3 %v4714_v16  ;;  %v4750_v16 = vld [vmem:[%s6506_s23 + $0x170] sm:$0xff] }
0x16c6   :  { %3042 = vmatpush.msrb.mxu2 %v4698_v52 }
0x16c8   :  { %3043 = vmatpush.msrb.mxu2 %v4697_v21 }
0x16c9   :  { %v5065_v23 = vpop.eup %5064 }
0x16ca   :  { %v2846_v24 = vsel %vm337_vm2, %v5065_v23, 0.0  ;;  %3044 = vmatpush.msrb.mxu2 %v4696_v49  ;;  %v4733_v49 = vld [vmem:[%s6505_s22 + $0x78] sm:$0xff] }
0x16cb   :  { %2847 = vadd.xlane.f32.xlu0 %v2846_v24  ;;  %v4712_v24 = vld [vmem:[%s5387_s3 + $0x68] sm:$0xff]  ;;  %3195 = vmatpush.msra.mxu0 %v4733_v49 }
0x1736   :  { %v2845_v26 = vpop.xlane.xlu2 %2844 }
0x1737   :  { %5066 = vrcp.f32 %v2845_v26  ;;  %v2860_v20 = vand.u32 2147483648, %v2845_v26  ;;  %v2858_v33 = vand.u32 2147483647, %v2845_v26  ;;  %vm2854_vm11 = vweird.f32 %v2845_v26 }
0x1739   :  { %v2861_v35 = vor.u32 1.1754944e-38, %v2860_v20  ;;  %vm2859_vm13 = vcmp.eq.f32.partialorder %v2858_v33, 8.507059e+37 }
0x173d   :  { %v5067_v27 = vpop.eup %5066 }
0x173e   :  { %v2850_v28 = vmul.f32 %v5067_v27, %v2845_v26  ;;  %v2848_v29 = vpop.xlane.xlu0 %2847  ;;  %vm2855_vm10 = vweird.f32 %v5067_v27 }
0x173f   :  { %5068 = vrcp.f32 %v2848_v29  ;;  %vm2856_vm12 = vmor %vm2854_vm11, %vm2855_vm10  ;;  %v2875_v43 = vand.u32 2147483648, %v2848_v29  ;;  %v2873_v48 = vand.u32 2147483647, %v2848_v29  ;;  %vm2869_vm15 = vweird.f32 %v2848_v29 }
0x1740   :  { %v2851_v31 = vsub.f32 1.0, %v2850_v28 }
0x1741   :  { %v2876_v51 = vor.u32 1.1754944e-38, %v2875_v43  ;;  %vm2874_vm4 = vcmp.eq.f32.partialorder %v2873_v48, 8.507059e+37 }
0x1742   :  { %v2852_v32 = vmul.f32 %v5067_v27, %v2851_v31  ;;  %v4710_v31 = vld [vmem:[%s5387_s3 + $0x58] sm:$0xff] }
0x1744   :  { %v2853_v30 = vadd.f32 %v5067_v27, %v2852_v32 }
0x1745   :  { %v5069_v34 = vpop.eup %5068 }
0x1746   :  { %v2857_v36 = vsel %vm2856_vm12, %v5067_v27, %v2853_v30  ;;  %v2865_v37 = vmul.f32 %v5069_v34, %v2848_v29  ;;  %vm2870_vm14 = vweird.f32 %v5069_v34  ;;  %v4711_v27 = vld [vmem:[%s5387_s3 + $0x60] sm:$0xff] }
0x1747   :  { %v2862_v39 = vsel %vm2859_vm13, %v2861_v35, %v2857_v36  ;;  %vm2871_vm3 = vmor %vm2869_vm15, %vm2870_vm14 }
0x1748   :  { %v2863_v40 = vmul.f32 %v5063_v22, %v2862_v39  ;;  %v2866_v41 = vsub.f32 1.0, %v2865_v37  ;;  %v4971_v37 = vld [vmem:[%s5317_s30 + $0x1] ss:$0 sm:$0xff]  ;;  %s6527_s30 = sld [smem:[#allocation25_spill]] }
0x174a   :  { %v2867_v46 = vmul.f32 %v5069_v34, %v2866_v41  ;;  %4687 = vmatmul.msk.f32.vlgmr.msrb.gmra.mxu0 %vm337_vm2, %v2863_v40  ;;  %v4972_v41 = vld [vmem:[%s6502_s0 + $0x1] ss:$0 sm:$0xff]  ;;  %s5108_s0 = scalar_lea.hbm %s5107_s18, 16 }
0x174b   :  { %p5109_p0 = scmp.ne.s32.totalorder %s5107_s18, %s5108_s0 }
0x174c   :  { %v2868_v50 = vadd.f32 %v5069_v34, %v2867_v46 }
0x174e   :  { %v2872_v53 = vsel %vm2871_vm3, %v5069_v34, %v2868_v50 }
0x174f   :  { %v2877_v58 = vsel %vm2874_vm4, %v2876_v51, %v2872_v53 }
0x1750   :  { %v2878_v59 = vmul.f32 %v5065_v23, %v2877_v58  ;;  %v4713_v23 = vld [vmem:[%s5387_s3 + $0x70] sm:$0xff] }
0x1751   :  { %3083 = vmatpush.msrb.mxu3 %v4713_v23  ;;  %v4742_v23 = vld [vmem:[%s6506_s23 + $0x1f0] sm:$0xff] }
0x1752   :  { %4688 = vmatmul.msk.f32.gmra.mxu0 %vm337_vm2, %v2878_v59 }
0x1753   :  { %3084 = vmatpush.msrb.mxu3 %v4712_v24  ;;  %v4731_v24 = vld [vmem:[%s6505_s22 + $0x68] sm:$0xff] }
0x1755   :  { %3085 = vmatpush.msrb.mxu3 %v4711_v27  ;;  %v4730_v27 = vld [vmem:[%s6505_s22 + $0x60] sm:$0xff] }
0x1757   :  { %3086 = vmatpush.msrb.mxu3 %v4710_v31  ;;  %v4729_v31 = vld [vmem:[%s6505_s22 + $0x58] sm:$0xff] }
0x17c7   :  { %v2902_v62 = vpop.f32.mrf.mxu0 }
0x17c8   :  { %4691 = vmatmul.msk.f32.vlgmr.msrb.gmra.mxu1 %vm337_vm2, %v2902_v62 }
0x17cf   :  { %v2905_v63 = vpop.f32.mrf.mxu0 }
0x17d0   :  { %4692 = vmatmul.msk.f32.gmra.mxu1 %vm337_vm2, %v2905_v63  ;;  %v4709_v63 = vld [vmem:[%s5387_s3 + $0x50] sm:$0xff] }
0x17d1   :  { %3087 = vmatpush.msrb.mxu3 %v4709_v63  ;;  %v4759_v63 = vld [vmem:[%s6506_s23 + $0x188] sm:$0xff] }
0x1845   :  { %v2934_v1 = vpop.f32.mrf.mxu1 }
0x1846   :  { %v2940_v2 = vadd.f32 %v2934_v1, %v6080_v12  ;;  %v4707_v1 = vld [vmem:[%s5387_s3 + $0x40] sm:$0xff] }
0x1848   :  { %v2947_v3 = vadd.f32 %v4970_v0, %v2940_v2  ;;  %v4973_v2 = vld [vmem:[%s6503_s5 + $0x1] ss:$0 sm:$0xff]  ;;  %s5110_s5 = scalar_lea.hbm %s5417_s25, 16 }
0x1849   :  { %p5112_p2 = scmp.lt.s32.totalorder %s5110_s5, %s5108_s0 }
0x184a   :  { %v2949_v4 = vadd.f32 %v2947_v3, %v5894_v38 }
0x184b   :  { %p5113_p3 = por %p5112_p2, %p5111_p1 }
0x184c   :  { %v2955_v6 = vsel %vm237_vm1, %v2949_v4, 0.0 }
0x184d   :  { %2956 = vadd.xlane.f32.xlu1 %v2955_v6  ;;  %v2937_v7 = vpop.f32.mrf.mxu1  ;;  %p5114_p4 = pnand %p5113_p3, %p5109_p0 }
0x184e   :  { %v2941_v5 = vadd.f32 %v2937_v7, %v6083_v17 }
0x1850   :  { %v2948_v8 = vadd.f32 %v4970_v0, %v2941_v5  ;;  %v4708_v0 = vld [vmem:[%s5387_s3 + $0x48] sm:$0xff]  ;;  %s6522_s3 = sld [smem:[#allocation28_spill]] }
0x1851   :  { %3088 = vmatpush.msrb.mxu3 %v4708_v0 }
0x1852   :  { %v2950_v9 = vadd.f32 %v2948_v8, %v5902_v25 }
0x1853   :  { %3089 = vmatpush.msrb.mxu3 %v4707_v1  ;;  %v4758_v1 = vld [vmem:[%s6506_s23 + $0x180] sm:$0xff] }
0x1854   :  { %v2958_v10 = vsel %vm237_vm1, %v2950_v9, 0.0 }
0x1855   :  { %2959 = vadd.xlane.f32.xlu2 %v2958_v10 }
0x18c0   :  { %v2957_v11 = vpop.xlane.xlu1 %2956 }
0x18c1   :  { %v2961_v12 = vmul.f32 %v2957_v11, %v5683_v14 }
0x18c3   :  { %v2963_v15 = vsub.f32 %v2949_v4, %v2961_v12 }
0x18c5   :  { %v2965_v38 = vmul.f32 %v2963_v15, %v2963_v15 }
0x18c7   :  { %v2967_v55 = vsel %vm237_vm1, %v2965_v38, 0.0 }
0x18c8   :  { %2968 = vadd.xlane.f32.xlu0 %v2967_v55  ;;  %v2960_v17 = vpop.xlane.xlu2 %2959 }
0x18c9   :  { %v2962_v57 = vmul.f32 %v2960_v17, %v5683_v14 }
0x18cb   :  { %v6107_v25 = vsub.f32 %v2950_v9, %v2962_v57  ;;  %v4974_v9 = vld [vmem:[%s6504_s12 + $0x1] ss:$0 sm:$0xff] }
0x18cd   :  { %v2966_v13 = vmul.f32 %v6107_v25, %v6107_v25 }
0x18cf   :  { %v2970_v42 = vsel %vm237_vm1, %v2966_v13, 0.0 }
0x18d0   :  { %2971 = vadd.xlane.f32.xlu1 %v2970_v42 }
0x193b   :  { %v2969_v47 = vpop.xlane.xlu0 %2968 }
0x193c   :  { %v2973_v22 = vmul.f32 %v2969_v47, %v5683_v14  ;;  %v4751_v47 = vld [vmem:[%s6506_s23 + $0x178] sm:$0xff] }
0x193d   :  { %3236 = vmatpush.msra.mxu1 %v4751_v47  ;;  %v4785_v47 = vld [vmem:[%s6506_s23 + $0x258] sm:$0xff] }
0x193e   :  { %v2975_v54 = vadd.f32 1e-05, %v2973_v22  ;;  %v4743_v22 = vld [vmem:[%s6506_s23 + $0x1f8] sm:$0xff] }
0x193f   :  { %3282 = vmatpush.msra.mxu3 %v4743_v22  ;;  %3237 = vmatpush.msra.mxu1 %v4750_v16  ;;  %v4784_v22 = vld [vmem:[%s6506_s23 + $0x250] sm:$0xff] }
0x1940   :  { %5070 = vrsqrt.f32 %v2975_v54  ;;  %vm2983_vm6 = vweird.f32 %v2975_v54 }
0x1941   :  { %3283 = vmatpush.msra.mxu3 %v4742_v23 }
0x1943   :  { %v2972_v18 = vpop.xlane.xlu1 %2971 }
0x1944   :  { %v2974_v26 = vmul.f32 %v2972_v18, %v5683_v14  ;;  %v4749_v18 = vld [vmem:[%s6506_s23 + $0x168] sm:$0xff] }
0x1945   :  { %3238 = vmatpush.msra.mxu1 %v4749_v18 }
0x1946   :  { %v5071_v28 = vpop.eup %5070  ;;  %v2976_v29 = vadd.f32 1e-05, %v2974_v26  ;;  %v4741_v26 = vld [vmem:[%s6506_s23 + $0x1e8] sm:$0xff] }
0x1947   :  { %v2978_v20 = vmul.f32 %v5071_v28, %v2975_v54  ;;  %vm2984_vm5 = vweird.f32 %v5071_v28  ;;  %v4732_v54 = vld [vmem:[%s6505_s22 + $0x70] sm:$0xff]  ;;  %3284 = vmatpush.msra.mxu3 %v4741_v26  ;;  %v4777_v26 = vld [vmem:[%s6506_s23 + $0x238] sm:$0xff] }
0x1948   :  { %5072 = vrsqrt.f32 %v2976_v29  ;;  %vm2985_vm7 = vmor %vm2983_vm6, %vm2984_vm5  ;;  %vm2993_vm9 = vweird.f32 %v2976_v29  ;;  %3196 = vmatpush.msra.mxu0 %v4732_v54  ;;  %v4783_v54 = vld [vmem:[%s6506_s23 + $0x248] sm:$0xff] }
0x1949   :  { %v2979_v32 = vmul.f32 %v5071_v28, %v2978_v20  ;;  %v4747_v20 = vld [vmem:[%s6506_s23 + $0x158] sm:$0xff] }
0x194a   :  { %3197 = vmatpush.msra.mxu0 %v4731_v24 }
0x194b   :  { %v2980_v33 = vmul.f32 0.5, %v2979_v32  ;;  %v4739_v32 = vld [vmem:[%s6506_s23 + $0x1d8] sm:$0xff] }
0x194c   :  { %3198 = vmatpush.msra.mxu0 %v4730_v27  ;;  %v6222_v27 = vld [vmem:[%s6509_s1] sm:$0xff] }
0x194d   :  { %v2981_v30 = vsub.f32 1.5, %v2980_v33  ;;  %v4728_v33 = vld [vmem:[%s6505_s22 + $0x50] sm:$0xff] }
0x194e   :  { %v5073_v34 = vpop.eup %5072  ;;  %3199 = vmatpush.msra.mxu0 %v4729_v31 }
0x194f   :  { %v2982_v35 = vmul.f32 %v5071_v28, %v2981_v30  ;;  %v2988_v36 = vmul.f32 %v5073_v34, %v2976_v29  ;;  %vm2994_vm8 = vweird.f32 %v5073_v34  ;;  %v4740_v29 = vld [vmem:[%s6506_s23 + $0x1e0] sm:$0xff]  ;;  %v4746_v30 = vld [vmem:[%s6506_s23 + $0x150] sm:$0xff] }
0x1950   :  { %vm2995_vm10 = vmor %vm2993_vm9, %vm2994_vm8  ;;  %3285 = vmatpush.msra.mxu3 %v4740_v29  ;;  %3200 = vmatpush.msra.mxu0 %v4728_v33  ;;  %v4775_v29 = vld [vmem:[%s6506_s23 + $0x228] sm:$0xff] }
0x1951   :  { %v2986_v39 = vsel %vm2985_vm7, %v5071_v28, %v2982_v35  ;;  %v2989_v40 = vmul.f32 %v5073_v34, %v2988_v36  ;;  %v4748_v28 = vld [vmem:[%s6506_s23 + $0x160] sm:$0xff]  ;;  %v4727_v35 = vld [vmem:[%s6505_s22 + $0x48] sm:$0xff] }
0x1952   :  { %v2997_v43 = vmul.f32 %v2986_v39, %v2963_v15  ;;  %3239 = vmatpush.msra.mxu1 %v4748_v28  ;;  %3286 = vmatpush.msra.mxu3 %v4739_v32  ;;  %v4745_v36 = vld [vmem:[%s6506_s23 + $0x148] sm:$0xff]  ;;  %v4726_v39 = vld [vmem:[%s6505_s22 + $0x40] sm:$0xff]  ;;  %v4776_v28 = vld [vmem:[%s6506_s23 + $0x230] sm:$0xff] }
0x1953   :  { %v2990_v46 = vmul.f32 0.5, %v2989_v40  ;;  %3201 = vmatpush.msra.mxu0 %v4727_v35  ;;  %v4744_v40 = vld [vmem:[%s6506_s23 + $0x140] sm:$0xff]  ;;  %v4773_v32 = vld [vmem:[%s6506_s23 + $0x218] sm:$0xff]  ;;  %v6231_v33 = vld [vmem:[%s6509_s1 + $0x8] sm:$0xff] }
0x1954   :  { %v3002_v48 = vmul.f32 %v4971_v37, %v2997_v43  ;;  %3240 = vmatpush.msra.mxu1 %v4747_v20  ;;  %v4765_v43 = vld [vmem:[%s6506_s23 + $0x1b8] sm:$0xff]  ;;  %v4774_v20 = vld [vmem:[%s6506_s23 + $0x220] sm:$0xff] }
0x1955   :  { %v2991_v50 = vsub.f32 1.5, %v2990_v46  ;;  %3202 = vmatpush.msra.mxu0 %v4726_v39 }
0x1956   :  { %v3007_v51 = vadd.f32 %v4972_v41, %v3002_v48  ;;  %3241 = vmatpush.msra.mxu1 %v4746_v30  ;;  %v4764_v48 = vld [vmem:[%s6506_s23 + $0x1b0] sm:$0xff] }
0x1957   :  { %v2992_v53 = vmul.f32 %v5073_v34, %v2991_v50  ;;  %3314 = vmatpush.msrb.mxu0 %v4765_v43  ;;  %v4772_v30 = vld [vmem:[%s6506_s23 + $0x210] sm:$0xff]  ;;  %v6252_v43 = vld [vmem:[%s6509_s1 + $0x40] sm:$0xff] }
0x1958   :  { %4705 = vmatmul.msk.f32.vlgmr.msrb.gmra.mxu2 %vm237_vm1, %v3007_v51  ;;  %3242 = vmatpush.msra.mxu1 %v4745_v36  ;;  %v4770_v36 = vld [vmem:[%s6506_s23 + $0x200] sm:$0xff] }
0x1959   :  { %v2996_v58 = vsel %vm2995_vm10, %v5073_v34, %v2992_v53  ;;  %v4738_v34 = vld [vmem:[%s6506_s23 + $0x1d0] sm:$0xff]  ;;  %3315 = vmatpush.msrb.mxu0 %v4764_v48 }
0x195a   :  { %v2998_v59 = vmul.f32 %v2996_v58, %v6107_v25  ;;  %3287 = vmatpush.msra.mxu3 %v4738_v34  ;;  %3243 = vmatpush.msra.mxu1 %v4744_v40  ;;  %v4762_v58 = vld [vmem:[%s6506_s23 + $0x1a0] sm:$0xff]  ;;  %v4771_v34 = vld [vmem:[%s6506_s23 + $0x208] sm:$0xff]  ;;  %v6246_v40 = vld [vmem:[%s6509_s1 + $0x18] sm:$0xff] }
0x195c   :  { %v3003_v61 = vmul.f32 %v4971_v37, %v2998_v59  ;;  %v4737_v37 = vld [vmem:[%s6506_s23 + $0x1c8] sm:$0xff]  ;;  %v4761_v59 = vld [vmem:[%s6506_s23 + $0x198] sm:$0xff] }
0x195d   :  { %3288 = vmatpush.msra.mxu3 %v4737_v37  ;;  %v6239_v37 = vld [vmem:[%s6509_s1 + $0x10] sm:$0xff] }
0x195e   :  { %v3008_v62 = vadd.f32 %v4972_v41, %v3003_v61  ;;  %v4736_v41 = vld [vmem:[%s6506_s23 + $0x1c0] sm:$0xff]  ;;  %v4760_v61 = vld [vmem:[%s6506_s23 + $0x190] sm:$0xff] }
0x195f   :  { %3289 = vmatpush.msra.mxu3 %v4736_v41 }
0x1960   :  { %4706 = vmatmul.msk.f32.gmra.mxu2 %vm237_vm1, %v3008_v62 }
0x19db   :  { %v3046_v3 = vpop.f32.mrf.mxu2 }
0x19dc   :  { %v3047_v4 = vadd.f32 %v4973_v2, %v3046_v3 }
0x19de   :  { %v3052_v6 = vmax.f32 %v3047_v4, 0.0 }
0x19e0   :  { %4716 = vmatmul.msk.f32.vlgmr.msrb.gmra.mxu3 %vm237_vm1, %v3052_v6 }
0x19e3   :  { %v3049_v7 = vpop.f32.mrf.mxu2 }
0x19e4   :  { %v3050_v5 = vadd.f32 %v4973_v2, %v3049_v7 }
0x19e6   :  { %v3053_v8 = vmax.f32 %v3050_v5, 0.0 }
0x19e8   :  { %4717 = vmatmul.msk.f32.gmra.mxu3 %vm237_vm1, %v3053_v8 }
0x1a63   :  { %v3091_v10 = vpop.f32.mrf.mxu3 }
0x1a64   :  { %v3092_v11 = vadd.f32 %v4974_v9, %v3091_v10 }
0x1a66   :  { %v3097_v12 = vadd.f32 %v3092_v11, %v3007_v51  ;;  %v4763_v51 = vld [vmem:[%s6506_s23 + $0x1a8] sm:$0xff] }
0x1a67   :  { %3316 = vmatpush.msrb.mxu0 %v4763_v51 }
0x1a68   :  { %v3103_v15 = vsel %vm237_vm1, %v3097_v12, 0.0 }
0x1a69   :  { %3104 = vadd.xlane.f32.xlu2 %v3103_v15  ;;  %3317 = vmatpush.msrb.mxu0 %v4762_v58  ;;  %v4976_v15 = vld [vmem:[%s6508_s28 + $0x1] ss:$0 sm:$0xff]  ;;  %v6264_v58 = vld [vmem:[%s6509_s1 + $0x30] sm:$0xff] }
0x1a6b   :  { %v3094_v38 = vpop.f32.mrf.mxu3  ;;  %3318 = vmatpush.msrb.mxu0 %v4761_v59  ;;  %v6269_v59 = vld [vmem:[%s6509_s1 + $0x38] sm:$0xff] }
0x1a6c   :  { %v3095_v55 = vadd.f32 %v4974_v9, %v3094_v38 }
0x1a6d   :  { %3319 = vmatpush.msrb.mxu0 %v4760_v61  ;;  %v4725_v61 = vld [vmem:[%s6510_s2 + $0x1] sm:$0x1] }
0x1a6e   :  { %v3098_v17 = vadd.f32 %v3095_v55, %v3008_v62 }
0x1a6f   :  { %3320 = vmatpush.msrb.mxu0 %v4759_v63 }
0x1a70   :  { %v3106_v57 = vsel %vm237_vm1, %v3098_v17, 0.0 }
0x1a71   :  { %3107 = vadd.xlane.f32.xlu0 %v3106_v57  ;;  %3321 = vmatpush.msrb.mxu0 %v4758_v1  ;;  %v3554_v1 = vld [vmem:[%s6519_s17 + $0x18] sm:$0xff] }
0x1adc   :  { %v3105_v25 = vpop.xlane.xlu2 %3104 }
0x1add   :  { %v3109_v13 = vmul.f32 %v3105_v25, %v5683_v14 }
0x1adf   :  { %v6142_v42 = vsub.f32 %v3097_v12, %v3109_v13  ;;  %v4789_v13 = vld [vmem:[%s6506_s23 + $0x278] sm:$0xff] }
0x1ae1   :  { %v3113_v19 = vmul.f32 %v6142_v42, %v6142_v42 }
0x1ae3   :  { %v3115_v56 = vsel %vm237_vm1, %v3113_v19, 0.0 }
0x1ae4   :  { %v3108_v60 = vpop.xlane.xlu0 %3107  ;;  %3116 = vadd.xlane.f32.xlu1 %v3115_v56 }
0x1ae5   :  { %v3110_v44 = vmul.f32 %v3108_v60, %v5683_v14 }
0x1ae7   :  { %v6148_v45 = vsub.f32 %v3098_v17, %v3110_v44  ;;  %v4787_v44 = vld [vmem:[%s6506_s23 + $0x268] sm:$0xff] }
0x1ae9   :  { %v3114_v52 = vmul.f32 %v6148_v45, %v6148_v45 }
0x1aeb   :  { %v3118_v21 = vsel %vm237_vm1, %v3114_v52, 0.0 }
0x1aec   :  { %3119 = vadd.xlane.f32.xlu2 %v3118_v21  ;;  %v4786_v21 = vld [vmem:[%s6506_s23 + $0x260] sm:$0xff] }
0x1b57   :  { %v3117_v46 = vpop.xlane.xlu1 %3116 }
0x1b58   :  { %v3121_v50 = vmul.f32 %v3117_v46, %v5683_v14  ;;  %v6257_v46 = vld [vmem:[%s6509_s1 + $0x48] sm:$0xff] }
0x1b5a   :  { %v3123_v53 = vadd.f32 1e-05, %v3121_v50 }
0x1b5c   :  { %5074 = vrsqrt.f32 %v3123_v53  ;;  %vm3131_vm12 = vweird.f32 %v3123_v53 }
0x1b5f   :  { %v3120_v62 = vpop.xlane.xlu2 %3119 }
0x1b60   :  { %v3122_v0 = vmul.f32 %v3120_v62, %v5683_v14  ;;  %v4975_v14 = vld [vmem:[%s6507_s26 + $0x1] ss:$0 sm:$0xff]  ;;  %v3480_v62 = vadd.f32 1e-05, %v4725_v61 }
0x1b61   :  { %v4981_v61 = vld [vmem:[%s6517_s15 + $0x1] ss:$0 sm:$0xff] }
0x1b62   :  { %v5075_v2 = vpop.eup %5074  ;;  %v3124_v3 = vadd.f32 1e-05, %v3122_v0  ;;  %v3511_v0 = vld [vmem:[%s6518_s9 + $0x18] sm:$0xff] }
0x1b63   :  { %v3126_v4 = vmul.f32 %v5075_v2, %v3123_v53  ;;  %vm3132_vm11 = vweird.f32 %v5075_v2 }
0x1b64   :  { %5076 = vrsqrt.f32 %v3124_v3  ;;  %vm3133_vm13 = vmor %vm3131_vm12, %vm3132_vm11  ;;  %vm3141_vm15 = vweird.f32 %v3124_v3 }
0x1b65   :  { %v3127_v6 = vmul.f32 %v5075_v2, %v3126_v4  ;;  %5078 = vrsqrt.f32 %v3480_v62 }
0x1b67   :  { %v3128_v7 = vmul.f32 0.5, %v3127_v6  ;;  %v3510_v6 = vld [vmem:[%s6518_s9 + $0x10] sm:$0xff] }
0x1b69   :  { %v3129_v5 = vsub.f32 1.5, %v3128_v7  ;;  %v3553_v7 = vld [vmem:[%s6519_s17 + $0x10] sm:$0xff] }
0x1b6a   :  { %v5077_v8 = vpop.eup %5076 }
0x1b6b   :  { %v3130_v9 = vmul.f32 %v5075_v2, %v3129_v5  ;;  %v3136_v10 = vmul.f32 %v5077_v8, %v3124_v3  ;;  %vm3142_vm14 = vweird.f32 %v5077_v8  ;;  %v5079_v3 = vpop.eup %5078  ;;  %v3588_v5 = vld [vmem:[%s6520_s21 + $0x10] sm:$0xff] }
0x1b6c   :  { %vm3143_vm3 = vmor %vm3141_vm15, %vm3142_vm14  ;;  %vm3488_vm4 = vweird.f32 %v5079_v3 }
0x1b6d   :  { %v3134_v11 = vsel %vm3133_vm13, %v5075_v2, %v3130_v9  ;;  %v3137_v12 = vmul.f32 %v5077_v8, %v3136_v10  ;;  %v3589_v2 = vld [vmem:[%s6520_s21 + $0x18] sm:$0xff]  ;;  %v3509_v9 = vld [vmem:[%s6518_s9 + $0x8] sm:$0xff] }
0x1b6e   :  { %v3145_v38 = vmul.f32 %v3134_v11, %v6142_v42  ;;  %v4788_v42 = vld [vmem:[%s6506_s23 + $0x270] sm:$0xff]  ;;  %v3552_v10 = vld [vmem:[%s6519_s17 + $0x8] sm:$0xff]  ;;  %v3508_v11 = vld [vmem:[%s6518_s9] sm:$0xff] }
0x1b6f   :  { %v3138_v55 = vmul.f32 0.5, %v3137_v12  ;;  %v3551_v12 = vld [vmem:[%s6519_s17] sm:$0xff] }
0x1b70   :  { %v3150_v17 = vmul.f32 %v4975_v14, %v3145_v38 }
0x1b71   :  { %v3139_v57 = vsub.f32 1.5, %v3138_v55 }
0x1b72   :  { %v6190_v25 = vadd.f32 %v4976_v15, %v3150_v17 }
0x1b73   :  { %v3140_v19 = vmul.f32 %v5077_v8, %v3139_v57 }
0x1b74   :  { %4734 = vmatmul.msk.f32.vlgmr.msra.gmra.mxu0 %vm237_vm1, %v6190_v25  ;;  %4752 = vmatmul.msk.f32.vlgmr.msra.gmra.mxu1 %vm237_vm1, %v6190_v25 }
0x1b75   :  { %v3144_v56 = vsel %vm3143_vm3, %v5077_v8, %v3140_v19  ;;  %4756 = vmatmul.msk.f32.vlgmr.msra.gmra.mxu3 %vm237_vm1, %v6190_v25  ;;  %3428 = vmatpush.msra.mxu0 %v4789_v13  ;;  %v3482_v8 = vmul.f32 %v5079_v3, %v3480_v62  ;;  %v4801_v13 = vld [vmem:[%s6520_s21 + $0x58] sm:$0xff] }
0x1b76   :  { %v3146_v60 = vmul.f32 %v3144_v56, %v6148_v45  ;;  %v4782_v45 = vld [vmem:[%s6506_s23 + $0x240] sm:$0xff]  ;;  %v4811_v19 = vld [vmem:[%s6520_s21 + $0x38] sm:$0xff] }
0x1b77   :  { %3429 = vmatpush.msra.mxu0 %v4788_v42  ;;  %v3483_v38 = vmul.f32 %v5079_v3, %v3482_v8  ;;  %v4800_v42 = vld [vmem:[%s6520_s21 + $0x50] sm:$0xff] }
0x1b78   :  { %v3151_v52 = vmul.f32 %v4975_v14, %v3146_v60  ;;  %v3587_v14 = vld [vmem:[%s6520_s21 + $0x8] sm:$0xff]  ;;  %v4810_v60 = vld [vmem:[%s6520_s21 + $0x30] sm:$0xff] }
0x1b79   :  { %3430 = vmatpush.msra.mxu0 %v4787_v44  ;;  %v3484_v57 = vmul.f32 0.5, %v3483_v38 }
0x1b7a   :  { %v3156_v49 = vadd.f32 %v4976_v15, %v3151_v52  ;;  %v3586_v15 = vld [vmem:[%s6520_s21] sm:$0xff]  ;;  %v4799_v52 = vld [vmem:[%s6520_s21 + $0x48] sm:$0xff] }
0x1b7b   :  { %3431 = vmatpush.msra.mxu0 %v4786_v21  ;;  %v4809_v21 = vld [vmem:[%s6520_s21 + $0x28] sm:$0xff] }
0x1b7c   :  { %4735 = vmatmul.msk.f32.gmra.mxu0 %vm237_vm1, %v3156_v49  ;;  %4753 = vmatmul.msk.f32.gmra.mxu1 %vm237_vm1, %v3156_v49 }
0x1b7d   :  { %4757 = vmatmul.msk.f32.gmra.mxu3 %vm237_vm1, %v3156_v49  ;;  %3432 = vmatpush.msra.mxu0 %v4785_v47 }
0x1b7f   :  { %3433 = vmatpush.msra.mxu0 %v4784_v22 }
0x1b81   :  { %3434 = vmatpush.msra.mxu0 %v4783_v54  ;;  %v4798_v54 = vld [vmem:[%s6520_s21 + $0x40] sm:$0xff] }
0x1b83   :  { %3435 = vmatpush.msra.mxu0 %v4782_v45  ;;  %v4808_v45 = vld [vmem:[%s6520_s21 + $0x20] sm:$0xff] }
0x1b84   :  { %4766 = vmatmul.msk.f32.vlgmr.msrb.gmra.mxu0 %vm237_vm1, %v6190_v25 }
0x1b85   :  { %3602 = vmatpush.msrb.mxu0 %v3589_v2 }
0x1b87   :  { %3603 = vmatpush.msrb.mxu0 %v3588_v5  ;;  %v4826_v5 = vld [vmem:[%s6520_s21 + $0x90] sm:$0xff] }
0x1b89   :  { %3604 = vmatpush.msrb.mxu0 %v3587_v14  ;;  %v4824_v14 = vld [vmem:[%s6520_s21 + $0x80] sm:$0xff] }
0x1b8b   :  { %3605 = vmatpush.msrb.mxu0 %v3586_v15 }
0x1b8c   :  { %4767 = vmatmul.msk.f32.gmra.mxu0 %vm237_vm1, %v3156_v49 }
0x1b94   :  { %4790 = vmatmul.msk.f32.vlgmr.msra.gmra.mxu0 %vm237_vm1, %v6190_v25 }
0x1b9c   :  { %4791 = vmatmul.msk.f32.gmra.mxu0 %vm237_vm1, %v3156_v49 }
0x1bf1   :  { %v6216_v16 = vpop.f32.mrf.mxu0  ;;  %v3245_v23 = vpop.f32.mrf.mxu1 }
0x1bf8   :  { %v3291_v4 = vpop.f32.mrf.mxu3 }
0x1bf9   :  { %v6218_v24 = vpop.f32.mrf.mxu0  ;;  %v3248_v18 = vpop.f32.mrf.mxu1 }
0x1bfa   :  { %3265 = vmatpush.msra.mxu2 %v3248_v18  ;;  %v4978_v18 = vld [vmem:[%s6511_s4 + $0x1] ss:$0 sm:$0xff] }
0x1bfc   :  { %3266 = vmatpush.msra.mxu2 %v3245_v23 }
0x1bfd   :  { %4754 = vmatmul.msk.f32.vlgmr.msra.gmra.mxu2 %vm337_vm2, %v6222_v27 }
0x1bfe   :  { %3371 = vmatpush.msrb.mxu2 %v4777_v26 }
0x1c00   :  { %3372 = vmatpush.msrb.mxu2 %v4776_v28  ;;  %v3294_v17 = vpop.f32.mrf.mxu3 }
0x1c01   :  { %v3323_v31 = vpop.f32.mrf.mxu0 }
0x1c02   :  { %3373 = vmatpush.msrb.mxu2 %v4775_v29 }
0x1c04   :  { %3374 = vmatpush.msrb.mxu2 %v4774_v20  ;;  %v4979_v20 = vld [vmem:[%s6514_s7 + $0x1] ss:$0 sm:$0xff] }
0x1c05   :  { %4755 = vmatmul.msk.f32.gmra.mxu2 %vm337_vm2, %v6231_v33 }
0x1c06   :  { %3375 = vmatpush.msrb.mxu2 %v4773_v32 }
0x1c08   :  { %3376 = vmatpush.msrb.mxu2 %v4772_v30 }
0x1c09   :  { %v3326_v35 = vpop.f32.mrf.mxu0 }
0x1c0a   :  { %3343 = vmatpush.msrb.mxu1 %v3326_v35  ;;  %3377 = vmatpush.msrb.mxu2 %v4771_v34 }
0x1c0c   :  { %3344 = vmatpush.msrb.mxu1 %v3323_v31  ;;  %3378 = vmatpush.msrb.mxu2 %v4770_v36 }
0x1c0d   :  { %4768 = vmatmul.msk.f32.vlgmr.msrb.gmra.mxu1 %vm337_vm2, %v6239_v37  ;;  %4778 = vmatmul.msk.f32.vlgmr.msrb.gmra.mxu2 %vm237_vm1, %v6190_v25  ;;  %v3485_v25 = vsub.f32 1.5, %v3484_v57  ;;  %v4819_v57 = vld [vmem:[%s6520_s21 + $0x78] sm:$0xff] }
0x1c0e   :  { %3534 = vmatpush.msra.mxu2 %v3511_v0 }
0x1c0f   :  { %v3486_v22 = vmul.f32 %v5079_v3, %v3485_v25  ;;  %v4818_v25 = vld [vmem:[%s6520_s21 + $0x70] sm:$0xff] }
0x1c10   :  { %3535 = vmatpush.msra.mxu2 %v3510_v6  ;;  %v4827_v6 = vld [vmem:[%s6520_s21 + $0x98] sm:$0xff] }
0x1c11   :  { %v3437_v39 = vpop.f32.mrf.mxu0 }
0x1c12   :  { %3536 = vmatpush.msra.mxu2 %v3509_v9  ;;  %v4825_v9 = vld [vmem:[%s6520_s21 + $0x88] sm:$0xff] }
0x1c14   :  { %3537 = vmatpush.msra.mxu2 %v3508_v11 }
0x1c15   :  { %4769 = vmatmul.msk.f32.gmra.mxu1 %vm337_vm2, %v6246_v40  ;;  %4779 = vmatmul.msk.f32.gmra.mxu2 %vm237_vm1, %v3156_v49  ;;  %vm3487_vm1 = vweird.f32 %v3480_v62 }
0x1c16   :  { %3648 = vmatpush.msrb.mxu2 %v4801_v13  ;;  %vm3489_vm5 = vmor %vm3487_vm1, %vm3488_vm4 }
0x1c17   :  { %v3490_v28 = vsel %vm3489_vm5, %v5079_v3, %v3486_v22 }
0x1c18   :  { %3649 = vmatpush.msrb.mxu2 %v4800_v42  ;;  %v3492_v34 = vperm.slane %v3490_v28, 0  ;;  %v4851_v28 = vld [vmem:[%s6520_s21 + $0xb8] sm:$0xff] }
0x1c19   :  { %v3440_v41 = vpop.f32.mrf.mxu0 }
0x1c1a   :  { %3457 = vmatpush.msra.mxu1 %v3440_v41  ;;  %3650 = vmatpush.msrb.mxu2 %v4799_v52  ;;  %v4980_v41 = vld [vmem:[%s6515_s10 + $0x1] ss:$0 sm:$0xff] }
0x1c1c   :  { %3458 = vmatpush.msra.mxu1 %v3437_v39  ;;  %3651 = vmatpush.msrb.mxu2 %v4798_v54 }
0x1c1d   :  { %4792 = vmatmul.msk.f32.vlgmr.msra.gmra.mxu1 %vm337_vm2, %v6252_v43 }
0x1c25   :  { %4793 = vmatmul.msk.f32.gmra.mxu1 %vm337_vm2, %v6257_v46 }
0x1c80   :  { %v3268_v48 = vpop.f32.mrf.mxu2 }
0x1c81   :  { %v3292_v56 = vadd.f32 %v3291_v4, %v3268_v48 }
0x1c88   :  { %v6261_v50 = vpop.f32.mrf.mxu2 }
0x1c89   :  { %v3295_v29 = vadd.f32 %v3294_v17, %v6261_v50 }
0x1c8a   :  { %v3346_v63 = vpop.f32.mrf.mxu1 }
0x1c8b   :  { %v3352_v49 = vadd.f32 %v3346_v63, %v3292_v56  ;;  %v4817_v56 = vld [vmem:[%s6520_s21 + $0x68] sm:$0xff] }
0x1c90   :  { %v3380_v51 = vpop.f32.mrf.mxu2 }
0x1c92   :  { %v3349_v55 = vpop.f32.mrf.mxu1 }
0x1c93   :  { %v3353_v32 = vadd.f32 %v3349_v55, %v3295_v29 }
0x1c98   :  { %v3383_v53 = vpop.f32.mrf.mxu2 }
0x1c99   :  { %3400 = vmatpush.msrb.mxu3 %v3383_v53 }
0x1c9a   :  { %v3460_v44 = vpop.f32.mrf.mxu1 }
0x1c9b   :  { %3401 = vmatpush.msrb.mxu3 %v3380_v51  ;;  %v4977_v51 = vld [vmem:[%s6516_s11 + $0x1] ss:$0 sm:$0xff] }
0x1c9c   :  { %4780 = vmatmul.msk.f32.vlgmr.msrb.gmra.mxu3 %vm337_vm2, %v6264_v58  ;;  %v3205_v50 = vadd.f32 %v4977_v51, %v6216_v16  ;;  %v3208_v16 = vadd.f32 %v4977_v51, %v6218_v24  ;;  %v4838_v51 = vld [vmem:[%s6519_s17 + $0x20] sm:$0xff] }
0x1c9d   :  { %3570 = vmatpush.msra.mxu3 %v3554_v1 }
0x1c9f   :  { %3571 = vmatpush.msra.mxu3 %v3553_v7 }
0x1ca1   :  { %3572 = vmatpush.msra.mxu3 %v3552_v10 }
0x1ca2   :  { %v3463_v36 = vpop.f32.mrf.mxu1 }
0x1ca3   :  { %3573 = vmatpush.msra.mxu3 %v3551_v12  ;;  %v4982_v12 = vld [vmem:[%s6521_s29] ss:$0 sm:$0xff] }
0x1ca4   :  { %4781 = vmatmul.msk.f32.gmra.mxu3 %vm337_vm2, %v6269_v59 }
0x1ca5   :  { %3676 = vmatpush.msrb.mxu3 %v4811_v19 }
0x1ca7   :  { %3677 = vmatpush.msrb.mxu3 %v4810_v60  ;;  %v4816_v60 = vld [vmem:[%s6520_s21 + $0x60] sm:$0xff] }
0x1ca9   :  { %3678 = vmatpush.msrb.mxu3 %v4809_v21 }
0x1cab   :  { %3679 = vmatpush.msrb.mxu3 %v4808_v45 }
0x1d1f   :  { %v3403_v47 = vpop.f32.mrf.mxu3 }
0x1d20   :  { %v3409_v23 = vadd.f32 %v3403_v47, %v3352_v49 }
0x1d22   :  { %v3466_v26 = vadd.f32 %v3460_v44, %v3409_v23  ;;  %v3550_v23 = vld [vmem:[%s6522_s3] sm:$0x1] }
0x1d24   :  { %v3471_v31 = vadd.f32 %v4978_v18, %v3466_v26  ;;  %v4841_v26 = vld [vmem:[%s6519_s17 + $0x38] sm:$0xff] }
0x1d26   :  { %v3473_v30 = vmax.f32 %v3471_v31, 0.0  ;;  %v4847_v31 = vld [vmem:[%s6520_s21 + $0xf8] sm:$0xff] }
0x1d27   :  { %v3406_v35 = vpop.f32.mrf.mxu3 }
0x1d28   :  { %v3478_v39 = vsub.f32 %v3473_v30, %v4979_v20  ;;  %v3410_v48 = vadd.f32 %v3406_v35, %v3353_v32  ;;  %v4840_v32 = vld [vmem:[%s6519_s17 + $0x30] sm:$0xff] }
0x1d29   :  { %v4850_v30 = vld [vmem:[%s6520_s21 + $0xb0] sm:$0xff] }
0x1d2a   :  { %v3494_v53 = vmul.f32 %v3492_v34, %v3478_v39  ;;  %v3467_v62 = vadd.f32 %v3463_v36, %v3410_v48  ;;  %v4846_v35 = vld [vmem:[%s6520_s21 + $0xf0] sm:$0xff]  ;;  %v4839_v36 = vld [vmem:[%s6519_s17 + $0x28] sm:$0xff] }
0x1d2b   :  { %v4849_v39 = vld [vmem:[%s6520_s21 + $0xa8] sm:$0xff] }
0x1d2c   :  { %v3499_v63 = vmul.f32 %v4980_v41, %v3494_v53  ;;  %v3472_v0 = vadd.f32 %v4978_v18, %v3467_v62  ;;  %v3830_v18 = vadd.f32 1e-05, %v3550_v23  ;;  %v4848_v53 = vld [vmem:[%s6520_s21 + $0xa0] sm:$0xff] }
0x1d2e   :  { %v3504_v1 = vadd.f32 %v4981_v61, %v3499_v63  ;;  %v3474_v2 = vmax.f32 %v3472_v0, 0.0  ;;  %5080 = vrsqrt.f32 %v3830_v18  ;;  %vm3837_vm6 = vweird.f32 %v3830_v18 }
0x1d30   :  { %v3506_v3 = vadd.f32 %v3504_v1, %v3205_v50  ;;  %v3479_v4 = vsub.f32 %v3474_v2, %v4979_v20  ;;  %v4861_v2 = vld [vmem:[%s6520_s21 + $0xd8] sm:$0xff] }
0x1d32   :  { %v3495_v7 = vmul.f32 %v3492_v34, %v3479_v4  ;;  %4794 = vmatmul.msk.f32.vlgmr.msra.gmra.mxu2 %vm195_vm0, %v3506_v3  ;;  %4796 = vmatmul.msk.f32.vlgmr.msra.gmra.mxu3 %vm195_vm0, %v3506_v3 }
0x1d33   :  { %4802 = vmatmul.msk.f32.vlgmr.msrb.gmra.mxu0 %vm195_vm0, %v3506_v3  ;;  %3782 = vmatpush.msra.mxu3 %v4827_v6 }
0x1d34   :  { %v3500_v8 = vmul.f32 %v4980_v41, %v3495_v7  ;;  %v5081_v20 = vpop.eup %5080  ;;  %v4845_v41 = vld [vmem:[%s6520_s21 + $0xe8] sm:$0xff] }
0x1d35   :  { %3783 = vmatpush.msra.mxu3 %v4826_v5  ;;  %v3832_v48 = vmul.f32 %v5081_v20, %v3830_v18  ;;  %vm3838_vm7 = vweird.f32 %v5081_v20  ;;  %v4859_v7 = vld [vmem:[%s6520_s21 + $0xc8] sm:$0xff] }
0x1d36   :  { %v3505_v10 = vadd.f32 %v4981_v61, %v3500_v8  ;;  %v4844_v61 = vld [vmem:[%s6520_s21 + $0xe0] sm:$0xff]  ;;  %vm3839_vm8 = vmor %vm3837_vm6, %vm3838_vm7 }
0x1d37   :  { %3784 = vmatpush.msra.mxu3 %v4825_v9  ;;  %v3833_v62 = vmul.f32 %v5081_v20, %v3832_v48 }
0x1d38   :  { %v3507_v11 = vadd.f32 %v3505_v10, %v3208_v16  ;;  %v4858_v16 = vld [vmem:[%s6520_s21 + $0xc0] sm:$0xff] }
0x1d39   :  { %3785 = vmatpush.msra.mxu3 %v4824_v14  ;;  %v3834_v50 = vmul.f32 0.5, %v3833_v62  ;;  %v4984_v14 = vld [vmem:[%s6523_s8] ss:$0 sm:$0xff]  ;;  %v4869_v62 = vld [vmem:[%s6520_s21 + $0x118] sm:$0xff] }
0x1d3a   :  { %4795 = vmatmul.msk.f32.gmra.mxu2 %vm195_vm0, %v3507_v11  ;;  %4797 = vmatmul.msk.f32.gmra.mxu3 %vm195_vm0, %v3507_v11 }
0x1d3b   :  { %4803 = vmatmul.msk.f32.gmra.mxu0 %vm195_vm0, %v3507_v11  ;;  %v3835_v1 = vsub.f32 1.5, %v3834_v50  ;;  %v4866_v50 = vld [vmem:[%s6520_s21 + $0x100] sm:$0xff] }
0x1d3d   :  { %v3836_v9 = vmul.f32 %v5081_v20, %v3835_v1 }
0x1d42   :  { %4806 = vmatmul.msk.f32.vlgmr.msrb.gmra.mxu2 %vm195_vm0, %v3506_v3  ;;  %4812 = vmatmul.msk.f32.vlgmr.msrb.gmra.mxu3 %vm195_vm0, %v3506_v3 }
0x1d4a   :  { %4807 = vmatmul.msk.f32.gmra.mxu2 %vm195_vm0, %v3507_v11  ;;  %4813 = vmatmul.msk.f32.gmra.mxu3 %vm195_vm0, %v3507_v11 }
0x1d52   :  { %4828 = vmatmul.msk.f32.vlgmr.msra.gmra.mxu3 %vm195_vm0, %v3506_v3 }
0x1d5a   :  { %4829 = vmatmul.msk.f32.gmra.mxu3 %vm195_vm0, %v3507_v11 }
0x1db0   :  { %v3607_v24 = vpop.f32.mrf.mxu0 }
0x1db5   :  { %v3539_v15 = vpop.f32.mrf.mxu2  ;;  %v6319_v38 = vpop.f32.mrf.mxu3 }
0x1db6   :  { %v6321_v55 = vadd.f32 %v4982_v12, %v3539_v15 }
0x1db8   :  { %4224 = vst.msk [vmem:[#allocation4] sm:$0xff] %vm337_vm2, %v6321_v55  ;;  %v3610_v17 = vpop.f32.mrf.mxu0 }
0x1db9   :  { %3627 = vmatpush.msrb.mxu1 %v3610_v17  ;;  %v4985_v17 = vld [vmem:[%s6524_s14] ss:$0 sm:$0xff] }
0x1dbb   :  { %3628 = vmatpush.msrb.mxu1 %v3607_v24  ;;  %v3840_v24 = vsel %vm3839_vm8, %v5081_v20, %v3836_v9  ;;  %v4877_v20 = vld [vmem:[%s6520_s21 + $0x138] sm:$0xff] }
0x1dbc   :  { %4804 = vmatmul.msk.f32.vlgmr.msrb.gmra.mxu1 %vm337_vm2, %v6222_v27 }
0x1dbd   :  { %v3542_v13 = vpop.f32.mrf.mxu2  ;;  %v6329_v19 = vpop.f32.mrf.mxu3  ;;  %3729 = vmatpush.msra.mxu1 %v4819_v57 }
0x1dbe   :  { %v6331_v42 = vadd.f32 %v4982_v12, %v3542_v13  ;;  %v3842_v13 = vperm.slane %v3840_v24, 0 }
0x1dbf   :  { %3730 = vmatpush.msra.mxu1 %v4818_v25 }
0x1dc0   :  { %4225 = vst.msk [vmem:[#allocation4 + $0x8] sm:$0xff] %vm337_vm2, %v6331_v42 }
0x1dc1   :  { %3731 = vmatpush.msra.mxu1 %v4817_v56 }
0x1dc3   :  { %3732 = vmatpush.msra.mxu1 %v4816_v60 }
0x1dc4   :  { %4805 = vmatmul.msk.f32.gmra.mxu1 %vm337_vm2, %v6231_v33 }
0x1dc5   :  { %v3681_v44 = vpop.f32.mrf.mxu3  ;;  %3896 = vmatpush.msrb.mxu1 %v4841_v26  ;;  %v3653_v34 = vpop.f32.mrf.mxu2 }
0x1dc7   :  { %3897 = vmatpush.msrb.mxu1 %v4840_v32 }
0x1dc9   :  { %3898 = vmatpush.msrb.mxu1 %v4839_v36 }
0x1dcb   :  { %3899 = vmatpush.msrb.mxu1 %v4838_v51 }
0x1dcc   :  { %4820 = vmatmul.msk.f32.vlgmr.msra.gmra.mxu1 %vm195_vm0, %v3506_v3  ;;  %v4860_v3 = vld [vmem:[%s6520_s21 + $0xd0] sm:$0xff] }
0x1dcd   :  { %v3684_v52 = vpop.f32.mrf.mxu3  ;;  %v3656_v0 = vpop.f32.mrf.mxu2  ;;  %4003 = vmatpush.msra.mxu1 %v4861_v2 }
0x1dce   :  { %3701 = vmatpush.msra.mxu0 %v3684_v52  ;;  %v4986_v52 = vld [vmem:[%s6525_s19] ss:$0 sm:$0xff] }
0x1dcf   :  { %4004 = vmatpush.msra.mxu1 %v4860_v3 }
0x1dd0   :  { %3702 = vmatpush.msra.mxu0 %v3681_v44 }
0x1dd1   :  { %4814 = vmatmul.msk.f32.vlgmr.msra.gmra.mxu0 %vm337_vm2, %v6239_v37  ;;  %4005 = vmatpush.msra.mxu1 %v4859_v7 }
0x1dd3   :  { %4006 = vmatpush.msra.mxu1 %v4858_v16  ;;  %v4186_v16 = vld [vmem:[%s6528_s6 + $0x8] sm:$0xff] }
0x1dd4   :  { %4821 = vmatmul.msk.f32.gmra.mxu1 %vm195_vm0, %v3507_v11 }
0x1dd5   :  { %v3787_v21 = vpop.f32.mrf.mxu3 }
0x1dd9   :  { %4815 = vmatmul.msk.f32.gmra.mxu0 %vm337_vm2, %v6246_v40 }
0x1ddd   :  { %v3790_v49 = vpop.f32.mrf.mxu3 }
0x1dde   :  { %3807 = vmatpush.msrb.mxu0 %v3790_v49  ;;  %v4983_v49 = vld [vmem:[%s6526_s24] ss:$0 sm:$0xff] }
0x1de0   :  { %3808 = vmatpush.msrb.mxu0 %v3787_v21 }
0x1de1   :  { %4830 = vmatmul.msk.f32.vlgmr.msrb.gmra.mxu0 %vm337_vm2, %v6252_v43 }
0x1de2   :  { %3975 = vmatpush.msra.mxu0 %v4847_v31 }
0x1de4   :  { %3976 = vmatpush.msra.mxu0 %v4846_v35  ;;  %v4875_v35 = vld [vmem:[%s6520_s21 + $0x128] sm:$0xff] }
0x1de6   :  { %3977 = vmatpush.msra.mxu0 %v4845_v41 }
0x1de8   :  { %3978 = vmatpush.msra.mxu0 %v4844_v61 }
0x1de9   :  { %4831 = vmatmul.msk.f32.gmra.mxu0 %vm337_vm2, %v6257_v46 }
0x1e39   :  { %v3630_v47 = vpop.f32.mrf.mxu1 }
0x1e3a   :  { %v3654_v4 = vadd.f32 %v3653_v34, %v3630_v47 }
0x1e41   :  { %v6349_v22 = vpop.f32.mrf.mxu1 }
0x1e42   :  { %v3657_v12 = vadd.f32 %v3656_v0, %v6349_v22  ;;  %v3576_v22 = vadd.f32 %v4983_v49, %v6319_v38  ;;  %v3579_v38 = vadd.f32 %v4983_v49, %v6329_v19  ;;  %v4867_v0 = vld [vmem:[%s6520_s21 + $0x108] sm:$0xff]  ;;  %v4990_v49 = vld [vmem:[%s6524_s14 + $0x1] ss:$0 sm:$0xff] }
0x1e49   :  { %v3734_v54 = vpop.f32.mrf.mxu1 }
0x1e4e   :  { %v3704_v29 = vpop.f32.mrf.mxu0 }
0x1e4f   :  { %v3710_v5 = vadd.f32 %v3704_v29, %v3654_v4 }
0x1e51   :  { %v3737_v45 = vpop.f32.mrf.mxu1 }
0x1e52   :  { %3754 = vmatpush.msra.mxu2 %v3737_v45 }
0x1e54   :  { %3755 = vmatpush.msra.mxu2 %v3734_v54  ;;  %v4987_v54 = vld [vmem:[%s6527_s30] ss:$0 sm:$0xff] }
0x1e55   :  { %4822 = vmatmul.msk.f32.vlgmr.msra.gmra.mxu2 %vm337_vm2, %v6264_v58 }
0x1e56   :  { %3929 = vmatpush.msrb.mxu2 %v4851_v28  ;;  %v3707_v63 = vpop.f32.mrf.mxu0 }
0x1e57   :  { %v3711_v57 = vadd.f32 %v3707_v63, %v3657_v12  ;;  %v4868_v63 = vld [vmem:[%s6520_s21 + $0x110] sm:$0xff] }
0x1e58   :  { %3930 = vmatpush.msrb.mxu2 %v4850_v30  ;;  %v4876_v30 = vld [vmem:[%s6520_s21 + $0x130] sm:$0xff] }
0x1e5a   :  { %3931 = vmatpush.msrb.mxu2 %v4849_v39  ;;  %v4874_v39 = vld [vmem:[%s6520_s21 + $0x120] sm:$0xff] }
0x1e5c   :  { %3932 = vmatpush.msrb.mxu2 %v4848_v53 }
0x1e5d   :  { %4823 = vmatmul.msk.f32.gmra.mxu2 %vm337_vm2, %v6269_v59 }
0x1e5e   :  { %v3810_v6 = vpop.f32.mrf.mxu0 }
0x1e66   :  { %v3813_v60 = vpop.f32.mrf.mxu0 }
0x1ed8   :  { %v3757_v8 = vpop.f32.mrf.mxu2 }
0x1ed9   :  { %v3763_v10 = vadd.f32 %v3757_v8, %v3710_v5  ;;  %v4187_v8 = vld [vmem:[%s6528_s6 + $0x10] sm:$0xff] }
0x1edb   :  { %v3816_v11 = vadd.f32 %v3810_v6, %v3763_v10  ;;  %v4185_v10 = vld [vmem:[%s6528_s6] sm:$0xff] }
0x1edd   :  { %v3821_v15 = vadd.f32 %v4984_v14, %v3816_v11 }
0x1edf   :  { %v3823_v25 = vmax.f32 %v3821_v15, 0.0 }
0x1ee0   :  { %v3760_v56 = vpop.f32.mrf.mxu2 }
0x1ee1   :  { %v3828_v44 = vsub.f32 %v3823_v25, %v4985_v17  ;;  %v3764_v21 = vadd.f32 %v3760_v56, %v3711_v57  ;;  %v4989_v56 = vld [vmem:[%s6523_s8 + $0x1] ss:$0 sm:$0xff] }
0x1ee3   :  { %v3844_v47 = vmul.f32 %v3842_v13, %v3828_v44  ;;  %v3817_v45 = vadd.f32 %v3813_v60, %v3764_v21 }
0x1ee5   :  { %v3849_v23 = vmul.f32 %v4986_v52, %v3844_v47  ;;  %v3822_v18 = vadd.f32 %v4984_v14, %v3817_v45 }
0x1ee7   :  { %v3854_v26 = vadd.f32 %v4987_v54, %v3849_v23  ;;  %v3824_v28 = vmax.f32 %v3822_v18, 0.0 }
0x1ee9   :  { %v3856_v29 = vadd.f32 %v3854_v26, %v3576_v22  ;;  %v3829_v31 = vsub.f32 %v3824_v28, %v4985_v17  ;;  %v4991_v26 = vld [vmem:[%s6525_s19 + $0x1] ss:$0 sm:$0xff] }
0x1eeb   :  { %v3845_v32 = vmul.f32 %v3842_v13, %v3829_v31  ;;  %4842 = vmatmul.msk.f32.vlgmr.msrb.gmra.mxu1 %vm195_vm0, %v3856_v29  ;;  %4852 = vmatmul.msk.f32.vlgmr.msrb.gmra.mxu2 %vm195_vm0, %v3856_v29 }
0x1eec   :  { %4856 = vmatmul.msk.f32.vlgmr.msra.gmra.mxu0 %vm195_vm0, %v3856_v29  ;;  %4109 = vmatpush.msrb.mxu1 %v4877_v20  ;;  %v4992_v20 = vld [vmem:[%s6527_s30 + $0x1] ss:$0 sm:$0xff] }
0x1eed   :  { %v3850_v34 = vmul.f32 %v4986_v52, %v3845_v32 }
0x1eee   :  { %4110 = vmatpush.msrb.mxu1 %v4876_v30 }
0x1eef   :  { %v3855_v36 = vadd.f32 %v4987_v54, %v3850_v34 }
0x1ef0   :  { %4111 = vmatpush.msrb.mxu1 %v4875_v35 }
0x1ef1   :  { %v3857_v41 = vadd.f32 %v3855_v36, %v3579_v38 }
0x1ef2   :  { %4112 = vmatpush.msrb.mxu1 %v4874_v39 }
0x1ef3   :  { %4843 = vmatmul.msk.f32.gmra.mxu1 %vm195_vm0, %v3857_v41  ;;  %4853 = vmatmul.msk.f32.gmra.mxu2 %vm195_vm0, %v3857_v41 }
0x1ef4   :  { %4857 = vmatmul.msk.f32.gmra.mxu0 %vm195_vm0, %v3857_v41 }
0x1efb   :  { %4862 = vmatmul.msk.f32.vlgmr.msra.gmra.mxu1 %vm195_vm0, %v3856_v29 }
0x1f03   :  { %4863 = vmatmul.msk.f32.gmra.mxu1 %vm195_vm0, %v3857_v41 }
0x1f0b   :  { %4878 = vmatmul.msk.f32.vlgmr.msrb.gmra.mxu1 %vm195_vm0, %v3856_v29 }
0x1f13   :  { %4879 = vmatmul.msk.f32.gmra.mxu1 %vm195_vm0, %v3857_v41 }
0x1f68   :  { %v6394_v19 = vpop.f32.mrf.mxu1 }
0x1f69   :  { %v3980_v5 = vpop.f32.mrf.mxu0 }
0x1f6e   :  { %v3934_v48 = vpop.f32.mrf.mxu2 }
0x1f70   :  { %v6396_v51 = vpop.f32.mrf.mxu1 }
0x1f71   :  { %v3983_v11 = vpop.f32.mrf.mxu0 }
0x1f76   :  { %v3937_v53 = vpop.f32.mrf.mxu2 }
0x1f77   :  { %3954 = vmatpush.msrb.mxu3 %v3937_v53 }
0x1f78   :  { %v4008_v61 = vpop.f32.mrf.mxu1 }
0x1f79   :  { %3955 = vmatpush.msrb.mxu3 %v3934_v48 }
0x1f7a   :  { %4854 = vmatmul.msk.f32.vlgmr.msrb.gmra.mxu3 %vm337_vm2, %v6222_v27 }
0x1f7b   :  { %4056 = vmatpush.msra.mxu3 %v4869_v62 }
0x1f7d   :  { %4057 = vmatpush.msra.mxu3 %v4868_v63 }
0x1f7f   :  { %4058 = vmatpush.msra.mxu3 %v4867_v0 }
0x1f80   :  { %v4011_v1 = vpop.f32.mrf.mxu1 }
0x1f81   :  { %4028 = vmatpush.msra.mxu2 %v4011_v1  ;;  %4059 = vmatpush.msra.mxu3 %v4866_v50 }
0x1f82   :  { %4855 = vmatmul.msk.f32.gmra.mxu3 %vm337_vm2, %v6231_v33 }
0x1f83   :  { %4029 = vmatpush.msra.mxu2 %v4008_v61 }
0x1f84   :  { %4864 = vmatmul.msk.f32.vlgmr.msra.gmra.mxu2 %vm337_vm2, %v6239_v37 }
0x1f88   :  { %v4114_v2 = vpop.f32.mrf.mxu1 }
0x1f8a   :  { %4870 = vmatmul.msk.f32.vlgmr.msra.gmra.mxu3 %vm195_vm0, %v3856_v29  ;;  %v4988_v29 = vld [vmem:[%s6526_s24 + $0x1] ss:$0 sm:$0xff] }
0x1f8b   :  { %v3902_v35 = vadd.f32 %v4988_v29, %v6394_v19  ;;  %v3905_v61 = vadd.f32 %v4988_v29, %v6396_v51 }
0x1f8c   :  { %4865 = vmatmul.msk.f32.gmra.mxu2 %vm337_vm2, %v6246_v40  ;;  %v4837_v40 = vld [vmem:[%s6522_s3 + $0x1] sm:$0x1] }
0x1f90   :  { %v4117_v27 = vpop.f32.mrf.mxu1 }
0x1f91   :  { %4134 = vmatpush.msrb.mxu2 %v4117_v27 }
0x1f92   :  { %4871 = vmatmul.msk.f32.gmra.mxu3 %vm195_vm0, %v3857_v41 }
0x1f93   :  { %4135 = vmatpush.msrb.mxu2 %v4114_v2 }
0x1f94   :  { %4880 = vmatmul.msk.f32.vlgmr.msrb.gmra.mxu2 %vm337_vm2, %v6252_v43  ;;  %v4157_v43 = vadd.f32 1e-05, %v4837_v40 }
0x1f96   :  { %5082 = vrsqrt.f32 %v4157_v43  ;;  %vm4164_vm9 = vweird.f32 %v4157_v43 }
0x1f9c   :  { %4881 = vmatmul.msk.f32.gmra.mxu2 %vm337_vm2, %v6257_v46  ;;  %v4188_v46 = vld [vmem:[%s6528_s6 + $0x18] sm:$0xff]  ;;  %v5083_v7 = vpop.eup %5082 }
0x1f9d   :  { %4211 = vmatpush.msrb.mxu3 %v4188_v46  ;;  %v4159_v9 = vmul.f32 %v5083_v7, %v4157_v43  ;;  %vm4165_vm10 = vweird.f32 %v5083_v7 }
0x1f9e   :  { %vm4166_vm11 = vmor %vm4164_vm9, %vm4165_vm10 }
0x1f9f   :  { %4212 = vmatpush.msrb.mxu3 %v4187_v8 }
0x1fa1   :  { %4213 = vmatpush.msrb.mxu3 %v4186_v16 }
0x1fa3   :  { %4214 = vmatpush.msrb.mxu3 %v4185_v10 }
0x1ffd   :  { %v3957_v33 = vpop.f32.mrf.mxu3 }
0x1ffe   :  { %v3981_v12 = vadd.f32 %v3980_v5, %v3957_v33 }
0x2005   :  { %v3960_v37 = vpop.f32.mrf.mxu3 }
0x2006   :  { %v3984_v52 = vadd.f32 %v3983_v11, %v3960_v37 }
0x2007   :  { %v4031_v6 = vpop.f32.mrf.mxu2 }
0x2008   :  { %v4037_v17 = vadd.f32 %v4031_v6, %v3981_v12 }
0x200d   :  { %v4061_v3 = vpop.f32.mrf.mxu3 }
0x200f   :  { %v4034_v14 = vpop.f32.mrf.mxu2 }
0x2010   :  { %v4038_v47 = vadd.f32 %v4034_v14, %v3984_v52 }
0x2015   :  { %v4064_v4 = vpop.f32.mrf.mxu3 }
0x2016   :  { %4081 = vmatpush.msrb.mxu0 %v4064_v4 }
0x2017   :  { %v4137_v15 = vpop.f32.mrf.mxu2 }
0x2018   :  { %4082 = vmatpush.msrb.mxu0 %v4061_v3 }
0x2019   :  { %4872 = vmatmul.msk.f32.vlgmr.msrb.gmra.mxu0 %vm337_vm2, %v6264_v58  ;;  %v4160_v58 = vmul.f32 %v5083_v7, %v4159_v9 }
0x201f   :  { %v4140_v18 = vpop.f32.mrf.mxu2 }
0x2021   :  { %4873 = vmatmul.msk.f32.gmra.mxu0 %vm337_vm2, %v6269_v59  ;;  %v4161_v59 = vmul.f32 0.5, %v4160_v58 }
0x2023   :  { %v4162_v24 = vsub.f32 1.5, %v4161_v59 }
0x2025   :  { %v4163_v25 = vmul.f32 %v5083_v7, %v4162_v24 }
0x2027   :  { %v4167_v44 = vsel %vm4166_vm11, %v5083_v7, %v4163_v25 }
0x2028   :  { %v4169_v45 = vperm.slane %v4167_v44, 0 }
0x2096   :  { %v4084_v57 = vpop.f32.mrf.mxu0 }
0x2097   :  { %v4090_v13 = vadd.f32 %v4084_v57, %v4037_v17 }
0x2099   :  { %v4143_v60 = vadd.f32 %v4137_v15, %v4090_v13 }
0x209b   :  { %v4148_v21 = vadd.f32 %v4989_v56, %v4143_v60 }
0x209d   :  { %v4150_v54 = vmax.f32 %v4148_v21, 0.0 }
0x209e   :  { %v4087_v23 = vpop.f32.mrf.mxu0 }
0x209f   :  { %v4155_v22 = vsub.f32 %v4150_v54, %v4990_v49  ;;  %v4091_v28 = vadd.f32 %v4087_v23, %v4038_v47 }
0x20a1   :  { %v4171_v31 = vmul.f32 %v4169_v45, %v4155_v22  ;;  %v4144_v32 = vadd.f32 %v4140_v18, %v4091_v28 }
0x20a3   :  { %v4176_v30 = vmul.f32 %v4991_v26, %v4171_v31  ;;  %v4149_v34 = vadd.f32 %v4989_v56, %v4144_v32 }
0x20a5   :  { %v4181_v38 = vadd.f32 %v4992_v20, %v4176_v30  ;;  %v4151_v36 = vmax.f32 %v4149_v34, 0.0 }
0x20a7   :  { %v4183_v39 = vadd.f32 %v4181_v38, %v3902_v35  ;;  %v4156_v41 = vsub.f32 %v4151_v36, %v4990_v49 }
0x20a9   :  { %v4172_v48 = vmul.f32 %v4169_v45, %v4156_v41  ;;  %4882 = vmatmul.msk.f32.vlgmr.msrb.gmra.mxu3 %vm195_vm0, %v4183_v39 }
0x20ab   :  { %v4177_v53 = vmul.f32 %v4991_v26, %v4172_v48 }
0x20ad   :  { %v4182_v62 = vadd.f32 %v4992_v20, %v4177_v53 }
0x20af   :  { %v4184_v63 = vadd.f32 %v4182_v62, %v3905_v61 }
0x20b1   :  { %4883 = vmatmul.msk.f32.gmra.mxu3 %vm195_vm0, %v4184_v63 }
0x20b2   :  { %5117 = shalt.err (!%p5114_p4)
}
0x20b3   :  { %s5191_s12 = smov 128   ;;  %s6529_s22 = sld [smem:[#allocation18_spill]] }
0x20b4   :  { %s5192_s23 = smov 8   ;;  %s5193_s25 = smov [#allocation2]  }
0x20b5   :  { %4253 = dma.vmem_to_hbm [thread:$0]  %s4246_s27, 256, %s4248_s16, [#allocation5], %s5191_s12, %s5191_s12, %s5192_s23  }
0x20b6   :  { %s4232_s26 = sshll.u32 %s5193_s25, 4  ;;  %s4234_s28 = sshll.u32 %s5412_s13, 4  ;;  %s4233_s26 = int_to_ptr.vmem [resolvable:$true] %s4232_s26  ;;  %s4235_s28 = int_to_ptr.hbm [resolvable:$true] %s4234_s28 }
0x20b7   :  { %s5130_s1 = sshra.s32 %s4235_s28, 4  ;;  %s5134_s4 = scalar_lea.hbm %s5412_s13, 16  ;;  %s5131_s1 = int_to_ptr.hbm [resolvable:$true] %s5130_s1 }
0x20b8   :  { %s5132_s2 = scalar_lea.hbm %s5131_s1, 16  ;;  %p5135_p6 = scmp.lt.s32.totalorder %s5131_s1, %s5412_s13 }
0x20b9   :  { %v4993_v19 = vld [vmem:[%s6529_s22] ss:$0 sm:$0xff]  ;;  %p5133_p5 = scmp.ne.s32.totalorder %s5131_s1, %s5132_s2  ;;  %p5136_p7 = scmp.lt.s32.totalorder %s5134_s4, %s5132_s2 }
0x20bb   :  { %p5137_p8 = por %p5136_p7, %p5135_p6 }
0x20bd   :  { %p5138_p9 = pnand %p5137_p8, %p5133_p5 }
0x212c   :  { %v4216_v51 = vpop.f32.mrf.mxu3 }
0x212d   :  { %v4217_v0 = vadd.f32 %v4993_v19, %v4216_v51 }
0x212f   :  { %v4222_v50 = vadd.f32 %v4217_v0, %v6321_v55 }
0x2131   :  { %4226 = vst.msk [vmem:[#allocation2] sm:$0xff] %vm337_vm2, %v4222_v50 }
0x2134   :  { %v4219_v1 = vpop.f32.mrf.mxu3 }
0x2135   :  { %v4220_v2 = vadd.f32 %v4993_v19, %v4219_v1 }
0x2137   :  { %v4223_v27 = vadd.f32 %v4220_v2, %v6331_v42 }
0x2139   :  { %4227 = vst.msk [vmem:[#allocation2 + $0x8] sm:$0xff] %vm337_vm2, %v4223_v27 }
0x213a   :  { %5141 = shalt.err (!%p5138_p9)
}
0x213b   :  { %4240 = dma.vmem_to_hbm [thread:$0]  %s4233_s26, 256, %s4235_s28, [#allocation3], %s5191_s12, %s5191_s12, %s5192_s23  }
0x213c   :  { %5142 = dma.done.wait [#allocation3], 256  }
0x213d   :  { %5143 = vsyncadd [#allocation3], 4294967040 }
0x213e   :  { %5144 = dma.done.wait [#allocation5], 256  }
0x213f   :  { %5145 = vsyncadd [#allocation5], 4294967040 }
0x2140   :  { %4262 = vsyncpa [#allocation3], 1 }
0x2141   :  { %4263 = vsyncpa [#allocation5], 1 }

</bundles_post_ra>
